<compile_context>
chip_gen: v7x
topology: tpu7x:2x2x1
jax: 0.10.0
libtpu: 0.0.40
codegen_flags: <defaults>
</compile_context>

<pallas_src>
import jax
import jax.numpy as jnp
import numpy as np
from jax.experimental import pallas as pl
from jax.experimental.pallas import tpu as pltpu


# ----------------------------- fused kernel --------------------------------
def _fused_encoder_kernel(xc_ref, w1_ref, b1_ref, w2_ref, b2_ref,
                          w3_ref, b3_ref, o_ref,
                          pad2_ref, patch2_ref, pad3_ref, patch3_ref):
    # Static shapes derived from the scratch refs.
    B = pad2_ref.shape[0]
    H1, W1, C1 = pad2_ref.shape[1] - 2, pad2_ref.shape[2] - 2, pad2_ref.shape[3]
    H2, W2, C2 = pad3_ref.shape[1] - 2, pad3_ref.shape[2] - 2, pad3_ref.shape[3]
    H0, W0 = 2 * H1, 2 * W1
    C3 = o_ref.shape[2]
    K1 = xc_ref.shape[2]
    bf16 = jnp.bfloat16

    # ---------- layer 1: conv (im2col pre-packed in wrapper) + bias + ReLU --
    # xc: (B, H0*W0, 27) bf16 ; leading-dim reshape is free ; f32 accumulation.
    x2d = xc_ref[...].reshape(B * H0 * W0, K1)
    a1 = jnp.dot(x2d, w1_ref[...], preferred_element_type=jnp.float32)
    a1 = jnp.maximum(a1 + b1_ref[...], 0.0)                  # (B*H0*W0, C1) f32

    # ---------- maxpool 2x2 #1 ----------------------------------------------
    # vertical pairs land on a leading dim (cheap); horizontal pairs via the
    # (W1, 2, C) reshape (proven lowering at this size).
    a1 = jnp.max(a1.reshape(B * H1, 2, W0, C1), axis=1)       # (B*H1, W0, C1)
    p1 = jnp.max(a1.reshape(B * H1, W1, 2, C1), axis=2)       # (B*H1, W1, C1)

    # ---------- layer 2: border-zero pad + bf16 im2col + ONE matmul ----------
    # Border-only zeroing (interior is fully overwritten below).  Do NOT gate
    # this with program_id==0: under "parallel" semantics the second core on
    # v7x never executes pid 0.
    pad2_ref[:, 0:1, :, :] = jnp.zeros((B, 1, W1 + 2, C1), bf16)
    pad2_ref[:, H1 + 1:H1 + 2, :, :] = jnp.zeros((B, 1, W1 + 2, C1), bf16)
    pad2_ref[:, :, 0:1, :] = jnp.zeros((B, H1 + 2, 1, C1), bf16)
    pad2_ref[:, :, W1 + 1:W1 + 2, :] = jnp.zeros((B, H1 + 2, 1, C1), bf16)
    pad2_ref[:, 1:1 + H1, 1:1 + W1, :] = p1.reshape(B, H1, W1, C1).astype(bf16)

    # im2col into bf16 scratch; pair two 64-wide taps -> one 128-lane store.
    for t in range(0, 8, 2):
        dy0, dx0 = divmod(t, 3)
        dy1, dx1 = divmod(t + 1, 3)
        s0 = pad2_ref[:, dy0:dy0 + H1, dx0:dx0 + W1, :]
        s1 = pad2_ref[:, dy1:dy1 + H1, dx1:dx1 + W1, :]
        pair = jnp.concatenate([s0, s1], axis=-1)             # (B,H1,W1,128)
        patch2_ref[:, t * C1:(t + 2) * C1] = pair.reshape(B * H1 * W1, 2 * C1)
    patch2_ref[:, 8 * C1:9 * C1] = (
        pad2_ref[:, 2:2 + H1, 2:2 + W1, :].reshape(B * H1 * W1, C1))

    a2 = jnp.dot(patch2_ref[...], w2_ref[...],
                 preferred_element_type=jnp.float32)          # (B*H1*W1, C2)
    a2 = jnp.maximum(a2 + b2_ref[...], 0.0)

    # ---------- maxpool 2x2 #2 ----------------------------------------------
    a2 = jnp.max(a2.reshape(B * H2, 2, W1, C2), axis=1)       # (B*H2, W1, C2)
    p2 = jnp.max(a2.reshape(B * H2, W2, 2, C2), axis=2)       # (B*H2, W2, C2)

    # ---------- layer 3: border-zero pad + bf16 im2col + ONE matmul ----------
    pad3_ref[:, 0:1, :, :] = jnp.zeros((B, 1, W2 + 2, C2), bf16)
    pad3_ref[:, H2 + 1:H2 + 2, :, :] = jnp.zeros((B, 1, W2 + 2, C2), bf16)
    pad3_ref[:, :, 0:1, :] = jnp.zeros((B, H2 + 2, 1, C2), bf16)
    pad3_ref[:, :, W2 + 1:W2 + 2, :] = jnp.zeros((B, H2 + 2, 1, C2), bf16)
    pad3_ref[:, 1:1 + H2, 1:1 + W2, :] = p2.reshape(B, H2, W2, C2).astype(bf16)

    for t in range(9):                      # C2 = 128: already 128-lane dense
        dy, dx = divmod(t, 3)
        patch3_ref[:, t * C2:(t + 1) * C2] = (
            pad3_ref[:, dy:dy + H2, dx:dx + W2, :].reshape(B * H2 * W2, C2))

    a3 = jnp.dot(patch3_ref[...], w3_ref[...],
                 preferred_element_type=jnp.float32)          # (B*H2*W2, C3)
    a3 = jnp.maximum(a3 + b3_ref[...], 0.0)

    # Lane-dense output store: last dim = 256 (2x128).
    o_ref[...] = a3.reshape(B, H2 * W2, C3).astype(o_ref.dtype)


# ------------------------------ wrapper glue --------------------------------
def _im2col_3x3(x_nhwc):
    """(N, H, W, C) -> (N, H*W, 9*C) patches for a 3x3 'same' conv (XLA glue)."""
    N, H, W, C = x_nhwc.shape
    xp = jnp.pad(x_nhwc, ((0, 0), (1, 1), (1, 1), (0, 0)))
    cols = [xp[:, dy:dy + H, dx:dx + W, :]
            for dy in range(3) for dx in range(3)]
    return jnp.concatenate(cols, axis=-1).reshape(N, H * W, 9 * C)


def prepare_params(params):
    """One-time weight repack (call OUTSIDE jit): OIHW -> (9*Cin, Cout) bf16,
    bias -> (1, Cout) f32."""
    def pack(w, b):
        cout = w.shape[0]
        w_hwio = jnp.transpose(w, (2, 3, 1, 0))               # (3,3,Cin,Cout)
        return (w_hwio.reshape(-1, cout).astype(jnp.bfloat16),
                b.reshape(1, cout).astype(jnp.float32))
    w1, b1 = pack(params["w1"], params["b1"])
    w2, b2 = pack(params["w2"], params["b2"])
    w3, b3 = pack(params["w3"], params["b3"])
    return {"w1": w1, "b1": b1, "w2": w2, "b2": b2, "w3": w3, "b3": b3}


def _pick_batch_block(n):
    """Images per grid step: amortize per-step overhead but keep >=2 steps
    so megacore (v7x) still splits the grid."""
    for b in (8, 4, 2):
        if n % b == 0 and n // b >= 2:
            return b
    return 1


@jax.jit
def neural3d_forward(x_nchw, packed):
    """Matches Neural3DModel.forward: NCHW f32 in -> NCHW f32 features out."""
    N, Cin, H, W = x_nchw.shape
    assert Cin == 3 and H % 4 == 0 and W % 4 == 0
    H1, W1 = H // 2, W // 2
    H2, W2 = H // 4, W // 4
    C1, C2, C3 = 64, 128, 256
    B = _pick_batch_block(N)

    x_nhwc = jnp.transpose(x_nchw, (0, 2, 3, 1))
    # Layer-1 im2col in XLA glue (Cin=3 on lanes inside the kernel would waste
    # 125/128 lanes); bf16 halves the input DMA bytes.
    xc = _im2col_3x3(x_nhwc).astype(jnp.bfloat16)             # (N, H*W, 27)

    out = pl.pallas_call(
        _fused_encoder_kernel,
        out_shape=jax.ShapeDtypeStruct((N, H2 * W2, C3), jnp.float32),
        grid=(N // B,),
        in_specs=[
            pl.BlockSpec((B, H * W, 9 * Cin), lambda n: (n, 0, 0)),
            pl.BlockSpec((9 * Cin, C1), lambda n: (0, 0)),
            pl.BlockSpec((1, C1), lambda n: (0, 0)),
            pl.BlockSpec((9 * C1, C2), lambda n: (0, 0)),
            pl.BlockSpec((1, C2), lambda n: (0, 0)),
            pl.BlockSpec((9 * C2, C3), lambda n: (0, 0)),
            pl.BlockSpec((1, C3), lambda n: (0, 0)),
        ],
        out_specs=pl.BlockSpec((B, H2 * W2, C3), lambda n: (n, 0, 0)),
        scratch_shapes=[
            pltpu.VMEM((B, H1 + 2, W1 + 2, C1), jnp.bfloat16),  # padded act, L2
            pltpu.VMEM((B * H1 * W1, 9 * C1), jnp.bfloat16),    # im2col, L2
            pltpu.VMEM((B, H2 + 2, W2 + 2, C2), jnp.bfloat16),  # padded act, L3
            pltpu.VMEM((B * H2 * W2, 9 * C2), jnp.bfloat16),    # im2col, L3
        ],
        compiler_params=pltpu.CompilerParams(
            dimension_semantics=("parallel",)),                 # megacore on v7x
    )(xc, packed["w1"], packed["b1"], packed["w2"], packed["b2"],
      packed["w3"], packed["b3"])

    # Lane-dense (N, H2*W2, 256) -> NCHW to match the PyTorch module.
    return jnp.transpose(out.reshape(N, H2, W2, C3), (0, 3, 1, 2))


# ------------------------------ params & reference --------------------------
def init_params(key):
    """Deterministic synthetic parameters (PyTorch OIHW conv layout, f32)."""
    ks = jax.random.split(key, 6)

    def conv_init(kw, kb, cin, cout):
        fan_in = cin * 3 * 3
        scale = 1.0 / np.sqrt(fan_in)
        w = jax.random.uniform(kw, (cout, cin, 3, 3), jnp.float32, -scale, scale)
        b = jax.random.uniform(kb, (cout,), jnp.float32, -scale, scale)
        return w, b

    w1, b1 = conv_init(ks[0], ks[1], 3, 64)
    w2, b2 = conv_init(ks[2], ks[3], 64, 128)
    w3, b3 = conv_init(ks[4], ks[5], 128, 256)
    return {"w1": w1, "b1": b1, "w2": w2, "b2": b2, "w3": w3, "b3": b3}


def _reference_forward(x_nchw, params):
    def conv(x, w, b):
        y = jax.lax.conv_general_dilated(
            x, w, window_strides=(1, 1), padding="SAME",
            dimension_numbers=("NCHW", "OIHW", "NCHW"))
        return jnp.maximum(y + b[None, :, None, None], 0.0)

    def pool(x):
        return jax.lax.reduce_window(
            x, -jnp.inf, jax.lax.max,
            window_dimensions=(1, 1, 2, 2), window_strides=(1, 1, 2, 2),
            padding="VALID")

    x = conv(x_nchw, params["w1"], params["b1"]); x = pool(x)
    x = conv(x, params["w2"], params["b2"]); x = pool(x)
    x = conv(x, params["w3"], params["b3"])
    return x


if __name__ == "__main__":
    key = jax.random.PRNGKey(0)
    k_x, k_p = jax.random.split(key)
    x = jax.random.normal(k_x, (2, 3, 16, 16), jnp.float32)   # NCHW input
    params = init_params(k_p)
    packed = prepare_params(params)      # weight repack once, outside jit

    out = neural3d_forward(x, packed)
    out = jax.block_until_ready(out)
    assert out.shape == (2, 256, 4, 4), out.shape

    ref = _reference_forward(x, params)
    # Matmul inputs are bf16 (f32 accumulation), so tolerance vs. the f32
    # reference is relaxed accordingly (3 chained bf16 conv layers).
    np.testing.assert_allclose(np.asarray(out), np.asarray(ref),
                               rtol=4e-2, atol=4e-2)
    print("KERNEL_OK")
</pallas_src>

<mosaic_0001>
module attributes {stable_mosaic.version = 11 : i64} {
  func.func @_fused_encoder_kernel(%arg0: i32, %arg1: memref<1x256x27xbf16, #tpu.memory_space<vmem>>, %arg2: memref<27x64xbf16, #tpu.memory_space<vmem>>, %arg3: memref<1x64xf32, #tpu.memory_space<vmem>>, %arg4: memref<576x128xbf16, #tpu.memory_space<vmem>>, %arg5: memref<1x128xf32, #tpu.memory_space<vmem>>, %arg6: memref<1152x256xbf16, #tpu.memory_space<vmem>>, %arg7: memref<1x256xf32, #tpu.memory_space<vmem>>, %arg8: memref<1x16x256xf32, #tpu.memory_space<vmem>>, %arg9: memref<1x10x10x64xbf16, #tpu.memory_space<vmem>>, %arg10: memref<64x576xbf16, #tpu.memory_space<vmem>>, %arg11: memref<1x6x6x128xbf16, #tpu.memory_space<vmem>>, %arg12: memref<16x1152xbf16, #tpu.memory_space<vmem>>) attributes {dimension_semantics = [#tpu.dimension_semantics<parallel>], iteration_bounds = array<i64: 2>, scalar_prefetch = 0 : i64, scratch_operands = 4 : i64, tpu.core_type = #tpu.core_type<tc>, window_params = [{transform_indices = @transform_0, window_bounds = array<i64: 1, 256, 27>}, {pipeline_mode = #tpu.pipeline_mode<synchronous>, transform_indices = @transform_1, window_bounds = array<i64: 27, 64>}, {pipeline_mode = #tpu.pipeline_mode<synchronous>, transform_indices = @transform_2, window_bounds = array<i64: 1, 64>}, {pipeline_mode = #tpu.pipeline_mode<synchronous>, transform_indices = @transform_3, window_bounds = array<i64: 576, 128>}, {pipeline_mode = #tpu.pipeline_mode<synchronous>, transform_indices = @transform_4, window_bounds = array<i64: 1, 128>}, {pipeline_mode = #tpu.pipeline_mode<synchronous>, transform_indices = @transform_5, window_bounds = array<i64: 1152, 256>}, {pipeline_mode = #tpu.pipeline_mode<synchronous>, transform_indices = @transform_6, window_bounds = array<i64: 1, 256>}, {transform_indices = @transform_7, window_bounds = array<i64: 1, 16, 256>}]} {
    %c0 = arith.constant 0 : index
    %c0_0 = arith.constant 0 : index
    %c0_1 = arith.constant 0 : index
    %0 = vector.load %arg1[%c0, %c0_0, %c0_1] : memref<1x256x27xbf16, #tpu.memory_space<vmem>>, vector<1x256x27xbf16>
    %1 = vector.shape_cast %0 : vector<1x256x27xbf16> to vector<256x27xbf16>
    %c0_2 = arith.constant 0 : index
    %c0_3 = arith.constant 0 : index
    %2 = vector.load %arg2[%c0_2, %c0_3] : memref<27x64xbf16, #tpu.memory_space<vmem>>, vector<27x64xbf16>
    %cst = arith.constant dense<0.000000e+00> : vector<256x64xf32>
    %3 = tpu.matmul %1, %2, %cst {dimension_numbers = #tpu.dot_dimension_numbers<[1], [0], [0], [1], [0, 0, 1, 1], [], []>} : vector<256x27xbf16>, vector<27x64xbf16>, vector<256x64xf32> -> vector<256x64xf32>
    %c0_4 = arith.constant 0 : index
    %c0_5 = arith.constant 0 : index
    %4 = vector.load %arg3[%c0_4, %c0_5] : memref<1x64xf32, #tpu.memory_space<vmem>>, vector<1x64xf32>
    %5 = vector.broadcast %4 : vector<1x64xf32> to vector<256x64xf32>
    %6 = arith.addf %3, %5 : vector<256x64xf32>
    %cst_6 = arith.constant 0.000000e+00 : f32
    %7 = vector.broadcast %cst_6 : f32 to vector<256x64xf32>
    %8 = arith.maximumf %6, %7 : vector<256x64xf32>
    %9 = vector.shape_cast %8 : vector<256x64xf32> to vector<8x2x16x64xf32>
    %cst_7 = arith.constant dense<0xFF800000> : vector<8x16x64xf32>
    %10 = vector.multi_reduction <maximumf>, %9, %cst_7 [1] : vector<8x2x16x64xf32> to vector<8x16x64xf32>
    %11 = vector.shape_cast %10 : vector<8x16x64xf32> to vector<8x8x2x64xf32>
    %cst_8 = arith.constant dense<0xFF800000> : vector<8x8x64xf32>
    %12 = vector.multi_reduction <maximumf>, %11, %cst_8 [2] : vector<8x8x2x64xf32> to vector<8x8x64xf32>
    %cst_9 = arith.constant 0.000000e+00 : bf16
    %13 = vector.broadcast %cst_9 : bf16 to vector<1x1x10x64xbf16>
    %c0_10 = arith.constant 0 : index
    %c0_11 = arith.constant 0 : index
    %c0_12 = arith.constant 0 : index
    %c0_13 = arith.constant 0 : index
    %14 = vector.load %arg9[%c0_10, %c0_11, %c0_12, %c0_13] : memref<1x10x10x64xbf16, #tpu.memory_space<vmem>>, vector<1x1x10x64xbf16>
    tpu.vector_store %arg9[%c0_10, %c0_11, %c0_12, %c0_13], %13 {strides = array<i32>} : memref<1x10x10x64xbf16, #tpu.memory_space<vmem>>, vector<1x1x10x64xbf16>,
    %cst_14 = arith.constant 0.000000e+00 : bf16
    %15 = vector.broadcast %cst_14 : bf16 to vector<1x1x10x64xbf16>
    %c0_15 = arith.constant 0 : index
    %c9 = arith.constant 9 : index
    %c0_16 = arith.constant 0 : index
    %c0_17 = arith.constant 0 : index
    %16 = vector.load %arg9[%c0_15, %c9, %c0_16, %c0_17] : memref<1x10x10x64xbf16, #tpu.memory_space<vmem>>, vector<1x1x10x64xbf16>
    tpu.vector_store %arg9[%c0_15, %c9, %c0_16, %c0_17], %15 {strides = array<i32>} : memref<1x10x10x64xbf16, #tpu.memory_space<vmem>>, vector<1x1x10x64xbf16>,
    %cst_18 = arith.constant 0.000000e+00 : bf16
    %17 = vector.broadcast %cst_18 : bf16 to vector<1x10x1x64xbf16>
    %c0_19 = arith.constant 0 : index
    %c0_20 = arith.constant 0 : index
    %c0_21 = arith.constant 0 : index
    %c0_22 = arith.constant 0 : index
    %18 = vector.load %arg9[%c0_19, %c0_20, %c0_21, %c0_22] : memref<1x10x10x64xbf16, #tpu.memory_space<vmem>>, vector<1x10x1x64xbf16>
    tpu.vector_store %arg9[%c0_19, %c0_20, %c0_21, %c0_22], %17 {strides = array<i32>} : memref<1x10x10x64xbf16, #tpu.memory_space<vmem>>, vector<1x10x1x64xbf16>,
    %cst_23 = arith.constant 0.000000e+00 : bf16
    %19 = vector.broadcast %cst_23 : bf16 to vector<1x10x1x64xbf16>
    %c0_24 = arith.constant 0 : index
    %c0_25 = arith.constant 0 : index
    %c9_26 = arith.constant 9 : index
    %c0_27 = arith.constant 0 : index
    %20 = vector.load %arg9[%c0_24, %c0_25, %c9_26, %c0_27] : memref<1x10x10x64xbf16, #tpu.memory_space<vmem>>, vector<1x10x1x64xbf16>
    tpu.vector_store %arg9[%c0_24, %c0_25, %c9_26, %c0_27], %19 {strides = array<i32>} : memref<1x10x10x64xbf16, #tpu.memory_space<vmem>>, vector<1x10x1x64xbf16>,
    %21 = vector.shape_cast %12 : vector<8x8x64xf32> to vector<1x8x8x64xf32>
    %22 = arith.truncf %21 : vector<1x8x8x64xf32> to vector<1x8x8x64xbf16>
    %c0_28 = arith.constant 0 : index
    %c1 = arith.constant 1 : index
    %c1_29 = arith.constant 1 : index
    %c0_30 = arith.constant 0 : index
    %23 = vector.load %arg9[%c0_28, %c1, %c1_29, %c0_30] : memref<1x10x10x64xbf16, #tpu.memory_space<vmem>>, vector<1x8x8x64xbf16>
    tpu.vector_store %arg9[%c0_28, %c1, %c1_29, %c0_30], %22 {strides = array<i32>} : memref<1x10x10x64xbf16, #tpu.memory_space<vmem>>, vector<1x8x8x64xbf16>,
    %c0_31 = arith.constant 0 : index
    %c0_32 = arith.constant 0 : index
    %c0_33 = arith.constant 0 : index
    %c0_34 = arith.constant 0 : index
    %24 = vector.load %arg9[%c0_31, %c0_32, %c0_33, %c0_34] : memref<1x10x10x64xbf16, #tpu.memory_space<vmem>>, vector<1x8x8x64xbf16>
    %c0_35 = arith.constant 0 : index
    %c0_36 = arith.constant 0 : index
    %c1_37 = arith.constant 1 : index
    %c0_38 = arith.constant 0 : index
    %25 = vector.load %arg9[%c0_35, %c0_36, %c1_37, %c0_38] : memref<1x10x10x64xbf16, #tpu.memory_space<vmem>>, vector<1x8x8x64xbf16>
    %26 = tpu.concatenate %24, %25 in 3 : vector<1x8x8x64xbf16>, vector<1x8x8x64xbf16> -> vector<1x8x8x128xbf16>
    %27 = vector.shape_cast %26 : vector<1x8x8x128xbf16> to vector<64x128xbf16>
    %c0_39 = arith.constant 0 : index
    %c0_40 = arith.constant 0 : index
    %28 = vector.load %arg10[%c0_39, %c0_40] : memref<64x576xbf16, #tpu.memory_space<vmem>>, vector<64x128xbf16>
    tpu.vector_store %arg10[%c0_39, %c0_40], %27 {strides = array<i32>} : memref<64x576xbf16, #tpu.memory_space<vmem>>, vector<64x128xbf16>,
    %c0_41 = arith.constant 0 : index
    %c0_42 = arith.constant 0 : index
    %c2 = arith.constant 2 : index
    %c0_43 = arith.constant 0 : index
    %29 = vector.load %arg9[%c0_41, %c0_42, %c2, %c0_43] : memref<1x10x10x64xbf16, #tpu.memory_space<vmem>>, vector<1x8x8x64xbf16>
    %c0_44 = arith.constant 0 : index
    %c1_45 = arith.constant 1 : index
    %c0_46 = arith.constant 0 : index
    %c0_47 = arith.constant 0 : index
    %30 = vector.load %arg9[%c0_44, %c1_45, %c0_46, %c0_47] : memref<1x10x10x64xbf16, #tpu.memory_space<vmem>>, vector<1x8x8x64xbf16>
    %31 = tpu.concatenate %29, %30 in 3 : vector<1x8x8x64xbf16>, vector<1x8x8x64xbf16> -> vector<1x8x8x128xbf16>
    %32 = vector.shape_cast %31 : vector<1x8x8x128xbf16> to vector<64x128xbf16>
    %c0_48 = arith.constant 0 : index
    %c128 = arith.constant 128 : index
    %33 = vector.load %arg10[%c0_48, %c128] : memref<64x576xbf16, #tpu.memory_space<vmem>>, vector<64x128xbf16>
    tpu.vector_store %arg10[%c0_48, %c128], %32 {strides = array<i32>} : memref<64x576xbf16, #tpu.memory_space<vmem>>, vector<64x128xbf16>,
    %c0_49 = arith.constant 0 : index
    %c1_50 = arith.constant 1 : index
    %c1_51 = arith.constant 1 : index
    %c0_52 = arith.constant 0 : index
    %34 = vector.load %arg9[%c0_49, %c1_50, %c1_51, %c0_52] : memref<1x10x10x64xbf16, #tpu.memory_space<vmem>>, vector<1x8x8x64xbf16>
    %c0_53 = arith.constant 0 : index
    %c1_54 = arith.constant 1 : index
    %c2_55 = arith.constant 2 : index
    %c0_56 = arith.constant 0 : index
    %35 = vector.load %arg9[%c0_53, %c1_54, %c2_55, %c0_56] : memref<1x10x10x64xbf16, #tpu.memory_space<vmem>>, vector<1x8x8x64xbf16>
    %36 = tpu.concatenate %34, %35 in 3 : vector<1x8x8x64xbf16>, vector<1x8x8x64xbf16> -> vector<1x8x8x128xbf16>
    %37 = vector.shape_cast %36 : vector<1x8x8x128xbf16> to vector<64x128xbf16>
    %c0_57 = arith.constant 0 : index
    %c256 = arith.constant 256 : index
    %38 = vector.load %arg10[%c0_57, %c256] : memref<64x576xbf16, #tpu.memory_space<vmem>>, vector<64x128xbf16>
    tpu.vector_store %arg10[%c0_57, %c256], %37 {strides = array<i32>} : memref<64x576xbf16, #tpu.memory_space<vmem>>, vector<64x128xbf16>,
    %c0_58 = arith.constant 0 : index
    %c2_59 = arith.constant 2 : index
    %c0_60 = arith.constant 0 : index
    %c0_61 = arith.constant 0 : index
    %39 = vector.load %arg9[%c0_58, %c2_59, %c0_60, %c0_61] : memref<1x10x10x64xbf16, #tpu.memory_space<vmem>>, vector<1x8x8x64xbf16>
    %c0_62 = arith.constant 0 : index
    %c2_63 = arith.constant 2 : index
    %c1_64 = arith.constant 1 : index
    %c0_65 = arith.constant 0 : index
    %40 = vector.load %arg9[%c0_62, %c2_63, %c1_64, %c0_65] : memref<1x10x10x64xbf16, #tpu.memory_space<vmem>>, vector<1x8x8x64xbf16>
    %41 = tpu.concatenate %39, %40 in 3 : vector<1x8x8x64xbf16>, vector<1x8x8x64xbf16> -> vector<1x8x8x128xbf16>
    %42 = vector.shape_cast %41 : vector<1x8x8x128xbf16> to vector<64x128xbf16>
    %c0_66 = arith.constant 0 : index
    %c384 = arith.constant 384 : index
    %43 = vector.load %arg10[%c0_66, %c384] : memref<64x576xbf16, #tpu.memory_space<vmem>>, vector<64x128xbf16>
    tpu.vector_store %arg10[%c0_66, %c384], %42 {strides = array<i32>} : memref<64x576xbf16, #tpu.memory_space<vmem>>, vector<64x128xbf16>,
    %c0_67 = arith.constant 0 : index
    %c2_68 = arith.constant 2 : index
    %c2_69 = arith.constant 2 : index
    %c0_70 = arith.constant 0 : index
    %44 = vector.load %arg9[%c0_67, %c2_68, %c2_69, %c0_70] : memref<1x10x10x64xbf16, #tpu.memory_space<vmem>>, vector<1x8x8x64xbf16>
    %45 = vector.shape_cast %44 : vector<1x8x8x64xbf16> to vector<64x64xbf16>
    %c0_71 = arith.constant 0 : index
    %c512 = arith.constant 512 : index
    %46 = vector.load %arg10[%c0_71, %c512] : memref<64x576xbf16, #tpu.memory_space<vmem>>, vector<64x64xbf16>
    tpu.vector_store %arg10[%c0_71, %c512], %45 {strides = array<i32>} : memref<64x576xbf16, #tpu.memory_space<vmem>>, vector<64x64xbf16>,
    %c0_72 = arith.constant 0 : index
    %c0_73 = arith.constant 0 : index
    %47 = vector.load %arg10[%c0_72, %c0_73] : memref<64x576xbf16, #tpu.memory_space<vmem>>, vector<64x576xbf16>
    %c0_74 = arith.constant 0 : index
    %c0_75 = arith.constant 0 : index
    %48 = vector.load %arg4[%c0_74, %c0_75] : memref<576x128xbf16, #tpu.memory_space<vmem>>, vector<576x128xbf16>
    %cst_76 = arith.constant dense<0.000000e+00> : vector<64x128xf32>
    %49 = tpu.matmul %47, %48, %cst_76 {dimension_numbers = #tpu.dot_dimension_numbers<[1], [0], [0], [1], [0, 0, 1, 1], [], []>} : vector<64x576xbf16>, vector<576x128xbf16>, vector<64x128xf32> -> vector<64x128xf32>
    %c0_77 = arith.constant 0 : index
    %c0_78 = arith.constant 0 : index
    %50 = vector.load %arg5[%c0_77, %c0_78] : memref<1x128xf32, #tpu.memory_space<vmem>>, vector<1x128xf32>
    %51 = vector.broadcast %50 : vector<1x128xf32> to vector<64x128xf32>
    %52 = arith.addf %49, %51 : vector<64x128xf32>
    %cst_79 = arith.constant 0.000000e+00 : f32
    %53 = vector.broadcast %cst_79 : f32 to vector<64x128xf32>
    %54 = arith.maximumf %52, %53 : vector<64x128xf32>
    %55 = vector.shape_cast %54 : vector<64x128xf32> to vector<4x2x8x128xf32>
    %cst_80 = arith.constant dense<0xFF800000> : vector<4x8x128xf32>
    %56 = vector.multi_reduction <maximumf>, %55, %cst_80 [1] : vector<4x2x8x128xf32> to vector<4x8x128xf32>
    %57 = vector.shape_cast %56 : vector<4x8x128xf32> to vector<4x4x2x128xf32>
    %cst_81 = arith.constant dense<0xFF800000> : vector<4x4x128xf32>
    %58 = vector.multi_reduction <maximumf>, %57, %cst_81 [2] : vector<4x4x2x128xf32> to vector<4x4x128xf32>
    %cst_82 = arith.constant 0.000000e+00 : bf16
    %59 = vector.broadcast %cst_82 : bf16 to vector<1x1x6x128xbf16>
    %c0_83 = arith.constant 0 : index
    %c0_84 = arith.constant 0 : index
    %c0_85 = arith.constant 0 : index
    %c0_86 = arith.constant 0 : index
    %60 = vector.load %arg11[%c0_83, %c0_84, %c0_85, %c0_86] : memref<1x6x6x128xbf16, #tpu.memory_space<vmem>>, vector<1x1x6x128xbf16>
    tpu.vector_store %arg11[%c0_83, %c0_84, %c0_85, %c0_86], %59 {strides = array<i32>} : memref<1x6x6x128xbf16, #tpu.memory_space<vmem>>, vector<1x1x6x128xbf16>,
    %cst_87 = arith.constant 0.000000e+00 : bf16
    %61 = vector.broadcast %cst_87 : bf16 to vector<1x1x6x128xbf16>
    %c0_88 = arith.constant 0 : index
    %c5 = arith.constant 5 : index
    %c0_89 = arith.constant 0 : index
    %c0_90 = arith.constant 0 : index
    %62 = vector.load %arg11[%c0_88, %c5, %c0_89, %c0_90] : memref<1x6x6x128xbf16, #tpu.memory_space<vmem>>, vector<1x1x6x128xbf16>
    tpu.vector_store %arg11[%c0_88, %c5, %c0_89, %c0_90], %61 {strides = array<i32>} : memref<1x6x6x128xbf16, #tpu.memory_space<vmem>>, vector<1x1x6x128xbf16>,
    %cst_91 = arith.constant 0.000000e+00 : bf16
    %63 = vector.broadcast %cst_91 : bf16 to vector<1x6x1x128xbf16>
    %c0_92 = arith.constant 0 : index
    %c0_93 = arith.constant 0 : index
    %c0_94 = arith.constant 0 : index
    %c0_95 = arith.constant 0 : index
    %64 = vector.load %arg11[%c0_92, %c0_93, %c0_94, %c0_95] : memref<1x6x6x128xbf16, #tpu.memory_space<vmem>>, vector<1x6x1x128xbf16>
    tpu.vector_store %arg11[%c0_92, %c0_93, %c0_94, %c0_95], %63 {strides = array<i32>} : memref<1x6x6x128xbf16, #tpu.memory_space<vmem>>, vector<1x6x1x128xbf16>,
    %cst_96 = arith.constant 0.000000e+00 : bf16
    %65 = vector.broadcast %cst_96 : bf16 to vector<1x6x1x128xbf16>
    %c0_97 = arith.constant 0 : index
    %c0_98 = arith.constant 0 : index
    %c5_99 = arith.constant 5 : index
    %c0_100 = arith.constant 0 : index
    %66 = vector.load %arg11[%c0_97, %c0_98, %c5_99, %c0_100] : memref<1x6x6x128xbf16, #tpu.memory_space<vmem>>, vector<1x6x1x128xbf16>
    tpu.vector_store %arg11[%c0_97, %c0_98, %c5_99, %c0_100], %65 {strides = array<i32>} : memref<1x6x6x128xbf16, #tpu.memory_space<vmem>>, vector<1x6x1x128xbf16>,
    %67 = vector.shape_cast %58 : vector<4x4x128xf32> to vector<1x4x4x128xf32>
    %68 = arith.truncf %67 : vector<1x4x4x128xf32> to vector<1x4x4x128xbf16>
    %c0_101 = arith.constant 0 : index
    %c1_102 = arith.constant 1 : index
    %c1_103 = arith.constant 1 : index
    %c0_104 = arith.constant 0 : index
    %69 = vector.load %arg11[%c0_101, %c1_102, %c1_103, %c0_104] : memref<1x6x6x128xbf16, #tpu.memory_space<vmem>>, vector<1x4x4x128xbf16>
    tpu.vector_store %arg11[%c0_101, %c1_102, %c1_103, %c0_104], %68 {strides = array<i32>} : memref<1x6x6x128xbf16, #tpu.memory_space<vmem>>, vector<1x4x4x128xbf16>,
    %c0_105 = arith.constant 0 : index
    %c0_106 = arith.constant 0 : index
    %c0_107 = arith.constant 0 : index
    %c0_108 = arith.constant 0 : index
    %70 = vector.load %arg11[%c0_105, %c0_106, %c0_107, %c0_108] : memref<1x6x6x128xbf16, #tpu.memory_space<vmem>>, vector<1x4x4x128xbf16>
    %71 = vector.shape_cast %70 : vector<1x4x4x128xbf16> to vector<16x128xbf16>
    %c0_109 = arith.constant 0 : index
    %c0_110 = arith.constant 0 : index
    %72 = vector.load %arg12[%c0_109, %c0_110] : memref<16x1152xbf16, #tpu.memory_space<vmem>>, vector<16x128xbf16>
    tpu.vector_store %arg12[%c0_109, %c0_110], %71 {strides = array<i32>} : memref<16x1152xbf16, #tpu.memory_space<vmem>>, vector<16x128xbf16>,
    %c0_111 = arith.constant 0 : index
    %c0_112 = arith.constant 0 : index
    %c1_113 = arith.constant 1 : index
    %c0_114 = arith.constant 0 : index
    %73 = vector.load %arg11[%c0_111, %c0_112, %c1_113, %c0_114] : memref<1x6x6x128xbf16, #tpu.memory_space<vmem>>, vector<1x4x4x128xbf16>
    %74 = vector.shape_cast %73 : vector<1x4x4x128xbf16> to vector<16x128xbf16>
    %c0_115 = arith.constant 0 : index
    %c128_116 = arith.constant 128 : index
    %75 = vector.load %arg12[%c0_115, %c128_116] : memref<16x1152xbf16, #tpu.memory_space<vmem>>, vector<16x128xbf16>
    tpu.vector_store %arg12[%c0_115, %c128_116], %74 {strides = array<i32>} : memref<16x1152xbf16, #tpu.memory_space<vmem>>, vector<16x128xbf16>,
    %c0_117 = arith.constant 0 : index
    %c0_118 = arith.constant 0 : index
    %c2_119 = arith.constant 2 : index
    %c0_120 = arith.constant 0 : index
    %76 = vector.load %arg11[%c0_117, %c0_118, %c2_119, %c0_120] : memref<1x6x6x128xbf16, #tpu.memory_space<vmem>>, vector<1x4x4x128xbf16>
    %77 = vector.shape_cast %76 : vector<1x4x4x128xbf16> to vector<16x128xbf16>
    %c0_121 = arith.constant 0 : index
    %c256_122 = arith.constant 256 : index
    %78 = vector.load %arg12[%c0_121, %c256_122] : memref<16x1152xbf16, #tpu.memory_space<vmem>>, vector<16x128xbf16>
    tpu.vector_store %arg12[%c0_121, %c256_122], %77 {strides = array<i32>} : memref<16x1152xbf16, #tpu.memory_space<vmem>>, vector<16x128xbf16>,
    %c0_123 = arith.constant 0 : index
    %c1_124 = arith.constant 1 : index
    %c0_125 = arith.constant 0 : index
    %c0_126 = arith.constant 0 : index
    %79 = vector.load %arg11[%c0_123, %c1_124, %c0_125, %c0_126] : memref<1x6x6x128xbf16, #tpu.memory_space<vmem>>, vector<1x4x4x128xbf16>
    %80 = vector.shape_cast %79 : vector<1x4x4x128xbf16> to vector<16x128xbf16>
    %c0_127 = arith.constant 0 : index
    %c384_128 = arith.constant 384 : index
    %81 = vector.load %arg12[%c0_127, %c384_128] : memref<16x1152xbf16, #tpu.memory_space<vmem>>, vector<16x128xbf16>
    tpu.vector_store %arg12[%c0_127, %c384_128], %80 {strides = array<i32>} : memref<16x1152xbf16, #tpu.memory_space<vmem>>, vector<16x128xbf16>,
    %c0_129 = arith.constant 0 : index
    %c1_130 = arith.constant 1 : index
    %c1_131 = arith.constant 1 : index
    %c0_132 = arith.constant 0 : index
    %82 = vector.load %arg11[%c0_129, %c1_130, %c1_131, %c0_132] : memref<1x6x6x128xbf16, #tpu.memory_space<vmem>>, vector<1x4x4x128xbf16>
    %83 = vector.shape_cast %82 : vector<1x4x4x128xbf16> to vector<16x128xbf16>
    %c0_133 = arith.constant 0 : index
    %c512_134 = arith.constant 512 : index
    %84 = vector.load %arg12[%c0_133, %c512_134] : memref<16x1152xbf16, #tpu.memory_space<vmem>>, vector<16x128xbf16>
    tpu.vector_store %arg12[%c0_133, %c512_134], %83 {strides = array<i32>} : memref<16x1152xbf16, #tpu.memory_space<vmem>>, vector<16x128xbf16>,
    %c0_135 = arith.constant 0 : index
    %c1_136 = arith.constant 1 : index
    %c2_137 = arith.constant 2 : index
    %c0_138 = arith.constant 0 : index
    %85 = vector.load %arg11[%c0_135, %c1_136, %c2_137, %c0_138] : memref<1x6x6x128xbf16, #tpu.memory_space<vmem>>, vector<1x4x4x128xbf16>
    %86 = vector.shape_cast %85 : vector<1x4x4x128xbf16> to vector<16x128xbf16>
    %c0_139 = arith.constant 0 : index
    %c640 = arith.constant 640 : index
    %87 = vector.load %arg12[%c0_139, %c640] : memref<16x1152xbf16, #tpu.memory_space<vmem>>, vector<16x128xbf16>
    tpu.vector_store %arg12[%c0_139, %c640], %86 {strides = array<i32>} : memref<16x1152xbf16, #tpu.memory_space<vmem>>, vector<16x128xbf16>,
    %c0_140 = arith.constant 0 : index
    %c2_141 = arith.constant 2 : index
    %c0_142 = arith.constant 0 : index
    %c0_143 = arith.constant 0 : index
    %88 = vector.load %arg11[%c0_140, %c2_141, %c0_142, %c0_143] : memref<1x6x6x128xbf16, #tpu.memory_space<vmem>>, vector<1x4x4x128xbf16>
    %89 = vector.shape_cast %88 : vector<1x4x4x128xbf16> to vector<16x128xbf16>
    %c0_144 = arith.constant 0 : index
    %c768 = arith.constant 768 : index
    %90 = vector.load %arg12[%c0_144, %c768] : memref<16x1152xbf16, #tpu.memory_space<vmem>>, vector<16x128xbf16>
    tpu.vector_store %arg12[%c0_144, %c768], %89 {strides = array<i32>} : memref<16x1152xbf16, #tpu.memory_space<vmem>>, vector<16x128xbf16>,
    %c0_145 = arith.constant 0 : index
    %c2_146 = arith.constant 2 : index
    %c1_147 = arith.constant 1 : index
    %c0_148 = arith.constant 0 : index
    %91 = vector.load %arg11[%c0_145, %c2_146, %c1_147, %c0_148] : memref<1x6x6x128xbf16, #tpu.memory_space<vmem>>, vector<1x4x4x128xbf16>
    %92 = vector.shape_cast %91 : vector<1x4x4x128xbf16> to vector<16x128xbf16>
    %c0_149 = arith.constant 0 : index
    %c896 = arith.constant 896 : index
    %93 = vector.load %arg12[%c0_149, %c896] : memref<16x1152xbf16, #tpu.memory_space<vmem>>, vector<16x128xbf16>
    tpu.vector_store %arg12[%c0_149, %c896], %92 {strides = array<i32>} : memref<16x1152xbf16, #tpu.memory_space<vmem>>, vector<16x128xbf16>,
    %c0_150 = arith.constant 0 : index
    %c2_151 = arith.constant 2 : index
    %c2_152 = arith.constant 2 : index
    %c0_153 = arith.constant 0 : index
    %94 = vector.load %arg11[%c0_150, %c2_151, %c2_152, %c0_153] : memref<1x6x6x128xbf16, #tpu.memory_space<vmem>>, vector<1x4x4x128xbf16>
    %95 = vector.shape_cast %94 : vector<1x4x4x128xbf16> to vector<16x128xbf16>
    %c0_154 = arith.constant 0 : index
    %c1024 = arith.constant 1024 : index
    %96 = vector.load %arg12[%c0_154, %c1024] : memref<16x1152xbf16, #tpu.memory_space<vmem>>, vector<16x128xbf16>
    tpu.vector_store %arg12[%c0_154, %c1024], %95 {strides = array<i32>} : memref<16x1152xbf16, #tpu.memory_space<vmem>>, vector<16x128xbf16>,
    %c0_155 = arith.constant 0 : index
    %c0_156 = arith.constant 0 : index
    %97 = vector.load %arg12[%c0_155, %c0_156] : memref<16x1152xbf16, #tpu.memory_space<vmem>>, vector<16x1152xbf16>
    %c0_157 = arith.constant 0 : index
    %c0_158 = arith.constant 0 : index
    %98 = vector.load %arg6[%c0_157, %c0_158] : memref<1152x256xbf16, #tpu.memory_space<vmem>>, vector<1152x256xbf16>
    %cst_159 = arith.constant dense<0.000000e+00> : vector<16x256xf32>
    %99 = tpu.matmul %97, %98, %cst_159 {dimension_numbers = #tpu.dot_dimension_numbers<[1], [0], [0], [1], [0, 0, 1, 1], [], []>} : vector<16x1152xbf16>, vector<1152x256xbf16>, vector<16x256xf32> -> vector<16x256xf32>
    %c0_160 = arith.constant 0 : index
    %c0_161 = arith.constant 0 : index
    %100 = vector.load %arg7[%c0_160, %c0_161] : memref<1x256xf32, #tpu.memory_space<vmem>>, vector<1x256xf32>
    %101 = vector.broadcast %100 : vector<1x256xf32> to vector<16x256xf32>
    %102 = arith.addf %99, %101 : vector<16x256xf32>
    %cst_162 = arith.constant 0.000000e+00 : f32
    %103 = vector.broadcast %cst_162 : f32 to vector<16x256xf32>
    %104 = arith.maximumf %102, %103 : vector<16x256xf32>
    %105 = vector.shape_cast %104 : vector<16x256xf32> to vector<1x16x256xf32>
    %c0_163 = arith.constant 0 : index
    %c0_164 = arith.constant 0 : index
    %c0_165 = arith.constant 0 : index
    %106 = vector.load %arg8[%c0_163, %c0_164, %c0_165] : memref<1x16x256xf32, #tpu.memory_space<vmem>>, vector<1x16x256xf32>
    tpu.vector_store %arg8[%c0_163, %c0_164, %c0_165], %105 {strides = array<i32>} : memref<1x16x256xf32, #tpu.memory_space<vmem>>, vector<1x16x256xf32>,
    return
  }
  func.func @transform_0(%arg0: i32) -> (i32, i32, i32) {
    %c0_i32 = arith.constant 0 : i32
    %c0_i32_0 = arith.constant 0 : i32
    %c0_i32_1 = arith.constant 0 : i32
    return %arg0, %c0_i32, %c0_i32_0 : i32, i32, i32
  }
  func.func @transform_1(%arg0: i32) -> (i32, i32) {
    %c0_i32 = arith.constant 0 : i32
    %c0_i32_0 = arith.constant 0 : i32
    %c0_i32_1 = arith.constant 0 : i32
    return %c0_i32, %c0_i32_0 : i32, i32
  }
  func.func @transform_2(%arg0: i32) -> (i32, i32) {
    %c0_i32 = arith.constant 0 : i32
    %c0_i32_0 = arith.constant 0 : i32
    %c0_i32_1 = arith.constant 0 : i32
    return %c0_i32, %c0_i32_0 : i32, i32
  }
  func.func @transform_3(%arg0: i32) -> (i32, i32) {
    %c0_i32 = arith.constant 0 : i32
    %c0_i32_0 = arith.constant 0 : i32
    %c0_i32_1 = arith.constant 0 : i32
    return %c0_i32, %c0_i32_0 : i32, i32
  }
  func.func @transform_4(%arg0: i32) -> (i32, i32) {
    %c0_i32 = arith.constant 0 : i32
    %c0_i32_0 = arith.constant 0 : i32
    %c0_i32_1 = arith.constant 0 : i32
    return %c0_i32, %c0_i32_0 : i32, i32
  }
  func.func @transform_5(%arg0: i32) -> (i32, i32) {
    %c0_i32 = arith.constant 0 : i32
    %c0_i32_0 = arith.constant 0 : i32
    %c0_i32_1 = arith.constant 0 : i32
    return %c0_i32, %c0_i32_0 : i32, i32
  }
  func.func @transform_6(%arg0: i32) -> (i32, i32) {
    %c0_i32 = arith.constant 0 : i32
    %c0_i32_0 = arith.constant 0 : i32
    %c0_i32_1 = arith.constant 0 : i32
    return %c0_i32, %c0_i32_0 : i32, i32
  }
  func.func @transform_7(%arg0: i32) -> (i32, i32, i32) {
    %c0_i32 = arith.constant 0 : i32
    %c0_i32_0 = arith.constant 0 : i32
    %c0_i32_1 = arith.constant 0 : i32
    return %arg0, %c0_i32, %c0_i32_0 : i32, i32, i32
  }
}

</mosaic_0001>

<bundles_post_ra>
// kernel: neural3d_forward.1
= control target key start
LH: loop header
LB: loop body
LE: loop exit
PB: predicated region body
PF: predicated region fallthrough
CT: control target
= control target key end

     0   :  { %s6930_s24 = smov 0   ;;  %s8477_s0 = inlined_call_operand.vmem [shape: bf16[2,256,27], index: 0, kind: input, shape index: {}]   ;;  %s8478_s1 = inlined_call_operand.vmem [shape: bf16[27,64], index: 1, kind: input, shape index: {}]   ;;  %s8479_s2 = inlined_call_operand.vmem [shape: f32[1,64], index: 2, kind: input, shape index: {}]   ;;  %s8480_s3 = inlined_call_operand.vmem [shape: bf16[576,128], index: 3, kind: input, shape index: {}]   ;;  %s8481_s4 = inlined_call_operand.vmem [shape: f32[1,128], index: 4, kind: input, shape index: {}]   ;;  %s8482_s5 = inlined_call_operand.vmem [shape: bf16[1152,256], index: 5, kind: input, shape index: {}]   ;;  %s8483_s6 = inlined_call_operand.vmem [shape: f32[1,256], index: 6, kind: input, shape index: {}]   ;;  %s8484_s7 = inlined_call_operand.vmem [shape: f32[2,16,256], index: 7, kind: output, shape index: {}]  }
   0x1 LB: > { %s5798_s25 = sadd.s32 4294967295, %s6884_s24   ;;  %p5802_p0 = scmp.ge.s32.totalorder %s6884_s24, 1  ;;  %s6884_s24 = sphi %s6930_s24, %s17_s24  }
   0x2   : > { %p237_p1 = scmp.lt.s32.totalorder %s6884_s24, 3 }
   0x4   : > { %p238_p2 = pnand %p5802_p0, %p237_p1 }
   0x5   : > { %v6549_v0 = vld [vmem:[%s8478_s1] sm:$0xff] (!%p238_p2)   ;;  %vm463_vm0 = vcmask (!%p238_p2), 1044480   ;;  %v6550_v1 = vld [vmem:[%s8478_s1 + $0x8] sm:$0x3f] (!%p238_p2)   ;;  %vm464_vm1 = vcmask (!%p238_p2), 1045504   ;;  %p269_p3 = scmp.lt.s32.totalorder (!%p238_p2), %s5798_s25, 1  ;;  %v732_v46 = vlaneseq (!%p238_p2) }
   0x6   : > { %241 = sbr.rel (%p238_p2) target bundleno = 1241 (0x4d9), region = 48  ;;  %6465 = vmatprep.subr.bf16.mxu0 (!%p238_p2), %v6549_v0  ;;  %vm414_vm2 = vcmask (!%p238_p2), 220160   ;;  %v6886_v2 = vmov (!%p238_p2), 65535   ;;  %vm1515_vm3 = vcmask (!%p238_p2), 516096   ;;  %vm1553_vm4 = vsmask.f32 (!%p238_p2), 7938 }
   0x7   : > { %6466 = vmatpush3.bf16.msra.mxu0 (!%p238_p2), %v6549_v0  ;;  %v465_v3 = vsel (!%p238_p2), %vm463_vm0, 4294967295, %v6886_v2  ;;  %vm6986_vm5 = vmand (!%p238_p2), %vm1515_vm3, %vm1553_vm4  ;;  %v1558_v23 = vld [vmem:[#allocation2 + $0xc] sm:$0x1] (!%p238_p2)  ;;  %vm1513_vm6 = vcmask (!%p238_p2), 519168   ;;  %v6887_v25 = vmov (!%p238_p2), 0   ;;  %v7036_v52 = vshrl.u32 (!%p238_p2), %v732_v46, 7 }
   0x8   : > { %v466_v4 = vsel (!%p238_p2), %vm464_vm1, %v465_v3, 0  ;;  %v1559_v24 = vsel (!%p238_p2), %vm6986_vm5, 0, %v1558_v23  ;;  %1518 = vst.msk [vmem:[#allocation2 + $0x48] sm:$0xf] (!%p238_p2), %vm1513_vm6, %v6887_v25  ;;  %1514 = vst.msk [vmem:[#allocation2] sm:$0xf] (!%p238_p2), %vm1513_vm6, %v6887_v25 }
   0x9   : > { %v468_v5 = vand.u32 (!%p238_p2), %v6550_v1, %v466_v4  ;;  %1560 = vst [vmem:[#allocation2 + $0xc] sm:$0x1] (!%p238_p2), %v1559_v24  ;;  %1519 = vst.msk [vmem:[#allocation2 + $0x4c] sm:$0x1] (!%p238_p2), %vm1515_vm3, %v6887_v25  ;;  %vm1521_vm7 = vsmask.f32 (!%p238_p2), 256 }
   0xa   : > { %1516 = vst.msk [vmem:[#allocation2 + $0x4] sm:$0x1] (!%p238_p2), %vm1515_vm3, %v6887_v25  ;;  %3812 = vst [vmem:[#allocation4] sm:$0x7] (!%p238_p2), %v6887_v25  ;;  %v1526_v27 = vld [vmem:[#allocation2 + $0x8] sm:$0x1] (!%p238_p2) }
   0xb   : > { %6467 = vmatprep.subr.bf16.mxu0 (!%p238_p2), %v468_v5  ;;  %3814 = vst [vmem:[#allocation4 + $0x14] sm:$0x7] (!%p238_p2), %v6887_v25  ;;  %vm7004_vm8 = vmand (!%p238_p2), %vm1515_vm3, %vm1521_vm7  ;;  %v1561_v32 = vld [vmem:[#allocation2 + $0x14] sm:$0x1] (!%p238_p2)  ;;  %v1529_v34 = vld [vmem:[#allocation2 + $0x10] sm:$0x1] (!%p238_p2) }
   0xc   : > { %6468 = vmatpush3.bf16.msra.mxu0 (!%p238_p2), %v468_v5  ;;  %v1527_v28 = vsel (!%p238_p2), %vm7004_vm8, 0, %v1526_v27  ;;  %vm7014_vm9 = vmand (!%p238_p2), %vm1513_vm6, %vm1553_vm4  ;;  %v1562_v33 = vsel (!%p238_p2), %vm6986_vm5, 0, %v1561_v32  ;;  %v1530_v35 = vsel (!%p238_p2), %vm7004_vm8, 0, %v1529_v34  ;;  %v1564_v36 = vld [vmem:[#allocation2 + $0x1c] sm:$0x1] (!%p238_p2)  ;;  %vm663_vm10 = vcmask (!%p238_p2), 523264  }
   0xd   : > { %s8508_s25 = smov (!%p269_p3, %s5798_s25), 1  ;;  %1528 = vst [vmem:[#allocation2 + $0x8] sm:$0x1] %v1527_v28  ;;  %1563 = vst [vmem:[#allocation2 + $0x14] sm:$0x1] %v1562_v33  ;;  %v1565_v37 = vsel %vm6986_vm5, 0, %v1564_v36 }
   0xe   : > { %s6269_s30 = sshll.u32 %s8508_s25, 7  ;;  %1531 = vst [vmem:[#allocation2 + $0x10] sm:$0x1] %v1530_v35  ;;  %1566 = vst [vmem:[#allocation2 + $0x1c] sm:$0x1] %v1565_v37  ;;  %vm1064_vm11 = vcmask 517120  }
   0xf   : > { %s6950_s10 = scalar_lea.vmem %s8477_s0, %s6269_s30  ;;  %v1532_v38 = vld [vmem:[#allocation2 + $0x18] sm:$0x1]  ;;  %v1567_v40 = vld [vmem:[#allocation2 + $0x24] sm:$0x1]  ;;  %v1535_v42 = vld [vmem:[#allocation2 + $0x20] sm:$0x1] }
  0x10   : > { %v6551_v6 = vld [vmem:[%s6950_s10] sm:$0xff]   ;;  %v6552_v7 = vld [vmem:[%s6950_s10 + $0x8] sm:$0xff]   ;;  %v6553_v8 = vld [vmem:[%s6950_s10 + $0x10] sm:$0xff]   ;;  %v1533_v39 = vsel %vm7004_vm8, 0, %v1532_v38  ;;  %v1568_v41 = vsel %vm6986_vm5, 0, %v1567_v40  ;;  %v1536_v43 = vsel %vm7004_vm8, 0, %v1535_v42 }
  0x11   : > { %6469 = vmatprep.mubr.msk.bf16.mxu0 %vm414_vm2, %v6551_v6  ;;  %v6554_v9 = vld [vmem:[%s6950_s10 + $0x18] sm:$0xff]   ;;  %v6555_v10 = vld [vmem:[%s6950_s10 + $0x20] sm:$0xff]   ;;  %v6556_v11 = vld [vmem:[%s6950_s10 + $0x28] sm:$0xff]   ;;  %1534 = vst [vmem:[#allocation2 + $0x18] sm:$0x1] %v1533_v39  ;;  %vm1905_vm12 = vcmask 1042434  }
  0x12   : > { %6470 = vmatmul.mubr.msk.bf16.vlgmr.msra.gmra.mrb[0].mxu0 %vm414_vm2, %v6552_v7  ;;  %v6557_v12 = vld [vmem:[%s6950_s10 + $0x30] sm:$0xff]   ;;  %v6558_v13 = vld [vmem:[%s6950_s10 + $0x38] sm:$0xff]   ;;  %v6559_v14 = vld [vmem:[%s6950_s10 + $0x40] sm:$0xff]   ;;  %1569 = vst [vmem:[#allocation2 + $0x24] sm:$0x1] %v1568_v41  ;;  %vm1907_vm13 = vcmask 1043459  }
  0x13   : > { %6473 = vmatprep.mubr.msk.bf16.mxu0 %vm414_vm2, %v6553_v8  ;;  %v6560_v15 = vld [vmem:[%s6950_s10 + $0x48] sm:$0xff]   ;;  %v6561_v16 = vld [vmem:[%s6950_s10 + $0x50] sm:$0xff]   ;;  %v6562_v17 = vld [vmem:[%s6950_s10 + $0x58] sm:$0xff]   ;;  %1537 = vst [vmem:[#allocation2 + $0x20] sm:$0x1] %v1536_v43  ;;  %vm1909_vm14 = vcmask 1044484  }
  0x14   : > { %v6563_v18 = vld [vmem:[%s6950_s10 + $0x60] sm:$0xff]   ;;  %v6564_v19 = vld [vmem:[%s6950_s10 + $0x68] sm:$0xff]   ;;  %v6565_v20 = vld [vmem:[%s6950_s10 + $0x70] sm:$0xff]   ;;  %v6888_v44 = vmov 1983009808   ;;  %vm1911_vm15 = vcmask 1045509  }
  0x15   : > { %v6566_v21 = vld [vmem:[%s6950_s10 + $0x78] sm:$0xff]   ;;  %v1582_v29 = vld [vmem:[#allocation2 + $0x4c] sm:$0x1]  ;;  %v730_v45 = vunpack.c.l.s4 %v6888_v44  ;;  %v7033_v47 = vld [vmem:[%s8479_s2] ss:$0 sm:$0xff]  ;;  %vm1913_vm0 = vcmask 1046534  }
  0x16   : > { %v1583_v30 = vsel %vm6986_vm5, 0, %v1582_v29  ;;  %v1570_v5 = vld [vmem:[#allocation2 + $0x2c] sm:$0x1]  ;;  %vm1915_vm1 = vcmask 1047559   ;;  %s6889_s14 = smov 64   ;;  %vm2399_vm3 = vcmask 1046532  }
  0x17   : > { %1584 = vst [vmem:[#allocation2 + $0x4c] sm:$0x1] %v1583_v30  ;;  %v731_v51 = vunpack.c.0.s8 %v730_v45  ;;  %v6616_v22 = vld [vmem:[%s8480_s3 + $0x28] sm:$0xff]   ;;  %vm2678_vm6 = vsmask.f32 7440  ;;  %s6270_s23 = sshll.u32 %s8508_s25, 5 }
  0x18   : > { %s278_s28 = scalar_lea.vmem %s8484_s7, %s6270_s23 }
  0x19   : > { %v7043_v61 = vsub.s32 %v731_v51, %v7036_v52 }
  0x1a   : > { %6474 = vmatmul.mubr.msk.bf16.gmra.mrb[4].mxu0 %vm414_vm2, %v6554_v9 }
  0x1b   : > { %6477 = vmatprep.mubr.msk.bf16.mxu0 %vm414_vm2, %v6555_v10 }
  0x22   : > { %6478 = vmatmul.mubr.msk.bf16.gmra.mrb[8].mxu0 %vm414_vm2, %v6556_v11 }
  0x23   : > { %6481 = vmatprep.mubr.msk.bf16.mxu0 %vm414_vm2, %v6557_v12 }
  0x2a   : > { %6482 = vmatmul.mubr.msk.bf16.gmra.mrb[12].mxu0 %vm414_vm2, %v6558_v13  ;;  %v1571_v13 = vsel %vm6986_vm5, 0, %v1570_v5 }
  0x2b   : > { %6485 = vmatprep.mubr.msk.bf16.mxu0 %vm414_vm2, %v6559_v14  ;;  %1572 = vst [vmem:[#allocation2 + $0x2c] sm:$0x1] %v1571_v13 }
  0x32   : > { %6486 = vmatmul.mubr.msk.bf16.gmra.mrb[16].mxu0 %vm414_vm2, %v6560_v15 }
  0x33   : > { %6489 = vmatprep.mubr.msk.bf16.mxu0 %vm414_vm2, %v6561_v16 }
  0x3a   : > { %6490 = vmatmul.mubr.msk.bf16.gmra.mrb[20].mxu0 %vm414_vm2, %v6562_v17 }
  0x3b   : > { %6493 = vmatprep.mubr.msk.bf16.mxu0 %vm414_vm2, %v6563_v18 }
  0x42   : > { %6494 = vmatmul.mubr.msk.bf16.gmra.mrb[24].mxu0 %vm414_vm2, %v6564_v19 }
  0x43   : > { %6497 = vmatprep.mubr.msk.bf16.mxu0 %vm414_vm2, %v6565_v20 }
  0x4a   : > { %6498 = vmatmul.mubr.msk.bf16.gmra.mrb[28].mxu0 %vm414_vm2, %v6566_v21  ;;  %vm2398_vm2 = vcmask 1042432  }
  0x4b   : > { %vm7493_vm4 = vmor %vm2398_vm2, %vm2399_vm3 }
  0xe5   : > { %v6471_v48 = vpop.f32.mrb[0].mxu0 }
  0xe6   : > { %v513_v49 = vadd.f32 %v6471_v48, %v7033_v47  ;;  %v504_v50 = vpop.f32.mrb[1].mxu0 }
  0xe7   : > { %v505_v53 = vadd.f32 %v7033_v47, %v504_v50  ;;  %v6472_v54 = vpop.f32.mrb[2].mxu0 }
  0xe8   : > { %v633_v55 = vmax.f32 %v513_v49, 0.0  ;;  %v516_v56 = vadd.f32 %v6472_v54, %v7033_v47  ;;  %v507_v57 = vpop.f32.mrb[3].mxu0 }
  0xe9   : > { %v631_v58 = vmax.f32 %v505_v53, 0.0  ;;  %v508_v59 = vadd.f32 %v7033_v47, %v507_v57 }
  0xea   : > { %v665_v60 = vsel %vm663_vm10, %v633_v55, -inf  ;;  %v634_v62 = vmax.f32 %v516_v56, 0.0 }
  0xeb   : > { %v664_v63 = vsel %vm663_vm10, %v631_v58, -inf  ;;  %v632_v0 = vmax.f32 %v508_v59, 0.0 }
  0xec   : > { %v666_v1 = vmax.f32 %v664_v63, %v665_v60  ;;  %v668_v2 = vsel %vm663_vm10, %v634_v62, -inf }
  0xed   : > { %v667_v3 = vsel %vm663_vm10, %v632_v0, -inf  ;;  %v6475_v4 = vpop.f32.mrb[4].mxu0 }
  0xee   : > { %v728_v6 = vcombine.high %v666_v1, %v666_v1  ;;  %v735_v7 = vrot.slane %v666_v1, %v7043_v61  ;;  %v669_v8 = vmax.f32 %v667_v3, %v668_v2  ;;  %v7050_v9 = vadd.f32 %v6475_v4, %v7033_v47  ;;  %v520_v10 = vpop.f32.mrb[5].mxu0 }
  0xef   : > { %v7053_v11 = vadd.f32 %v7033_v47, %v520_v10  ;;  %v7055_v12 = vpop.f32.mrb[6].mxu0 }
  0xf0   : > { %v742_v14 = vrot.slane %v728_v6, %v7043_v61  ;;  %v743_v15 = vcombine.high %v735_v7, %v735_v7  ;;  %v1065_v16 = vsel %vm1064_vm11, %v735_v7, -inf  ;;  %v745_v17 = vcombine.high %v669_v8, %v669_v8  ;;  %v7061_v18 = vpop.f32.mrb[7].mxu0 }
  0xf1   : > { %v1066_v19 = vrot.slane %v1065_v16, 4  ;;  %v752_v20 = vrot.slane %v669_v8, %v7043_v61  ;;  %v637_v21 = vmax.f32 %v7050_v9, 0.0  ;;  %v635_v23 = vmax.f32 %v7053_v11, 0.0 }
  0xf2   : > { %v744_v24 = vcombine.high %v742_v14, %v742_v14  ;;  %v1072_v27 = vsel %vm1064_vm11, %v743_v15, -inf  ;;  %v1079_v28 = vsel %vm1064_vm11, %v742_v14, -inf  ;;  %v759_v29 = vrot.slane %v745_v17, %v7043_v61 }
  0xf3   : > { %v1067_v30 = vmax.f32 %v1065_v16, %v1066_v19  ;;  %v1073_v32 = vrot.slane %v1072_v27, 4  ;;  %v1080_v33 = vrot.slane %v1079_v28, 4  ;;  %v760_v34 = vcombine.high %v752_v20, %v752_v20 }
  0xf4   : > { %v1086_v35 = vsel %vm1064_vm11, %v744_v24, -inf  ;;  %v761_v36 = vcombine.high %v759_v29, %v759_v29  ;;  %v1093_v37 = vsel %vm1064_vm11, %v752_v20, -inf  ;;  %v1107_v38 = vsel %vm1064_vm11, %v759_v29, -inf }
  0xf5   : > { %v1068_v39 = vrot.slane %v1067_v30, 2  ;;  %v1074_v40 = vmax.f32 %v1072_v27, %v1073_v32  ;;  %v1081_v41 = vmax.f32 %v1079_v28, %v1080_v33  ;;  %v1087_v42 = vrot.slane %v1086_v35, 4  ;;  %v7072_v43 = vpop.f32.mrb[8].mxu0 }
  0xf6   : > { %v1094_v44 = vrot.slane %v1093_v37, 4  ;;  %v1100_v45 = vsel %vm1064_vm11, %v760_v34, -inf  ;;  %v1108_v46 = vrot.slane %v1107_v38, 4  ;;  %v1114_v48 = vsel %vm1064_vm11, %v761_v36, -inf  ;;  %v7076_v49 = vpop.f32.mrb[9].mxu0 }
  0xf7   : > { %v1069_v50 = vmax.f32 %v1067_v30, %v1068_v39  ;;  %v1075_v51 = vrot.slane %v1074_v40, 2  ;;  %v1082_v53 = vrot.slane %v1081_v41, 2  ;;  %v1088_v54 = vmax.f32 %v1086_v35, %v1087_v42  ;;  %v7078_v55 = vpop.f32.mrb[10].mxu0 }
  0xf8   : > { %v1095_v56 = vmax.f32 %v1093_v37, %v1094_v44  ;;  %v1101_v57 = vrot.slane %v1100_v45, 4  ;;  %v1109_v58 = vmax.f32 %v1107_v38, %v1108_v46  ;;  %v1115_v59 = vrot.slane %v1114_v48, 4  ;;  %v7080_v60 = vpop.f32.mrb[11].mxu0 }
  0xf9   : > { %v1070_v62 = vrot.slane %v1069_v50, 1  ;;  %v1076_v63 = vmax.f32 %v1074_v40, %v1075_v51  ;;  %v1083_v0 = vmax.f32 %v1081_v41, %v1082_v53  ;;  %v1089_v1 = vrot.slane %v1088_v54, 2 }
  0xfa   : > { %v1096_v2 = vrot.slane %v1095_v56, 2  ;;  %v1102_v3 = vmax.f32 %v1100_v45, %v1101_v57  ;;  %v1110_v4 = vrot.slane %v1109_v58, 2  ;;  %v1116_v5 = vmax.f32 %v1114_v48, %v1115_v59 }
  0xfb   : > { %v1071_v6 = vmax.f32 %v1069_v50, %v1070_v62  ;;  %v1077_v7 = vrot.slane %v1076_v63, 1  ;;  %v1084_v8 = vrot.slane %v1083_v0, 1  ;;  %v1090_v10 = vmax.f32 %v1088_v54, %v1089_v1 }
  0xfc   : > { %v1097_v13 = vmax.f32 %v1095_v56, %v1096_v2  ;;  %v1103_v14 = vrot.slane %v1102_v3, 2  ;;  %v1111_v15 = vmax.f32 %v1109_v58, %v1110_v4  ;;  %v1117_v16 = vrot.slane %v1116_v5, 2 }
  0xfd   : > { %v1078_v17 = vmax.f32 %v1076_v63, %v1077_v7  ;;  %v1085_v19 = vmax.f32 %v1083_v0, %v1084_v8  ;;  %v1091_v20 = vrot.slane %v1090_v10, 1  ;;  %v6271_v24 = vpack.c.bf16 %v1071_v6, %v1071_v6  ;;  %v7082_v27 = vpop.f32.mrb[12].mxu0 }
  0xfe   : > { %v1098_v28 = vrot.slane %v1097_v13, 1  ;;  %v1104_v29 = vmax.f32 %v1102_v3, %v1103_v14  ;;  %v1112_v30 = vrot.slane %v1111_v15, 1  ;;  %v1118_v32 = vmax.f32 %v1116_v5, %v1117_v16  ;;  %v7084_v33 = vpop.f32.mrb[13].mxu0 }
  0xff   : > { %v1092_v34 = vmax.f32 %v1090_v10, %v1091_v20  ;;  %v6272_v35 = vpack.c.bf16 %v1078_v17, %v1078_v17  ;;  %v6273_v36 = vpack.c.bf16 %v1085_v19, %v1085_v19  ;;  %v1841_v37 = vunpack.c.l.b16 %v6271_v24  ;;  %v7086_v38 = vpop.f32.mrb[14].mxu0 }
 0x100   : > { %v1099_v39 = vmax.f32 %v1097_v13, %v1098_v28  ;;  %v1105_v40 = vrot.slane %v1104_v29, 1  ;;  %v1113_v41 = vmax.f32 %v1111_v15, %v1112_v30  ;;  %v1119_v42 = vrot.slane %v1118_v32, 1  ;;  %v7088_v44 = vpop.f32.mrb[15].mxu0  ;;  %v1994_v28 = vld [vmem:[#allocation2 + $0x8] sm:$0xf] }
 0x101   : > { %v6274_v45 = vpack.c.bf16 %v1092_v34, %v1092_v34  ;;  %v1842_v46 = vunpack.c.l.b16 %v6272_v35  ;;  %v1843_v48 = vunpack.c.l.b16 %v6273_v36  ;;  %v671_v50 = vsel %vm663_vm10, %v637_v21, -inf  ;;  %v1997_v21 = vld [vmem:[#allocation2 + $0xc] sm:$0x1] }
 0x102   : > { %v1106_v51 = vmax.f32 %v1104_v29, %v1105_v40  ;;  %v1120_v53 = vmax.f32 %v1118_v32, %v1119_v42  ;;  %v6275_v54 = vpack.c.bf16 %v1099_v39, %v1099_v39  ;;  %v6277_v56 = vpack.c.bf16 %v1113_v41, %v1113_v41 }
 0x103   : > { %v1844_v57 = vunpack.c.l.b16 %v6274_v45  ;;  %v1906_v58 = vsel %vm1905_vm12, %v1842_v46, %v1841_v37  ;;  %v670_v59 = vsel %vm663_vm10, %v635_v23, -inf  ;;  %v532_v62 = vadd.f32 %v7055_v12, %v7033_v47 }
 0x104   : > { %v1908_v63 = vsel %vm1907_vm13, %v1843_v48, %v1906_v58  ;;  %v6276_v0 = vpack.c.bf16 %v1106_v51, %v1106_v51  ;;  %v1845_v9 = vunpack.c.l.b16 %v6275_v54  ;;  %v1847_v1 = vunpack.c.l.b16 %v6277_v56 }
 0x105   : > { %v1910_v2 = vsel %vm1909_vm14, %v1844_v57, %v1908_v63  ;;  %v6335_v3 = vpack.c.bf16 %v1120_v53, %v1120_v53  ;;  %v672_v4 = vmax.f32 %v670_v59, %v671_v50  ;;  %v638_v5 = vmax.f32 %v532_v62, 0.0  ;;  %v7101_v6 = vpop.f32.mrb[16].mxu0 }
 0x106   : > { %v1846_v7 = vunpack.c.l.b16 %v6276_v0  ;;  %v1912_v11 = vsel %vm1911_vm15, %v1845_v9, %v1910_v2  ;;  %v524_v23 = vadd.f32 %v7033_v47, %v7061_v18  ;;  %v545_v12 = vadd.f32 %v7072_v43, %v7033_v47  ;;  %v7108_v8 = vpop.f32.mrb[17].mxu0 }
 0x107   : > { %v1998_v10 = vsel %vm7004_vm8, %v6335_v3, %v1997_v21  ;;  %v762_v13 = vcombine.high %v672_v4, %v672_v4  ;;  %v769_v14 = vrot.slane %v672_v4, %v7043_v61  ;;  %v674_v15 = vsel %vm663_vm10, %v638_v5, -inf  ;;  %v7114_v16 = vpop.f32.mrb[18].mxu0 }
 0x108   : > { %v1914_v17 = vsel %vm1913_vm0, %v1846_v7, %v1912_v11  ;;  %1999 = vst [vmem:[#allocation2 + $0xc] sm:$0x1] %v1998_v10  ;;  %v636_v19 = vmax.f32 %v524_v23, 0.0  ;;  %v641_v18 = vmax.f32 %v545_v12, 0.0  ;;  %v537_v43 = vadd.f32 %v7033_v47, %v7076_v49  ;;  %v7119_v20 = vpop.f32.mrb[19].mxu0 }
 0x109   : > { %v1916_v24 = vsel %vm1915_vm1, %v1847_v1, %v1914_v17  ;;  %v776_v29 = vrot.slane %v762_v13, %v7043_v61  ;;  %v777_v30 = vcombine.high %v769_v14, %v769_v14  ;;  %v1121_v32 = vsel %vm1064_vm11, %v769_v14, -inf }
 0x10a   : > { %v1959_v34 = vpack.c.b16 %v1916_v24, %v1916_v24  ;;  %v1122_v35 = vrot.slane %v1121_v32, 4  ;;  %v673_v36 = vsel %vm663_vm10, %v636_v19, -inf  ;;  %v7126_v37 = vsel %vm663_vm10, %v641_v18, -inf }
 0x10b   : > { %v778_v39 = vcombine.high %v776_v29, %v776_v29  ;;  %v1128_v49 = vsel %vm1064_vm11, %v777_v30, -inf  ;;  %v1135_v40 = vsel %vm1064_vm11, %v776_v29, -inf  ;;  %v675_v41 = vmax.f32 %v673_v36, %v674_v15 }
 0x10c   : > { %v1995_v42 = vsel %vm7014_vm9, %v1959_v34, %v1994_v28  ;;  %v1123_v45 = vmax.f32 %v1121_v32, %v1122_v35  ;;  %v1129_v46 = vrot.slane %v1128_v49, 4  ;;  %v1136_v48 = vrot.slane %v1135_v40, 4 }
 0x10d   : > { %1996 = vst [vmem:[#allocation2 + $0x8] sm:$0xf] %v1995_v42  ;;  %v1142_v50 = vsel %vm1064_vm11, %v778_v39, -inf  ;;  %v779_v51 = vcombine.high %v675_v41, %v675_v41  ;;  %v786_v53 = vrot.slane %v675_v41, %v7043_v61  ;;  %v639_v54 = vmax.f32 %v537_v43, 0.0  ;;  %v7134_v56 = vpop.f32.mrb[20].mxu0 }
 0x10e   : > { %v1124_v57 = vrot.slane %v1123_v45, 2  ;;  %v1130_v58 = vmax.f32 %v1128_v49, %v1129_v46  ;;  %v1137_v59 = vmax.f32 %v1135_v40, %v1136_v48  ;;  %v1143_v62 = vrot.slane %v1142_v50, 4  ;;  %v7136_v63 = vpop.f32.mrb[21].mxu0 }
 0x10f   : > { %v793_v0 = vrot.slane %v779_v51, %v7043_v61  ;;  %v794_v9 = vcombine.high %v786_v53, %v786_v53  ;;  %v1149_v1 = vsel %vm1064_vm11, %v786_v53, -inf  ;;  %v676_v21 = vsel %vm663_vm10, %v639_v54, -inf  ;;  %v7141_v2 = vpop.f32.mrb[22].mxu0 }
 0x110   : > { %v1125_v3 = vmax.f32 %v1123_v45, %v1124_v57  ;;  %v1131_v4 = vrot.slane %v1130_v58, 2  ;;  %v1138_v5 = vrot.slane %v1137_v59, 2  ;;  %v1144_v7 = vmax.f32 %v1142_v50, %v1143_v62  ;;  %v7143_v11 = vpop.f32.mrb[23].mxu0 }
 0x111   : > { %v795_v23 = vcombine.high %v793_v0, %v793_v0  ;;  %v1150_v12 = vrot.slane %v1149_v1, 4  ;;  %v1156_v10 = vsel %vm1064_vm11, %v794_v9, -inf  ;;  %v1163_v13 = vsel %vm1064_vm11, %v793_v0, -inf }
 0x112   : > { %v1126_v14 = vrot.slane %v1125_v3, 1  ;;  %v1132_v15 = vmax.f32 %v1130_v58, %v1131_v4  ;;  %v1139_v17 = vmax.f32 %v1137_v59, %v1138_v5  ;;  %v1145_v19 = vrot.slane %v1144_v7, 2 }
 0x113   : > { %v1151_v18 = vmax.f32 %v1149_v1, %v1150_v12  ;;  %v1157_v43 = vrot.slane %v1156_v10, 4  ;;  %v1164_v24 = vrot.slane %v1163_v13, 4  ;;  %v1170_v28 = vsel %vm1064_vm11, %v795_v23, -inf }
 0x114   : > { %v1127_v29 = vmax.f32 %v1125_v3, %v1126_v14  ;;  %v1133_v30 = vrot.slane %v1132_v15, 1  ;;  %v1140_v32 = vrot.slane %v1139_v17, 1  ;;  %v1146_v34 = vmax.f32 %v1144_v7, %v1145_v19 }
 0x115   : > { %v1152_v35 = vrot.slane %v1151_v18, 2  ;;  %v1158_v36 = vmax.f32 %v1156_v10, %v1157_v43  ;;  %v1165_v39 = vmax.f32 %v1163_v13, %v1164_v24  ;;  %v1171_v49 = vrot.slane %v1170_v28, 4  ;;  %v7148_v40 = vpop.f32.mrb[24].mxu0 }
 0x116   : > { %v1134_v41 = vmax.f32 %v1132_v15, %v1133_v30  ;;  %v1141_v42 = vmax.f32 %v1139_v17, %v1140_v32  ;;  %v1147_v45 = vrot.slane %v1146_v34, 1  ;;  %v6279_v46 = vpack.c.bf16 %v1127_v29, %v1127_v29  ;;  %v7150_v48 = vpop.f32.mrb[25].mxu0 }
 0x117   : > { %v1153_v50 = vmax.f32 %v1151_v18, %v1152_v35  ;;  %v1159_v51 = vrot.slane %v1158_v36, 2  ;;  %v1166_v53 = vrot.slane %v1165_v39, 2  ;;  %v1172_v54 = vmax.f32 %v1170_v28, %v1171_v49  ;;  %v7152_v57 = vpop.f32.mrb[26].mxu0 }
 0x118   : > { %v1148_v58 = vmax.f32 %v1146_v34, %v1147_v45  ;;  %v6280_v59 = vpack.c.bf16 %v1134_v41, %v1134_v41  ;;  %v6281_v62 = vpack.c.bf16 %v1141_v42, %v1141_v42  ;;  %v1849_v0 = vunpack.c.l.b16 %v6279_v46  ;;  %v7154_v9 = vpop.f32.mrb[27].mxu0  ;;  %v2003_v45 = vld [vmem:[#allocation2 + $0x14] sm:$0x1] }
 0x119   : > { %v1154_v1 = vrot.slane %v1153_v50, 1  ;;  %v1160_v3 = vmax.f32 %v1158_v36, %v1159_v51  ;;  %v1167_v4 = vmax.f32 %v1165_v39, %v1166_v53  ;;  %v1173_v5 = vrot.slane %v1172_v54, 2 }
 0x11a   : > { %v6282_v7 = vpack.c.bf16 %v1148_v58, %v1148_v58  ;;  %v1850_v23 = vunpack.c.l.b16 %v6280_v59  ;;  %v1851_v12 = vunpack.c.l.b16 %v6281_v62  ;;  %v678_v10 = vmax.f32 %v676_v21, %v7126_v37 }
 0x11b   : > { %v1155_v13 = vmax.f32 %v1153_v50, %v1154_v1  ;;  %v1161_v14 = vrot.slane %v1160_v3, 1  ;;  %v1168_v15 = vrot.slane %v1167_v4, 1  ;;  %v1174_v17 = vmax.f32 %v1172_v54, %v1173_v5 }
 0x11c   : > { %v1852_v19 = vunpack.c.l.b16 %v6282_v7  ;;  %v1917_v18 = vsel %vm1905_vm12, %v1850_v23, %v1849_v0  ;;  %v796_v43 = vcombine.high %v678_v10, %v678_v10  ;;  %v803_v24 = vrot.slane %v678_v10, %v7043_v61  ;;  %v2000_v10 = vld [vmem:[#allocation2 + $0x10] sm:$0xf] }
 0x11d   : > { %v1918_v28 = vsel %vm1907_vm13, %v1851_v12, %v1917_v18  ;;  %v1162_v29 = vmax.f32 %v1160_v3, %v1161_v14  ;;  %v1169_v30 = vmax.f32 %v1167_v4, %v1168_v15  ;;  %v1175_v32 = vrot.slane %v1174_v17, 1 }
 0x11e   : > { %v6283_v34 = vpack.c.bf16 %v1155_v13, %v1155_v13  ;;  %v1919_v35 = vsel %vm1909_vm14, %v1852_v19, %v1918_v28  ;;  %v810_v37 = vrot.slane %v796_v43, %v7043_v61  ;;  %v811_v21 = vcombine.high %v803_v24, %v803_v24 }
 0x11f   : > { %v1176_v36 = vmax.f32 %v1174_v17, %v1175_v32  ;;  %v6284_v39 = vpack.c.bf16 %v1162_v29, %v1162_v29  ;;  %v6285_v49 = vpack.c.bf16 %v1169_v30, %v1169_v30  ;;  %v1177_v41 = vsel %vm1064_vm11, %v803_v24, -inf  ;;  %v7175_v24 = vpop.f32.mrb[28].mxu0 }
 0x120   : > { %v1853_v42 = vunpack.c.l.b16 %v6283_v34  ;;  %v812_v46 = vcombine.high %v810_v37, %v810_v37  ;;  %v1178_v50 = vrot.slane %v1177_v41, 4  ;;  %v1184_v51 = vsel %vm1064_vm11, %v811_v21, -inf  ;;  %v7179_v34 = vpop.f32.mrb[29].mxu0 }
 0x121   : > { %v1854_v53 = vunpack.c.l.b16 %v6284_v39  ;;  %v1855_v54 = vunpack.c.l.b16 %v6285_v49  ;;  %v6336_v58 = vpack.c.bf16 %v1176_v36, %v1176_v36  ;;  %v1185_v59 = vrot.slane %v1184_v51, 4  ;;  %v7183_v36 = vpop.f32.mrb[30].mxu0 }
 0x122   : > { %v1920_v62 = vsel %vm1911_vm15, %v1853_v42, %v1919_v35  ;;  %v1179_v0 = vmax.f32 %v1177_v41, %v1178_v50  ;;  %v1191_v1 = vsel %vm1064_vm11, %v810_v37, -inf  ;;  %v1198_v3 = vsel %vm1064_vm11, %v812_v46, -inf  ;;  %v7186_v42 = vpop.f32.mrb[31].mxu0 }
 0x123   : > { %v1921_v4 = vsel %vm1913_vm0, %v1854_v53, %v1920_v62  ;;  %v2004_v5 = vsel %vm7004_vm8, %v6336_v58, %v2003_v45  ;;  %v1186_v7 = vmax.f32 %v1184_v51, %v1185_v59  ;;  %v1192_v23 = vrot.slane %v1191_v1, 4 }
 0x124   : > { %v1922_v12 = vsel %vm1915_vm1, %v1855_v54, %v1921_v4  ;;  %2005 = vst [vmem:[#allocation2 + $0x14] sm:$0x1] %v2004_v5  ;;  %v1180_v13 = vrot.slane %v1179_v0, 2  ;;  %v1199_v14 = vrot.slane %v1198_v3, 4  ;;  %v548_v15 = vadd.f32 %v7078_v55, %v7033_v47 }
 0x125   : > { %v1961_v17 = vpack.c.b16 %v1922_v12, %v1922_v12  ;;  %v1187_v19 = vrot.slane %v1186_v7, 2  ;;  %v1193_v18 = vmax.f32 %v1191_v1, %v1192_v23  ;;  %v540_v43 = vadd.f32 %v7033_v47, %v7080_v60 }
 0x126   : > { %v1181_v28 = vmax.f32 %v1179_v0, %v1180_v13  ;;  %v1200_v29 = vmax.f32 %v1198_v3, %v1199_v14  ;;  %v642_v30 = vmax.f32 %v548_v15, 0.0  ;;  %v561_v32 = vadd.f32 %v7082_v27, %v7033_v47 }
 0x127   : > { %v2001_v35 = vsel %vm7014_vm9, %v1961_v17, %v2000_v10  ;;  %v1188_v55 = vmax.f32 %v1186_v7, %v1187_v19  ;;  %v1194_v37 = vrot.slane %v1193_v18, 2  ;;  %v640_v21 = vmax.f32 %v540_v43, 0.0 }
 0x128   : > { %2002 = vst [vmem:[#allocation2 + $0x10] sm:$0xf] %v2001_v35  ;;  %v1182_v60 = vrot.slane %v1181_v28, 1  ;;  %v1201_v39 = vrot.slane %v1200_v29, 2  ;;  %v680_v49 = vsel %vm663_vm10, %v642_v30, -inf  ;;  %v645_v41 = vmax.f32 %v561_v32, 0.0 }
 0x129   : > { %v1189_v45 = vrot.slane %v1188_v55, 1  ;;  %v1195_v27 = vmax.f32 %v1193_v18, %v1194_v37  ;;  %v679_v46 = vsel %vm663_vm10, %v640_v21, -inf  ;;  %v553_v50 = vadd.f32 %v7033_v47, %v7084_v33 }
 0x12a   : > { %v1183_v51 = vmax.f32 %v1181_v28, %v1182_v60  ;;  %v1202_v53 = vmax.f32 %v1200_v29, %v1201_v39  ;;  %v681_v54 = vmax.f32 %v679_v46, %v680_v49  ;;  %v683_v58 = vsel %vm663_vm10, %v645_v41, -inf }
 0x12b   : > { %v1190_v59 = vmax.f32 %v1188_v55, %v1189_v45  ;;  %v1196_v62 = vrot.slane %v1195_v27, 1  ;;  %v643_v0 = vmax.f32 %v553_v50, 0.0  ;;  %v564_v1 = vadd.f32 %v7086_v38, %v7033_v47 }
 0x12c   : > { %v1203_v3 = vrot.slane %v1202_v53, 1  ;;  %v6287_v4 = vpack.c.bf16 %v1183_v51, %v1183_v51  ;;  %v813_v5 = vcombine.high %v681_v54, %v681_v54  ;;  %v820_v7 = vrot.slane %v681_v54, %v7043_v61 }
 0x12d   : > { %v1197_v23 = vmax.f32 %v1195_v27, %v1196_v62  ;;  %v6288_v12 = vpack.c.bf16 %v1190_v59, %v1190_v59  ;;  %v682_v33 = vsel %vm663_vm10, %v643_v0, -inf  ;;  %v646_v10 = vmax.f32 %v564_v1, 0.0 }
 0x12e   : > { %v1204_v13 = vmax.f32 %v1202_v53, %v1203_v3  ;;  %v1857_v14 = vunpack.c.l.b16 %v6287_v4  ;;  %v827_v15 = vrot.slane %v813_v5, %v7043_v61  ;;  %v828_v17 = vcombine.high %v820_v7, %v820_v7 }
 0x12f   : > { %v6289_v19 = vpack.c.bf16 %v1197_v23, %v1197_v23  ;;  %v1858_v18 = vunpack.c.l.b16 %v6288_v12  ;;  %v1205_v43 = vsel %vm1064_vm11, %v820_v7, -inf  ;;  %v684_v38 = vmax.f32 %v682_v33, %v683_v58 }
 0x130   : > { %v6290_v28 = vpack.c.bf16 %v1204_v13, %v1204_v13  ;;  %v829_v29 = vcombine.high %v827_v15, %v827_v15  ;;  %v1206_v30 = vrot.slane %v1205_v43, 4  ;;  %v1212_v32 = vsel %vm1064_vm11, %v828_v17, -inf }
 0x131   : > { %v1859_v35 = vunpack.c.l.b16 %v6289_v19  ;;  %v1923_v55 = vsel %vm1905_vm12, %v1858_v18, %v1857_v14  ;;  %v1213_v37 = vrot.slane %v1212_v32, 4  ;;  %v1219_v21 = vsel %vm1064_vm11, %v827_v15, -inf }
 0x132   : > { %v1860_v60 = vunpack.c.l.b16 %v6290_v28  ;;  %v1207_v39 = vmax.f32 %v1205_v43, %v1206_v30  ;;  %v1220_v49 = vrot.slane %v1219_v21, 4  ;;  %v1226_v41 = vsel %vm1064_vm11, %v829_v29, -inf }
 0x133   : > { %v1924_v45 = vsel %vm1907_vm13, %v1859_v35, %v1923_v55  ;;  %v1214_v27 = vmax.f32 %v1212_v32, %v1213_v37  ;;  %v1227_v46 = vrot.slane %v1226_v41, 4  ;;  %v830_v50 = vcombine.high %v684_v38, %v684_v38 }
 0x134   : > { %v1208_v51 = vrot.slane %v1207_v39, 2  ;;  %v1221_v53 = vmax.f32 %v1219_v21, %v1220_v49  ;;  %v1925_v54 = vsel %vm1909_vm14, %v1860_v60, %v1924_v45  ;;  %v837_v58 = vrot.slane %v684_v38, %v7043_v61 }
 0x135   : > { %v1215_v59 = vrot.slane %v1214_v27, 2  ;;  %v1228_v62 = vmax.f32 %v1226_v41, %v1227_v46  ;;  %v844_v0 = vrot.slane %v830_v50, %v7043_v61  ;;  %v7207_v1 = vsel %vm663_vm10, %v646_v10, -inf }
 0x136   : > { %v1209_v3 = vmax.f32 %v1207_v39, %v1208_v51  ;;  %v1222_v4 = vrot.slane %v1221_v53, 2  ;;  %v845_v5 = vcombine.high %v837_v58, %v837_v58  ;;  %v1233_v7 = vsel %vm1064_vm11, %v837_v58, -inf  ;;  %v2009_v58 = vld [vmem:[#allocation2 + $0x1c] sm:$0x1] }
 0x137   : > { %v1216_v23 = vmax.f32 %v1214_v27, %v1215_v59  ;;  %v1229_v12 = vrot.slane %v1228_v62, 2  ;;  %v846_v33 = vcombine.high %v844_v0, %v844_v0  ;;  %v1234_v13 = vrot.slane %v1233_v7, 4 }
 0x138   : > { %v1210_v14 = vrot.slane %v1209_v3, 1  ;;  %v1223_v15 = vmax.f32 %v1221_v53, %v1222_v4  ;;  %v1240_v17 = vsel %vm1064_vm11, %v845_v5, -inf  ;;  %v1247_v19 = vsel %vm1064_vm11, %v844_v0, -inf }
 0x139   : > { %v1217_v18 = vrot.slane %v1216_v23, 1  ;;  %v1230_v43 = vmax.f32 %v1228_v62, %v1229_v12  ;;  %v1235_v38 = vmax.f32 %v1233_v7, %v1234_v13  ;;  %v1241_v10 = vrot.slane %v1240_v17, 4 }
 0x13a   : > { %v1211_v28 = vmax.f32 %v1209_v3, %v1210_v14  ;;  %v1224_v29 = vrot.slane %v1223_v15, 1  ;;  %v1248_v30 = vrot.slane %v1247_v19, 4  ;;  %v1254_v32 = vsel %vm1064_vm11, %v846_v33, -inf }
 0x13b   : > { %v1218_v35 = vmax.f32 %v1216_v23, %v1217_v18  ;;  %v1231_v55 = vrot.slane %v1230_v43, 1  ;;  %v1236_v37 = vrot.slane %v1235_v38, 2  ;;  %v1242_v21 = vmax.f32 %v1240_v17, %v1241_v10  ;;  %v2006_v18 = vld [vmem:[#allocation2 + $0x18] sm:$0xf] }
 0x13c   : > { %v1225_v60 = vmax.f32 %v1223_v15, %v1224_v29  ;;  %v6291_v39 = vpack.c.bf16 %v1211_v28, %v1211_v28  ;;  %v1249_v49 = vmax.f32 %v1247_v19, %v1248_v30  ;;  %v1255_v41 = vrot.slane %v1254_v32, 4 }
 0x13d   : > { %v1232_v45 = vmax.f32 %v1230_v43, %v1231_v55  ;;  %v6292_v27 = vpack.c.bf16 %v1218_v35, %v1218_v35  ;;  %v1237_v46 = vmax.f32 %v1235_v38, %v1236_v37  ;;  %v1243_v50 = vrot.slane %v1242_v21, 2 }
 0x13e   : > { %v6293_v51 = vpack.c.bf16 %v1225_v60, %v1225_v60  ;;  %v1861_v53 = vunpack.c.l.b16 %v6291_v39  ;;  %v1250_v59 = vrot.slane %v1249_v49, 2  ;;  %v1256_v62 = vmax.f32 %v1254_v32, %v1255_v41 }
 0x13f   : > { %v1862_v0 = vunpack.c.l.b16 %v6292_v27  ;;  %v6337_v3 = vpack.c.bf16 %v1232_v45, %v1232_v45  ;;  %v1238_v4 = vrot.slane %v1237_v46, 1  ;;  %v1244_v5 = vmax.f32 %v1242_v21, %v1243_v50 }
 0x140   : > { %v1863_v7 = vunpack.c.l.b16 %v6293_v51  ;;  %v1926_v23 = vsel %vm1911_vm15, %v1861_v53, %v1925_v54  ;;  %v1251_v12 = vmax.f32 %v1249_v49, %v1250_v59  ;;  %v1257_v33 = vrot.slane %v1256_v62, 2  ;;  %v6574_v51 = vld [vmem:[%s8480_s3 + $0x100] sm:$0xff]  }
 0x141   : > { %v1927_v13 = vsel %vm1913_vm0, %v1862_v0, %v1926_v23  ;;  %v2010_v14 = vsel %vm7004_vm8, %v6337_v3, %v2009_v58  ;;  %v1239_v15 = vmax.f32 %v1237_v46, %v1238_v4  ;;  %v1245_v17 = vrot.slane %v1244_v5, 1  ;;  %6501 = vmatprep.subr.bf16.mxu0 %v6574_v51 }
 0x142   : > { %v1928_v19 = vsel %vm1915_vm1, %v1863_v7, %v1927_v13  ;;  %2011 = vst [vmem:[#allocation2 + $0x1c] sm:$0x1] %v2010_v14  ;;  %v1252_v43 = vrot.slane %v1251_v12, 1  ;;  %v1258_v38 = vmax.f32 %v1256_v62, %v1257_v33  ;;  %v556_v10 = vadd.f32 %v7033_v47, %v7088_v44  ;;  %6502 = vmatpush3.bf16.msra.mxu0 %v6574_v51 }
 0x143   : > { %v1963_v28 = vpack.c.b16 %v1928_v19, %v1928_v19  ;;  %v1246_v54 = vmax.f32 %v1244_v5, %v1245_v17  ;;  %v6295_v29 = vpack.c.bf16 %v1239_v15, %v1239_v15  ;;  %v577_v30 = vadd.f32 %v7101_v6, %v7033_v47 }
 0x144   : > { %v1253_v32 = vmax.f32 %v1251_v12, %v1252_v43  ;;  %v1259_v35 = vrot.slane %v1258_v38, 1  ;;  %v644_v55 = vmax.f32 %v556_v10, 0.0  ;;  %v569_v37 = vadd.f32 %v7033_v47, %v7108_v8 }
 0x145   : > { %v2007_v21 = vsel %vm7014_vm9, %v1963_v28, %v2006_v18  ;;  %v6296_v60 = vpack.c.bf16 %v1246_v54, %v1246_v54  ;;  %v1865_v39 = vunpack.c.l.b16 %v6295_v29  ;;  %v649_v49 = vmax.f32 %v577_v30, 0.0 }
 0x146   : > { %2008 = vst [vmem:[#allocation2 + $0x18] sm:$0xf] %v2007_v21  ;;  %v1260_v44 = vmax.f32 %v1258_v38, %v1259_v35  ;;  %v6297_v41 = vpack.c.bf16 %v1253_v32, %v1253_v32  ;;  %v685_v45 = vsel %vm663_vm10, %v644_v55, -inf  ;;  %v647_v27 = vmax.f32 %v569_v37, 0.0 }
 0x147   : > { %v1866_v46 = vunpack.c.l.b16 %v6296_v60  ;;  %v687_v6 = vmax.f32 %v685_v45, %v7207_v1  ;;  %v689_v50 = vsel %vm663_vm10, %v649_v49, -inf  ;;  %v580_v8 = vadd.f32 %v7114_v16, %v7033_v47  ;;  %v6576_v49 = vld [vmem:[%s8480_s3 + $0x108] sm:$0xff]  }
 0x148   : > { %v6298_v53 = vpack.c.bf16 %v1260_v44, %v1260_v44  ;;  %v1867_v58 = vunpack.c.l.b16 %v6297_v41  ;;  %v688_v59 = vsel %vm663_vm10, %v647_v27, -inf  ;;  %v7237_v62 = vadd.f32 %v7033_v47, %v7119_v20  ;;  %v6578_v44 = vld [vmem:[%s8480_s3 + $0x110] sm:$0xff]   ;;  %6503 = vmatprep.subr.bf16.mxu0 %v6576_v49 }
 0x149   : > { %v1929_v0 = vsel %vm1905_vm12, %v1866_v46, %v1865_v39  ;;  %v847_v1 = vcombine.high %v687_v6, %v687_v6  ;;  %v854_v3 = vrot.slane %v687_v6, %v7043_v61  ;;  %v690_v4 = vmax.f32 %v688_v59, %v689_v50  ;;  %6504 = vmatpush3.bf16.msra.mxu0 %v6576_v49 }
 0x14a   : > { %v1868_v16 = vunpack.c.l.b16 %v6298_v53  ;;  %v1930_v5 = vsel %vm1907_vm13, %v1867_v58, %v1929_v0  ;;  %v650_v7 = vmax.f32 %v580_v8, 0.0  ;;  %v648_v23 = vmax.f32 %v7237_v62, 0.0  ;;  %6505 = vmatprep.subr.bf16.mxu0 %v6578_v44  ;;  %v7284_v62 = vld [vmem:[%s8479_s2] ss:$0 sm:$0xff] }
 0x14b   : > { %v861_v12 = vrot.slane %v847_v1, %v7043_v61  ;;  %v862_v33 = vcombine.high %v854_v3, %v854_v3  ;;  %v1261_v47 = vsel %vm1064_vm11, %v854_v3, -inf  ;;  %v864_v20 = vcombine.high %v690_v4, %v690_v4 }
 0x14c   : > { %v1262_v13 = vrot.slane %v1261_v47, 4  ;;  %v7246_v14 = vsel %vm1909_vm14, %v1868_v16, %v1930_v5  ;;  %v871_v15 = vrot.slane %v690_v4, %v7043_v61  ;;  %v7250_v17 = vsel %vm663_vm10, %v650_v7, -inf  ;;  %v6580_v5 = vld [vmem:[%s8480_s3 + $0x118] sm:$0xff]  }
 0x14d   : > { %v863_v19 = vcombine.high %v861_v12, %v861_v12  ;;  %v1268_v18 = vsel %vm1064_vm11, %v862_v33, -inf  ;;  %v1275_v43 = vsel %vm1064_vm11, %v861_v12, -inf  ;;  %v878_v38 = vrot.slane %v864_v20, %v7043_v61  ;;  %6506 = vmatpush3.bf16.msra.mxu0 %v6578_v44 }
 0x14e   : > { %v1263_v10 = vmax.f32 %v1261_v47, %v1262_v13  ;;  %v1269_v28 = vrot.slane %v1268_v18, 4  ;;  %v1276_v54 = vrot.slane %v1275_v43, 4  ;;  %v879_v29 = vcombine.high %v871_v15, %v871_v15  ;;  %6507 = vmatprep.subr.bf16.mxu0 %v6580_v5 }
 0x14f   : > { %v1282_v30 = vsel %vm1064_vm11, %v863_v19, -inf  ;;  %v880_v32 = vcombine.high %v878_v38, %v878_v38  ;;  %v1289_v35 = vsel %vm1064_vm11, %v871_v15, -inf  ;;  %v1303_v55 = vsel %vm1064_vm11, %v878_v38, -inf }
 0x150   : > { %v1264_v37 = vrot.slane %v1263_v10, 2  ;;  %v1270_v21 = vmax.f32 %v1268_v18, %v1269_v28  ;;  %v1277_v60 = vmax.f32 %v1275_v43, %v1276_v54  ;;  %v1283_v39 = vrot.slane %v1282_v30, 4 }
 0x151   : > { %v1290_v41 = vrot.slane %v1289_v35, 4  ;;  %v1296_v45 = vsel %vm1064_vm11, %v879_v29, -inf  ;;  %v1304_v27 = vrot.slane %v1303_v55, 4  ;;  %v1310_v46 = vsel %vm1064_vm11, %v880_v32, -inf  ;;  %6508 = vmatpush3.bf16.msra.mxu0 %v6580_v5 }
 0x152   : > { %v1265_v6 = vmax.f32 %v1263_v10, %v1264_v37  ;;  %v1271_v50 = vrot.slane %v1270_v21, 2  ;;  %v1278_v8 = vrot.slane %v1277_v60, 2  ;;  %v1284_v51 = vmax.f32 %v1282_v30, %v1283_v39 }
 0x153   : > { %v1291_v53 = vmax.f32 %v1289_v35, %v1290_v41  ;;  %v1297_v58 = vrot.slane %v1296_v45, 4  ;;  %v1305_v59 = vmax.f32 %v1303_v55, %v1304_v27  ;;  %v1311_v0 = vrot.slane %v1310_v46, 4  ;;  %v2015_v41 = vld [vmem:[#allocation2 + $0x24] sm:$0x1] }
 0x154   : > { %v1266_v1 = vrot.slane %v1265_v6, 1  ;;  %v1272_v3 = vmax.f32 %v1270_v21, %v1271_v50  ;;  %v1279_v4 = vmax.f32 %v1277_v60, %v1278_v8  ;;  %v1285_v16 = vrot.slane %v1284_v51, 2  ;;  %v1538_v50 = vld [vmem:[#allocation2 + $0x28] sm:$0x1] }
 0x155   : > { %v1292_v7 = vrot.slane %v1291_v53, 2  ;;  %v1298_v12 = vmax.f32 %v1296_v45, %v1297_v58  ;;  %v1306_v33 = vrot.slane %v1305_v59, 2  ;;  %v1312_v47 = vmax.f32 %v1310_v46, %v1311_v0 }
 0x156   : > { %v1267_v20 = vmax.f32 %v1265_v6, %v1266_v1  ;;  %v1273_v13 = vrot.slane %v1272_v3, 1  ;;  %v1280_v15 = vrot.slane %v1279_v4, 1  ;;  %v1286_v19 = vmax.f32 %v1284_v51, %v1285_v16 }
 0x157   : > { %v1293_v18 = vmax.f32 %v1291_v53, %v1292_v7  ;;  %v1299_v43 = vrot.slane %v1298_v12, 2  ;;  %v1307_v38 = vmax.f32 %v1305_v59, %v1306_v33  ;;  %v1313_v10 = vrot.slane %v1312_v47, 2 }
 0x158   : > { %v1274_v28 = vmax.f32 %v1272_v3, %v1273_v13  ;;  %v1281_v54 = vmax.f32 %v1279_v4, %v1280_v15  ;;  %v1287_v29 = vrot.slane %v1286_v19, 1  ;;  %v6299_v30 = vpack.c.bf16 %v1267_v20, %v1267_v20 }
 0x159   : > { %v1294_v32 = vrot.slane %v1293_v18, 1  ;;  %v1300_v35 = vmax.f32 %v1298_v12, %v1299_v43  ;;  %v1308_v55 = vrot.slane %v1307_v38, 1  ;;  %v1314_v37 = vmax.f32 %v1312_v47, %v1313_v10 }
 0x15a   : > { %v1288_v21 = vmax.f32 %v1286_v19, %v1287_v29  ;;  %v6300_v60 = vpack.c.bf16 %v1274_v28, %v1274_v28  ;;  %v6301_v39 = vpack.c.bf16 %v1281_v54, %v1281_v54  ;;  %v1869_v49 = vunpack.c.l.b16 %v6299_v30 }
 0x15b   : > { %v1295_v45 = vmax.f32 %v1293_v18, %v1294_v32  ;;  %v1301_v27 = vrot.slane %v1300_v35, 1  ;;  %v1309_v46 = vmax.f32 %v1307_v38, %v1308_v55  ;;  %v1315_v6 = vrot.slane %v1314_v37, 1 }
 0x15c   : > { %v1870_v44 = vunpack.c.l.b16 %v6300_v60  ;;  %v1871_v8 = vunpack.c.l.b16 %v6301_v39  ;;  %v1932_v51 = vsel %vm1911_vm15, %v1869_v49, %v7246_v14  ;;  %v6338_v53 = vpack.c.bf16 %v1288_v21, %v1288_v21  ;;  %v2012_v14 = vld [vmem:[#allocation2 + $0x20] sm:$0xf] }
 0x15d   : > { %v1302_v58 = vmax.f32 %v1300_v35, %v1301_v27  ;;  %v1316_v59 = vmax.f32 %v1314_v37, %v1315_v6  ;;  %v6303_v0 = vpack.c.bf16 %v1295_v45, %v1295_v45  ;;  %v6305_v1 = vpack.c.bf16 %v1309_v46, %v1309_v46 }
 0x15e   : > { %v1933_v3 = vsel %vm1913_vm0, %v1870_v44, %v1932_v51  ;;  %v2016_v4 = vsel %vm7004_vm8, %v6338_v53, %v2015_v41  ;;  %v691_v16 = vsel %vm663_vm10, %v648_v23, -inf  ;;  %v1539_v5 = vsel %vm7004_vm8, 0, %v1538_v50 }
 0x15f   : > { %v1934_v7 = vsel %vm1915_vm1, %v1871_v8, %v1933_v3  ;;  %2017 = vst [vmem:[#allocation2 + $0x24] sm:$0x1] %v2016_v4  ;;  %v6304_v12 = vpack.c.bf16 %v1302_v58, %v1302_v58  ;;  %v6306_v33 = vpack.c.bf16 %v1316_v59, %v1316_v59  ;;  %v1873_v47 = vunpack.c.l.b16 %v6303_v0  ;;  %1540 = vst [vmem:[#allocation2 + $0x28] sm:$0x1] %v1539_v5 }
 0x160   : > { %v1965_v20 = vpack.c.b16 %v1934_v7, %v1934_v7  ;;  %v1875_v13 = vunpack.c.l.b16 %v6305_v1  ;;  %v693_v15 = vmax.f32 %v691_v16, %v7250_v17  ;;  %v593_v23 = vadd.f32 %v7284_v62, %v7134_v56 }
 0x161   : > { %v1874_v19 = vunpack.c.l.b16 %v6304_v12  ;;  %v1876_v18 = vunpack.c.l.b16 %v6306_v33  ;;  %v585_v43 = vadd.f32 %v7284_v62, %v7136_v63  ;;  %v596_v38 = vadd.f32 %v7284_v62, %v7141_v2 }
 0x162   : > { %v2013_v10 = vsel %vm7014_vm9, %v1965_v20, %v2012_v14  ;;  %v881_v17 = vcombine.high %v693_v15, %v693_v15  ;;  %v888_v28 = vrot.slane %v693_v15, %v7043_v61  ;;  %v653_v54 = vmax.f32 %v593_v23, 0.0 }
 0x163   : > { %2014 = vst [vmem:[#allocation2 + $0x20] sm:$0xf] %v2013_v10  ;;  %v1935_v29 = vsel %vm1905_vm12, %v1874_v19, %v1873_v47  ;;  %v651_v30 = vmax.f32 %v585_v43, 0.0  ;;  %v654_v56 = vmax.f32 %v596_v38, 0.0  ;;  %v588_v32 = vadd.f32 %v7284_v62, %v7143_v11 }
 0x164   : > { %v1936_v63 = vsel %vm1907_vm13, %v1875_v13, %v1935_v29  ;;  %v895_v35 = vrot.slane %v881_v17, %v7043_v61  ;;  %v896_v2 = vcombine.high %v888_v28, %v888_v28  ;;  %v1317_v55 = vsel %vm1064_vm11, %v888_v28, -inf }
 0x165   : > { %v1318_v37 = vrot.slane %v1317_v55, 4  ;;  %v7302_v21 = vsel %vm1909_vm14, %v1876_v18, %v1936_v63  ;;  %v695_v60 = vsel %vm663_vm10, %v653_v54, -inf  ;;  %v694_v39 = vsel %vm663_vm10, %v651_v30, -inf }
 0x166   : > { %v897_v49 = vcombine.high %v895_v35, %v895_v35  ;;  %v1324_v41 = vsel %vm1064_vm11, %v896_v2, -inf  ;;  %v1331_v11 = vsel %vm1064_vm11, %v895_v35, -inf  ;;  %v696_v45 = vmax.f32 %v694_v39, %v695_v60 }
 0x167   : > { %v1319_v27 = vmax.f32 %v1317_v55, %v1318_v37  ;;  %v1325_v46 = vrot.slane %v1324_v41, 4  ;;  %v1332_v6 = vrot.slane %v1331_v11, 4  ;;  %v7309_v50 = vsel %vm663_vm10, %v654_v56, -inf }
 0x168   : > { %v1338_v44 = vsel %vm1064_vm11, %v897_v49, -inf  ;;  %v898_v8 = vcombine.high %v696_v45, %v696_v45  ;;  %v905_v51 = vrot.slane %v696_v45, %v7043_v61  ;;  %v652_v53 = vmax.f32 %v588_v32, 0.0 }
 0x169   : > { %v1320_v58 = vrot.slane %v1319_v27, 2  ;;  %v1326_v59 = vmax.f32 %v1324_v41, %v1325_v46  ;;  %v1333_v0 = vmax.f32 %v1331_v11, %v1332_v6  ;;  %v1339_v1 = vrot.slane %v1338_v44, 4 }
 0x16a   : > { %v912_v3 = vrot.slane %v898_v8, %v7043_v61  ;;  %v913_v4 = vcombine.high %v905_v51, %v905_v51  ;;  %v1345_v16 = vsel %vm1064_vm11, %v905_v51, -inf  ;;  %v697_v5 = vsel %vm663_vm10, %v652_v53, -inf  ;;  %v2021_v8 = vld [vmem:[#allocation2 + $0x2c] sm:$0x1] }
 0x16b   : > { %v1321_v7 = vmax.f32 %v1319_v27, %v1320_v58  ;;  %v1327_v14 = vrot.slane %v1326_v59, 2  ;;  %v1334_v12 = vrot.slane %v1333_v0, 2  ;;  %v1340_v33 = vmax.f32 %v1338_v44, %v1339_v1 }
 0x16c   : > { %v914_v47 = vcombine.high %v912_v3, %v912_v3  ;;  %v1346_v20 = vrot.slane %v1345_v16, 4  ;;  %v1352_v13 = vsel %vm1064_vm11, %v913_v4, -inf  ;;  %v1359_v15 = vsel %vm1064_vm11, %v912_v3, -inf }
 0x16d   : > { %v1322_v23 = vrot.slane %v1321_v7, 1  ;;  %v1328_v19 = vmax.f32 %v1326_v59, %v1327_v14  ;;  %v1335_v18 = vmax.f32 %v1333_v0, %v1334_v12  ;;  %v1341_v43 = vrot.slane %v1340_v33, 2  ;;  %v1541_v0 = vld [vmem:[#allocation2 + $0x30] sm:$0x1] }
 0x16e   : > { %v1347_v38 = vmax.f32 %v1345_v16, %v1346_v20  ;;  %v1353_v10 = vrot.slane %v1352_v13, 4  ;;  %v1360_v17 = vrot.slane %v1359_v15, 4  ;;  %v1366_v28 = vsel %vm1064_vm11, %v914_v47, -inf }
 0x16f   : > { %v1323_v54 = vmax.f32 %v1321_v7, %v1322_v23  ;;  %v1329_v29 = vrot.slane %v1328_v19, 1  ;;  %v1336_v30 = vrot.slane %v1335_v18, 1  ;;  %v1342_v56 = vmax.f32 %v1340_v33, %v1341_v43  ;;  %v1573_v23 = vld [vmem:[#allocation2 + $0x34] sm:$0x1] }
 0x170   : > { %v1348_v32 = vrot.slane %v1347_v38, 2  ;;  %v1354_v63 = vmax.f32 %v1352_v13, %v1353_v10  ;;  %v1361_v35 = vmax.f32 %v1359_v15, %v1360_v17  ;;  %v1367_v2 = vrot.slane %v1366_v28, 4 }
 0x171   : > { %v1330_v55 = vmax.f32 %v1328_v19, %v1329_v29  ;;  %v1337_v37 = vmax.f32 %v1335_v18, %v1336_v30  ;;  %v1343_v60 = vrot.slane %v1342_v56, 1  ;;  %v6307_v39 = vpack.c.bf16 %v1323_v54, %v1323_v54  ;;  %v2018_v18 = vld [vmem:[#allocation2 + $0x28] sm:$0xf] }
 0x172   : > { %v1349_v49 = vmax.f32 %v1347_v38, %v1348_v32  ;;  %v1355_v41 = vrot.slane %v1354_v63, 2  ;;  %v1362_v11 = vrot.slane %v1361_v35, 2  ;;  %v1368_v45 = vmax.f32 %v1366_v28, %v1367_v2  ;;  %v6603_v2 = vld [vmem:[%s8480_s3 + $0x40] sm:$0xff]  }
 0x173   : > { %v1344_v27 = vmax.f32 %v1342_v56, %v1343_v60  ;;  %v6308_v46 = vpack.c.bf16 %v1330_v55, %v1330_v55  ;;  %v6309_v6 = vpack.c.bf16 %v1337_v37, %v1337_v37  ;;  %v1877_v44 = vunpack.c.l.b16 %v6307_v39  ;;  %v6604_v55 = vld [vmem:[%s8480_s3] sm:$0xff]   ;;  %v6605_v37 = vld [vmem:[%s8480_s3 + $0x48] sm:$0xff]   ;;  %6377 = vmatprep.subr.bf16.mxu1 %v6603_v2 }
 0x174   : > { %v1350_v51 = vrot.slane %v1349_v49, 1  ;;  %v1356_v53 = vmax.f32 %v1354_v63, %v1355_v41  ;;  %v1363_v58 = vmax.f32 %v1361_v35, %v1362_v11  ;;  %v1369_v59 = vrot.slane %v1368_v45, 2  ;;  %6378 = vmatpush3.bf16.msra.mxu1 %v6604_v55 }
 0x175   : > { %v1878_v1 = vunpack.c.l.b16 %v6308_v46  ;;  %v1879_v3 = vunpack.c.l.b16 %v6309_v6  ;;  %v1938_v4 = vsel %vm1911_vm15, %v1877_v44, %v7302_v21  ;;  %v6339_v16 = vpack.c.bf16 %v1344_v27, %v1344_v27  ;;  %6379 = vmatprep.subr.bf16.mxu1 %v6605_v37 }
 0x176   : > { %v1351_v7 = vmax.f32 %v1349_v49, %v1350_v51  ;;  %v1357_v14 = vrot.slane %v1356_v53, 1  ;;  %v1364_v12 = vrot.slane %v1363_v58, 1  ;;  %v1370_v33 = vmax.f32 %v1368_v45, %v1369_v59 }
 0x177   : > { %v1939_v47 = vsel %vm1913_vm0, %v1878_v1, %v1938_v4  ;;  %v2022_v20 = vsel %vm7004_vm8, %v6339_v16, %v2021_v8  ;;  %v699_v13 = vmax.f32 %v697_v5, %v7309_v50  ;;  %v1542_v15 = vsel %vm7004_vm8, 0, %v1541_v0 }
 0x178   : > { %v1940_v19 = vsel %vm1915_vm1, %v1879_v3, %v1939_v47  ;;  %2023 = vst [vmem:[#allocation2 + $0x2c] sm:$0x1] %v2022_v20  ;;  %v1358_v21 = vmax.f32 %v1356_v53, %v1357_v14  ;;  %v1365_v43 = vmax.f32 %v1363_v58, %v1364_v12  ;;  %v1371_v38 = vrot.slane %v1370_v33, 1  ;;  %1543 = vst [vmem:[#allocation2 + $0x30] sm:$0x1] %v1542_v15  ;;  %v6606_v53 = vld [vmem:[%s8480_s3 + $0x8] sm:$0xff]  }
 0x179   : > { %v1967_v10 = vpack.c.b16 %v1940_v19, %v1940_v19  ;;  %v6311_v17 = vpack.c.bf16 %v1351_v7, %v1351_v7  ;;  %v915_v28 = vcombine.high %v699_v13, %v699_v13  ;;  %v922_v54 = vrot.slane %v699_v13, %v7043_v61  ;;  %v1523_v3 = vld [vmem:[#allocation2] sm:$0x1]  ;;  %v1555_v13 = vld [vmem:[#allocation2 + $0x4] sm:$0x1]  ;;  %6380 = vmatpush3.bf16.msra.mxu1 %v6606_v53 }
 0x17a   : > { %v1372_v29 = vmax.f32 %v1370_v33, %v1371_v38  ;;  %v6312_v30 = vpack.c.bf16 %v1358_v21, %v1358_v21  ;;  %v6313_v50 = vpack.c.bf16 %v1365_v43, %v1365_v43  ;;  %v1574_v5 = vsel %vm6986_vm5, 0, %v1573_v23 }
 0x17b   : > { %v2019_v56 = vsel %vm7014_vm9, %v1967_v10, %v2018_v18  ;;  %v1881_v32 = vunpack.c.l.b16 %v6311_v17  ;;  %v929_v63 = vrot.slane %v915_v28, %v7043_v61  ;;  %v930_v35 = vcombine.high %v922_v54, %v922_v54  ;;  %1575 = vst [vmem:[#allocation2 + $0x34] sm:$0x1] %v1574_v5  ;;  %v1544_v28 = vld [vmem:[#allocation2 + $0x38] sm:$0x1] }
 0x17c   : > { %2020 = vst [vmem:[#allocation2 + $0x28] sm:$0xf] %v2019_v56  ;;  %v6314_v60 = vpack.c.bf16 %v1372_v29, %v1372_v29  ;;  %v1882_v39 = vunpack.c.l.b16 %v6312_v30  ;;  %v1883_v49 = vunpack.c.l.b16 %v6313_v50  ;;  %v1373_v41 = vsel %vm1064_vm11, %v922_v54, -inf  ;;  %v1576_v54 = vld [vmem:[#allocation2 + $0x3c] sm:$0x1] }
 0x17d   : > { %v931_v11 = vcombine.high %v929_v63, %v929_v63  ;;  %v1374_v45 = vrot.slane %v1373_v41, 4  ;;  %v1380_v27 = vsel %vm1064_vm11, %v930_v35, -inf  ;;  %v1387_v46 = vsel %vm1064_vm11, %v929_v63, -inf  ;;  %v6568_v56 = vld [vmem:[#allocation2 + $0x8] ss:$0 sps:$4 sm:$0xff]  }
 0x17e   : > { %v1884_v6 = vunpack.c.l.b16 %v6314_v60  ;;  %v1941_v44 = vsel %vm1905_vm12, %v1882_v39, %v1881_v32  ;;  %v1381_v8 = vrot.slane %v1380_v27, 4  ;;  %v1388_v51 = vrot.slane %v1387_v46, 4 }
 0x17f   : > { %v1942_v58 = vsel %vm1907_vm13, %v1883_v49, %v1941_v44  ;;  %v1375_v59 = vmax.f32 %v1373_v41, %v1374_v45  ;;  %v1394_v0 = vsel %vm1064_vm11, %v931_v11, -inf  ;;  %v609_v1 = vadd.f32 %v7284_v62, %v7148_v40 }
 0x180   : > { %v1382_v4 = vmax.f32 %v1380_v27, %v1381_v8  ;;  %v1389_v16 = vmax.f32 %v1387_v46, %v1388_v51  ;;  %v1395_v7 = vrot.slane %v1394_v0, 4  ;;  %v7355_v14 = vsel %vm1909_vm14, %v1884_v6, %v1942_v58  ;;  %v6608_v58 = vld [vmem:[%s8480_s3 + $0x50] sm:$0xff]  }
 0x181   : > { %v1376_v12 = vrot.slane %v1375_v59, 2  ;;  %v657_v33 = vmax.f32 %v609_v1, 0.0  ;;  %v601_v47 = vadd.f32 %v7284_v62, %v7150_v48  ;;  %v612_v20 = vadd.f32 %v7284_v62, %v7152_v57  ;;  %6381 = vmatprep.subr.bf16.mxu1 %v6608_v58 }
 0x182   : > { %v1383_v15 = vrot.slane %v1382_v4, 2  ;;  %v1390_v23 = vrot.slane %v1389_v16, 2  ;;  %v1396_v40 = vmax.f32 %v1394_v0, %v1395_v7  ;;  %v1524_v19 = vsel %vm7004_vm8, 0, %v1523_v3  ;;  %v2027_v1 = vld [vmem:[#allocation2 + $0x34] sm:$0x1] }
 0x183   : > { %v1377_v18 = vmax.f32 %v1375_v59, %v1376_v12  ;;  %v701_v21 = vsel %vm663_vm10, %v657_v33, -inf  ;;  %v655_v43 = vmax.f32 %v601_v47, 0.0  ;;  %v658_v38 = vmax.f32 %v612_v20, 0.0  ;;  %1525 = vst [vmem:[#allocation2] sm:$0x1] %v1524_v19  ;;  %v6609_v59 = vld [vmem:[%s8480_s3 + $0x10] sm:$0xff]  }
 0x184   : > { %v1384_v10 = vmax.f32 %v1382_v4, %v1383_v15  ;;  %v1391_v17 = vmax.f32 %v1389_v16, %v1390_v23  ;;  %v1397_v48 = vrot.slane %v1396_v40, 2  ;;  %v1556_v57 = vsel %vm6986_vm5, 0, %v1555_v13  ;;  %6382 = vmatpush3.bf16.msra.mxu1 %v6609_v59 }
 0x185   : > { %v1378_v29 = vrot.slane %v1377_v18, 1  ;;  %v700_v30 = vsel %vm663_vm10, %v655_v43, -inf  ;;  %v704_v50 = vsel %vm663_vm10, %v658_v38, -inf  ;;  %1557 = vst [vmem:[#allocation2 + $0x4] sm:$0x1] %v1556_v57  ;;  %v604_v5 = vadd.f32 %v7284_v62, %v7154_v9 }
 0x186   : > { %v1385_v32 = vrot.slane %v1384_v10, 1  ;;  %v1392_v63 = vrot.slane %v1391_v17, 1  ;;  %v1398_v35 = vmax.f32 %v1396_v40, %v1397_v48  ;;  %v702_v2 = vmax.f32 %v700_v30, %v701_v21 }
 0x187   : > { %v1379_v55 = vmax.f32 %v1377_v18, %v1378_v29  ;;  %v656_v37 = vmax.f32 %v604_v5, 0.0  ;;  %v1545_v60 = vsel %vm7004_vm8, 0, %v1544_v28  ;;  %v1577_v39 = vsel %vm6986_vm5, 0, %v1576_v54 }
 0x188   : > { %v1386_v49 = vmax.f32 %v1384_v10, %v1385_v32  ;;  %v1393_v41 = vmax.f32 %v1391_v17, %v1392_v63  ;;  %v1399_v11 = vrot.slane %v1398_v35, 1  ;;  %v932_v45 = vcombine.high %v702_v2, %v702_v2  ;;  %1546 = vst [vmem:[#allocation2 + $0x38] sm:$0x1] %v1545_v60  ;;  %1578 = vst [vmem:[#allocation2 + $0x3c] sm:$0x1] %v1577_v39 }
 0x189   : > { %v6315_v9 = vpack.c.bf16 %v1379_v55, %v1379_v55  ;;  %v939_v27 = vrot.slane %v702_v2, %v7043_v61  ;;  %v703_v46 = vsel %vm663_vm10, %v656_v37, -inf  ;;  %v2310_v6 = vrot.slane %v6568_v56, 7  ;;  %v2024_v17 = vld [vmem:[#allocation2 + $0x30] sm:$0xf]  ;;  %v7394_v63 = vld [vmem:[#allocation2 + $0x8] sm:$0xf] }
 0x18a   : > { %v1400_v44 = vmax.f32 %v1398_v35, %v1399_v11  ;;  %v6316_v8 = vpack.c.bf16 %v1386_v49, %v1386_v49  ;;  %v6317_v51 = vpack.c.bf16 %v1393_v41, %v1393_v41  ;;  %v946_v53 = vrot.slane %v932_v45, %v7043_v61  ;;  %v2042_v20 = vld [vmem:[#allocation2] sm:$0xf]  ;;  %v2051_v11 = vld [vmem:[#allocation2 + $0xc] sm:$0x1] }
 0x18b   : > { %v1885_v0 = vunpack.c.l.b16 %v6315_v9  ;;  %v947_v3 = vcombine.high %v939_v27, %v939_v27  ;;  %v1401_v4 = vsel %vm1064_vm11, %v939_v27, -inf  ;;  %v705_v16 = vmax.f32 %v703_v46, %v704_v50  ;;  %2318 = vrot.lane.b32.xlu0 %v2310_v6, %s6889_s14 }
 0x18c   : > { %v1886_v7 = vunpack.c.l.b16 %v6316_v8  ;;  %v1887_v12 = vunpack.c.l.b16 %v6317_v51  ;;  %v6340_v33 = vpack.c.bf16 %v1400_v44, %v1400_v44  ;;  %v948_v47 = vcombine.high %v946_v53, %v946_v53  ;;  %v2050_v13 = vld [vmem:[#allocation2 + $0x4] sm:$0x1] }
 0x18d   : > { %v1944_v15 = vsel %vm1911_vm15, %v1885_v0, %v7355_v14  ;;  %v1402_v23 = vrot.slane %v1401_v4, 4  ;;  %v1408_v40 = vsel %vm1064_vm11, %v947_v3, -inf  ;;  %v1415_v19 = vsel %vm1064_vm11, %v946_v53, -inf }
 0x18e   : > { %v1945_v18 = vsel %vm1913_vm0, %v1886_v7, %v1944_v15  ;;  %v2028_v21 = vsel %vm7004_vm8, %v6340_v33, %v2027_v1  ;;  %v1409_v43 = vrot.slane %v1408_v40, 4  ;;  %v1416_v38 = vrot.slane %v1415_v19, 4 }
 0x18f   : > { %v1946_v10 = vsel %vm1915_vm1, %v1887_v12, %v1945_v18  ;;  %2029 = vst [vmem:[#allocation2 + $0x34] sm:$0x1] %v2028_v21  ;;  %v1403_v48 = vmax.f32 %v1401_v4, %v1402_v23  ;;  %v1422_v14 = vsel %vm1064_vm11, %v948_v47, -inf  ;;  %v5914_v57 = vcombine.low %v2042_v20, %v2050_v13 }
 0x190   : > { %v1969_v28 = vpack.c.b16 %v1946_v10, %v1946_v10  ;;  %v1410_v54 = vmax.f32 %v1408_v40, %v1409_v43  ;;  %v1417_v29 = vmax.f32 %v1415_v19, %v1416_v38  ;;  %v1423_v30 = vrot.slane %v1422_v14, 4 }
 0x191   : > { %v1404_v50 = vrot.slane %v1403_v48, 2  ;;  %v2099_v5 = vshrl.u32 %v5914_v57, 16  ;;  %v2101_v56 = vshll.u32 %v5914_v57, 16  ;;  %v949_v32 = vcombine.high %v705_v16, %v705_v16 }
 0x192   : > { %v2025_v35 = vsel %vm7014_vm9, %v1969_v28, %v2024_v17  ;;  %v1411_v2 = vrot.slane %v1410_v54, 2  ;;  %v1418_v55 = vrot.slane %v1417_v29, 2  ;;  %v1424_v37 = vmax.f32 %v1422_v14, %v1423_v30 }
 0x193   : > { %2026 = vst [vmem:[#allocation2 + $0x30] sm:$0xf] %v2025_v35  ;;  %v1405_v60 = vmax.f32 %v1403_v48, %v1404_v50  ;;  %v2103_v39 = vrot.slane %v2101_v56, 1  ;;  %v956_v49 = vrot.slane %v705_v16, %v7043_v61  ;;  %v963_v41 = vrot.slane %v949_v32, %v7043_v61 }
 0x194   : > { %v1412_v45 = vmax.f32 %v1410_v54, %v1411_v2  ;;  %v1419_v9 = vmax.f32 %v1417_v29, %v1418_v55  ;;  %v1425_v27 = vrot.slane %v1424_v37, 2  ;;  %v5915_v46 = vcombine.low %v7394_v63, %v2051_v11  ;;  %v6610_v54 = vld [vmem:[%s8480_s3 + $0x58] sm:$0xff]  }
 0x195   : > { %v1406_v6 = vrot.slane %v1405_v60, 1  ;;  %v2104_v44 = vor.u32 %v2103_v39, %v2099_v5  ;;  %v964_v8 = vcombine.high %v956_v49, %v956_v49  ;;  %v965_v51 = vcombine.high %v963_v41, %v963_v41  ;;  %v6611_v29 = vld [vmem:[%s8480_s3 + $0x18] sm:$0xff]   ;;  %6383 = vmatprep.subr.bf16.mxu1 %v6610_v54 }
 0x196   : > { %v1413_v53 = vrot.slane %v1412_v45, 1  ;;  %v1420_v58 = vrot.slane %v1419_v9, 1  ;;  %v1426_v59 = vmax.f32 %v1424_v37, %v1425_v27  ;;  %v1429_v0 = vsel %vm1064_vm11, %v956_v49, -inf  ;;  %6384 = vmatpush3.bf16.msra.mxu1 %v6611_v29  ;;  %v2030_v29 = vld [vmem:[#allocation2 + $0x38] sm:$0xf] }
 0x197   : > { %v1407_v1 = vmax.f32 %v1405_v60, %v1406_v6  ;;  %2154 = vrot.lane.b32.xlu1 %v2104_v44, %s6889_s14  ;;  %v1430_v3 = vrot.slane %v1429_v0, 4  ;;  %v1436_v4 = vsel %vm1064_vm11, %v964_v8, -inf  ;;  %v1443_v16 = vsel %vm1064_vm11, %v963_v41, -inf }
 0x198   : > { %v1414_v7 = vmax.f32 %v1412_v45, %v1413_v53  ;;  %v1421_v12 = vmax.f32 %v1419_v9, %v1420_v58  ;;  %v1427_v33 = vrot.slane %v1426_v59, 1  ;;  %v1437_v47 = vrot.slane %v1436_v4, 4 }
 0x199   : > { %v6319_v20 = vpack.c.bf16 %v1407_v1, %v1407_v1  ;;  %v1431_v13 = vmax.f32 %v1429_v0, %v1430_v3  ;;  %v1444_v15 = vrot.slane %v1443_v16, 4  ;;  %v1450_v23 = vsel %vm1064_vm11, %v965_v51, -inf }
 0x19a   : > { %v1428_v40 = vmax.f32 %v1426_v59, %v1427_v33  ;;  %v6320_v19 = vpack.c.bf16 %v1414_v7, %v1414_v7  ;;  %v6321_v18 = vpack.c.bf16 %v1421_v12, %v1421_v12  ;;  %v1438_v21 = vmax.f32 %v1436_v4, %v1437_v47 }
 0x19b   : > { %v1889_v43 = vunpack.c.l.b16 %v6319_v20  ;;  %v1432_v38 = vrot.slane %v1431_v13, 2  ;;  %v1445_v10 = vmax.f32 %v1443_v16, %v1444_v15  ;;  %v1451_v17 = vrot.slane %v1450_v23, 4 }
 0x19c   : > { %v6322_v48 = vpack.c.bf16 %v1428_v40, %v1428_v40  ;;  %v1890_v14 = vunpack.c.l.b16 %v6320_v19  ;;  %v1891_v57 = vunpack.c.l.b16 %v6321_v18  ;;  %v1439_v28 = vrot.slane %v1438_v21, 2  ;;  %v1579_v19 = vld [vmem:[#allocation2 + $0x44] sm:$0x1] }
 0x19d   : > { %v1433_v30 = vmax.f32 %v1431_v13, %v1432_v38  ;;  %v1446_v50 = vrot.slane %v1445_v10, 2  ;;  %v1452_v5 = vmax.f32 %v1450_v23, %v1451_v17  ;;  %v2106_v56 = vshrl.u32 %v5915_v46, 16  ;;  %v2033_v13 = vld [vmem:[#allocation2 + $0x3c] sm:$0x1] }
 0x19e   : > { %v1892_v32 = vunpack.c.l.b16 %v6322_v48  ;;  %v1947_v35 = vsel %vm1905_vm12, %v1890_v14, %v1889_v43  ;;  %v1440_v2 = vmax.f32 %v1438_v21, %v1439_v28  ;;  %v2108_v55 = vshll.u32 %v5915_v46, 16  ;;  %v6613_v14 = vld [vmem:[%s8480_s3 + $0x60] sm:$0xff]   ;;  %v6615_v28 = vld [vmem:[%s8480_s3 + $0x68] sm:$0xff]  }
 0x19f   : > { %v1948_v37 = vsel %vm1907_vm13, %v1891_v57, %v1947_v35  ;;  %v1434_v60 = vrot.slane %v1433_v30, 1  ;;  %v1447_v39 = vmax.f32 %v1445_v10, %v1446_v50  ;;  %v1453_v49 = vrot.slane %v1452_v5, 2  ;;  %v6614_v57 = vld [vmem:[%s8480_s3 + $0x20] sm:$0xff]   ;;  %6385 = vmatprep.subr.bf16.mxu1 %v6613_v14 }
 0x1a0   : > { %v1441_v41 = vrot.slane %v1440_v2, 1  ;;  %v1949_v11 = vsel %vm1909_vm14, %v1892_v32, %v1948_v37  ;;  %v2110_v45 = vrot.slane %v2108_v55, 1  ;;  %v625_v9 = vadd.f32 %v7284_v62, %v7175_v24  ;;  %v6571_v55 = vld [vmem:[#allocation2 + $0x18] ss:$0 sps:$4 sm:$0xff]   ;;  %6386 = vmatpush3.bf16.msra.mxu1 %v6614_v57 }
 0x1a1   : > { %v1435_v27 = vmax.f32 %v1433_v30, %v1434_v60  ;;  %v1448_v6 = vrot.slane %v1447_v39, 1  ;;  %v1454_v44 = vmax.f32 %v1452_v5, %v1453_v49  ;;  %v617_v46 = vadd.f32 %v7284_v62, %v7179_v34  ;;  %v1547_v34 = vld [vmem:[#allocation2 + $0x40] sm:$0x1]  ;;  %6387 = vmatprep.subr.bf16.mxu1 %v6615_v28 }
 0x1a2   : > { %v1442_v8 = vmax.f32 %v1440_v2, %v1441_v41  ;;  %v2111_v51 = vor.u32 %v2110_v45, %v2106_v56  ;;  %v661_v53 = vmax.f32 %v625_v9, 0.0  ;;  %v628_v58 = vadd.f32 %v7284_v62, %v7183_v36 }
 0x1a3   : > { %v1449_v59 = vmax.f32 %v1447_v39, %v1448_v6  ;;  %v1455_v0 = vrot.slane %v1454_v44, 1  ;;  %v6323_v1 = vpack.c.bf16 %v1435_v27, %v1435_v27  ;;  %v659_v3 = vmax.f32 %v617_v46, 0.0  ;;  %v6618_v27 = vld [vmem:[%s8480_s3 + $0x70] sm:$0xff]  }
 0x1a4   : > { %v6324_v4 = vpack.c.bf16 %v1442_v8, %v1442_v8  ;;  %2156 = vrot.lane.b32.xlu1 %v2111_v51, %s6889_s14  ;;  %v707_v24 = vsel %vm663_vm10, %v661_v53, -inf  ;;  %v662_v16 = vmax.f32 %v628_v58, 0.0  ;;  %v620_v7 = vadd.f32 %v7284_v62, %v7186_v42  ;;  %v6570_v62 = vld [vmem:[#allocation2 + $0x10] ss:$0 sps:$4 sm:$0xff]   ;;  %6388 = vmatpush3.bf16.msra.mxu1 %v6616_v22 }
 0x1a5   : > { %v1456_v12 = vmax.f32 %v1454_v44, %v1455_v0  ;;  %v6325_v33 = vpack.c.bf16 %v1449_v59, %v1449_v59  ;;  %v1893_v47 = vunpack.c.l.b16 %v6323_v1  ;;  %v706_v20 = vsel %vm663_vm10, %v659_v3, -inf  ;;  %6389 = vmatprep.subr.bf16.mxu1 %v6618_v27 }
 0x1a6   : > { %v1894_v36 = vunpack.c.l.b16 %v6324_v4  ;;  %v708_v15 = vmax.f32 %v706_v20, %v707_v24  ;;  %v710_v23 = vsel %vm663_vm10, %v662_v16, -inf  ;;  %v660_v40 = vmax.f32 %v620_v7, 0.0  ;;  %v6619_v24 = vld [vmem:[%s8480_s3 + $0x30] sm:$0xff]  }
 0x1a7   : > { %v1895_v18 = vunpack.c.l.b16 %v6325_v33  ;;  %v1950_v21 = vsel %vm1911_vm15, %v1893_v47, %v1949_v11  ;;  %v6341_v43 = vpack.c.bf16 %v1456_v12, %v1456_v12  ;;  %v1548_v42 = vsel %vm7004_vm8, 0, %v1547_v34 }
 0x1a8   : > { %v1951_v38 = vsel %vm1913_vm0, %v1894_v36, %v1950_v21  ;;  %v966_v10 = vcombine.high %v708_v15, %v708_v15  ;;  %v973_v17 = vrot.slane %v708_v15, %v7043_v61  ;;  %v709_v48 = vsel %vm663_vm10, %v660_v40, -inf  ;;  %1549 = vst [vmem:[#allocation2 + $0x40] sm:$0x1] %v1548_v42  ;;  %6390 = vmatpush3.bf16.msra.mxu1 %v6619_v24 }
 0x1a9   : > { %v1952_v54 = vsel %vm1915_vm1, %v1895_v18, %v1951_v38  ;;  %v2034_v30 = vsel %vm7004_vm8, %v6341_v43, %v2033_v13  ;;  %v711_v50 = vmax.f32 %v709_v48, %v710_v23  ;;  %v1580_v5 = vsel %vm6986_vm5, 0, %v1579_v19 }
 0x1aa   : > { %v1971_v56 = vpack.c.b16 %v1952_v54, %v1952_v54  ;;  %2035 = vst [vmem:[#allocation2 + $0x3c] sm:$0x1] %v2034_v30  ;;  %v980_v32 = vrot.slane %v966_v10, %v7043_v61  ;;  %v981_v35 = vcombine.high %v973_v17, %v973_v17  ;;  %v1457_v2 = vsel %vm1064_vm11, %v973_v17, -inf  ;;  %1581 = vst [vmem:[#allocation2 + $0x44] sm:$0x1] %v1580_v5 }
 0x1ab   : > { %v1458_v37 = vrot.slane %v1457_v2, 4  ;;  %v983_v60 = vcombine.high %v711_v50, %v711_v50  ;;  %v990_v39 = vrot.slane %v711_v50, %v7043_v61  ;;  %v2311_v49 = vrot.slane %v6570_v62, 7 }
 0x1ac   : > { %v2031_v41 = vsel %vm7014_vm9, %v1971_v56, %v2030_v29  ;;  %v982_v11 = vcombine.high %v980_v32, %v980_v32  ;;  %v1464_v45 = vsel %vm1064_vm11, %v981_v35, -inf  ;;  %v1471_v9 = vsel %vm1064_vm11, %v980_v32, -inf  ;;  %v6620_v35 = vld [vmem:[%s8480_s3 + $0x78] sm:$0xff]  }
 0x1ad   : > { %2032 = vst [vmem:[#allocation2 + $0x38] sm:$0xf] %v2031_v41  ;;  %v1459_v6 = vmax.f32 %v1457_v2, %v1458_v37  ;;  %v1465_v44 = vrot.slane %v1464_v45, 4  ;;  %v1472_v46 = vrot.slane %v1471_v9, 4  ;;  %v997_v8 = vrot.slane %v983_v60, %v7043_v61  ;;  %2320 = vrot.lane.b32.xlu0 %v2311_v49, %s6889_s14  ;;  %v6621_v2 = vld [vmem:[%s8480_s3 + $0x38] sm:$0xff]   ;;  %6391 = vmatprep.subr.bf16.mxu1 %v6620_v35 }
 0x1ae   : > { %v1478_v51 = vsel %vm1064_vm11, %v982_v11, -inf  ;;  %v998_v53 = vcombine.high %v990_v39, %v990_v39  ;;  %v1485_v58 = vsel %vm1064_vm11, %v990_v39, -inf  ;;  %v2312_v59 = vrot.slane %v6571_v55, 7  ;;  %v7477_v49 = vld [vmem:[#allocation2 + $0x10] sm:$0xf]  ;;  %6392 = vmatpush3.bf16.msra.mxu1 %v6621_v2 }
 0x1af   : > { %v1460_v0 = vrot.slane %v1459_v6, 2  ;;  %v1466_v1 = vmax.f32 %v1464_v45, %v1465_v44  ;;  %v1473_v3 = vmax.f32 %v1471_v9, %v1472_v46  ;;  %v1479_v4 = vrot.slane %v1478_v51, 4  ;;  %v2052_v46 = vld [vmem:[#allocation2 + $0x14] sm:$0x1]  ;;  %v2036_v2 = vld [vmem:[#allocation2 + $0x40] sm:$0xf] }
 0x1b0   : > { %v999_v16 = vcombine.high %v997_v8, %v997_v8  ;;  %v1486_v7 = vrot.slane %v1485_v58, 4  ;;  %v1492_v34 = vsel %vm1064_vm11, %v998_v53, -inf  ;;  %v1499_v12 = vsel %vm1064_vm11, %v997_v8, -inf }
 0x1b1   : > { %v1461_v33 = vmax.f32 %v1459_v6, %v1460_v0  ;;  %v1467_v47 = vrot.slane %v1466_v1, 2  ;;  %v1474_v20 = vrot.slane %v1473_v3, 2  ;;  %v1480_v36 = vmax.f32 %v1478_v51, %v1479_v4  ;;  %2322 = vrot.lane.b32.xlu0 %v2312_v59, %s6889_s14  ;;  %v6573_v59 = vld [vmem:[#allocation2 + $0x20] ss:$0 sps:$4 sm:$0xff]  }
 0x1b2   : > { %v1487_v13 = vmax.f32 %v1485_v58, %v1486_v7  ;;  %v1493_v15 = vrot.slane %v1492_v34, 4  ;;  %v1500_v23 = vrot.slane %v1499_v12, 4  ;;  %v1506_v40 = vsel %vm1064_vm11, %v999_v16, -inf }
 0x1b3   : > { %v1462_v19 = vrot.slane %v1461_v33, 1  ;;  %v1468_v18 = vmax.f32 %v1466_v1, %v1467_v47  ;;  %v1475_v21 = vmax.f32 %v1473_v3, %v1474_v20  ;;  %v1481_v43 = vrot.slane %v1480_v36, 2 }
 0x1b4   : > { %v1488_v42 = vrot.slane %v1487_v13, 2  ;;  %v1494_v62 = vmax.f32 %v1492_v34, %v1493_v15  ;;  %v1501_v38 = vmax.f32 %v1499_v12, %v1500_v23  ;;  %v1507_v10 = vrot.slane %v1506_v40, 4  ;;  %v2995_v15 = vld [vmem:[#allocation2 + $0x18] sm:$0xe] }
 0x1b5   : > { %v1463_v17 = vmax.f32 %v1461_v33, %v1462_v19  ;;  %v1469_v48 = vrot.slane %v1468_v18, 1  ;;  %v1476_v14 = vrot.slane %v1475_v21, 1  ;;  %v1482_v57 = vmax.f32 %v1480_v36, %v1481_v43  ;;  %v2993_v36 = vld [vmem:[#allocation2 + $0x10] sm:$0xe]  ;;  %v2039_v19 = vld [vmem:[#allocation2 + $0x44] sm:$0x1] }
 0x1b6   : > { %v1489_v28 = vmax.f32 %v1487_v13, %v1488_v42  ;;  %v1495_v54 = vrot.slane %v1494_v62, 2  ;;  %v1502_v29 = vrot.slane %v1501_v38, 2  ;;  %v1508_v30 = vmax.f32 %v1506_v40, %v1507_v10  ;;  %v2994_v13 = vld [vmem:[#allocation2 + $0x14] sm:$0x1]  ;;  %v6577_v43 = vld [vmem:[#allocation2 + $0x28] ss:$0 sps:$4 sm:$0xff]  }
 0x1b7   : > { %v1470_v50 = vmax.f32 %v1468_v18, %v1469_v48  ;;  %v1477_v5 = vmax.f32 %v1475_v21, %v1476_v14  ;;  %v1483_v56 = vrot.slane %v1482_v57, 1  ;;  %v6327_v32 = vpack.c.bf16 %v1463_v17, %v1463_v17  ;;  %v2996_v10 = vld [vmem:[#allocation2 + $0x1c] sm:$0x1]  ;;  %v7483_v17 = vld [vmem:[#allocation2 + $0x18] sm:$0xf] }
 0x1b8   : > { %v1490_v55 = vrot.slane %v1489_v28, 1  ;;  %v1496_v37 = vmax.f32 %v1494_v62, %v1495_v54  ;;  %v1503_v60 = vmax.f32 %v1501_v38, %v1502_v29  ;;  %v1509_v39 = vrot.slane %v1508_v30, 2 }
 0x1b9   : > { %v1484_v22 = vmax.f32 %v1482_v57, %v1483_v56  ;;  %v6328_v41 = vpack.c.bf16 %v1470_v50, %v1470_v50  ;;  %v6329_v11 = vpack.c.bf16 %v1477_v5, %v1477_v5  ;;  %v1897_v45 = vunpack.c.l.b16 %v6327_v32  ;;  %v2053_v56 = vld [vmem:[#allocation2 + $0x1c] sm:$0x1]  ;;  %v2997_v32 = vld [vmem:[#allocation2 + $0x20] sm:$0xe] }
 0x1ba   : > { %v1491_v9 = vmax.f32 %v1489_v28, %v1490_v55  ;;  %v1497_v27 = vrot.slane %v1496_v37, 1  ;;  %v1504_v6 = vrot.slane %v1503_v60, 1  ;;  %v1510_v44 = vmax.f32 %v1508_v30, %v1509_v39  ;;  %v7487_v28 = vld [vmem:[#allocation2 + $0x20] sm:$0xf]  ;;  %v2054_v39 = vld [vmem:[#allocation2 + $0x24] sm:$0x1] }
 0x1bb   : > { %v6330_v8 = vpack.c.bf16 %v1484_v22, %v1484_v22  ;;  %v1898_v51 = vunpack.c.l.b16 %v6328_v41  ;;  %v1899_v53 = vunpack.c.l.b16 %v6329_v11  ;;  %v5916_v58 = vcombine.low %v7477_v49, %v2052_v46  ;;  %v2469_v22 = vld [vmem:[#allocation2 + $0x8] sm:$0xe] }
 0x1bc   : > { %v1498_v0 = vmax.f32 %v1496_v37, %v1497_v27  ;;  %v1505_v1 = vmax.f32 %v1503_v60, %v1504_v6  ;;  %v1511_v3 = vrot.slane %v1510_v44, 1  ;;  %v6331_v4 = vpack.c.bf16 %v1491_v9, %v1491_v9  ;;  %v2999_v9 = vld [vmem:[#allocation2 + $0x28] sm:$0xe]  ;;  %v3000_v27 = vld [vmem:[#allocation2 + $0x2c] sm:$0x1] }
 0x1bd   : > { %v1900_v24 = vunpack.c.l.b16 %v6330_v8  ;;  %v1953_v16 = vsel %vm1905_vm12, %v1898_v51, %v1897_v45  ;;  %v2113_v7 = vshrl.u32 %v5916_v58, 16  ;;  %v2115_v34 = vshll.u32 %v5916_v58, 16  ;;  %v2998_v45 = vld [vmem:[#allocation2 + $0x24] sm:$0x1]  ;;  %v7505_v51 = vld [vmem:[#allocation2 + $0x28] sm:$0xf] }
 0x1be   : > { %v1954_v12 = vsel %vm1907_vm13, %v1899_v53, %v1953_v16  ;;  %v1512_v33 = vmax.f32 %v1510_v44, %v1511_v3  ;;  %v6332_v47 = vpack.c.bf16 %v1498_v0, %v1498_v0  ;;  %v6333_v20 = vpack.c.bf16 %v1505_v1, %v1505_v1  ;;  %v2055_v53 = vld [vmem:[#allocation2 + $0x2c] sm:$0x1] }
 0x1bf   : > { %v1901_v23 = vunpack.c.l.b16 %v6331_v4  ;;  %v1955_v40 = vsel %vm1909_vm14, %v1900_v24, %v1954_v12  ;;  %v2117_v18 = vrot.slane %v2115_v34, 1  ;;  %v2313_v21 = vrot.slane %v6573_v59, 7  ;;  %v7507_v58 = vld [vmem:[#allocation2 + $0xc] sm:$0x1]  ;;  %v6581_v4 = vld [vmem:[#allocation2 + $0x30] ss:$0 sps:$4 sm:$0xff]  }
 0x1c0   : > { %v1902_v42 = vunpack.c.l.b16 %v6332_v47  ;;  %v1903_v62 = vunpack.c.l.b16 %v6333_v20  ;;  %v6342_v38 = vpack.c.bf16 %v1512_v33, %v1512_v33  ;;  %v6018_v57 = vrot.slane %v2993_v36, 9  ;;  %v7511_v24 = vld [vmem:[#allocation2 + $0x30] sm:$0xf]  ;;  %v6583_v33 = vld [vmem:[#allocation2 + $0x38] ss:$0 sps:$4 sm:$0xff]  }
 0x1c1   : > { %v1956_v48 = vsel %vm1911_vm15, %v1901_v23, %v1955_v40  ;;  %v2118_v14 = vor.u32 %v2117_v18, %v2113_v7  ;;  %2324 = vrot.lane.b32.xlu1 %v2313_v21, %s6889_s14  ;;  %v3027_v50 = vrot.slane %v2994_v13, 5  ;;  %v6019_v5 = vrot.slane %v2995_v15, 9  ;;  %v2056_v13 = vld [vmem:[#allocation2 + $0x34] sm:$0x1]  ;;  %v3001_v18 = vld [vmem:[#allocation2 + $0x30] sm:$0xe] }
 0x1c2   : > { %v1957_v54 = vsel %vm1913_vm0, %v1902_v42, %v1956_v48  ;;  %v2040_v29 = vsel %vm7004_vm8, %v6342_v38, %v2039_v19  ;;  %v3031_v55 = vrot.slane %v2996_v10, 5  ;;  %v5917_v37 = vcombine.low %v7483_v17, %v2053_v56  ;;  %v3003_v21 = vld [vmem:[#allocation2 + $0x38] sm:$0xe]  ;;  %v3002_v10 = vld [vmem:[#allocation2 + $0x34] sm:$0x1] }
 0x1c3   : > { %v1958_v35 = vsel %vm1915_vm1, %v1903_v62, %v1957_v54  ;;  %2041 = vst [vmem:[#allocation2 + $0x44] sm:$0x1] %v2040_v29  ;;  %2158 = vrot.lane.b32.xlu0 %v2118_v14, %s6889_s14  ;;  %v2314_v60 = vrot.slane %v6577_v43, 7  ;;  %v5918_v11 = vcombine.low %v7487_v28, %v2054_v39  ;;  %v3028_v6 = vsel %vm7493_vm4, %v6018_v57, %v3027_v50  ;;  %v2470_v43 = vld [vmem:[#allocation2 + $0x10] sm:$0xe] }
 0x1c4   : > { %v1973_v41 = vpack.c.b16 %v1958_v35, %v1958_v35  ;;  %v3032_v44 = vsel %vm7493_vm4, %v6019_v5, %v3031_v55  ;;  %v2122_v46 = vshll.u32 %v5917_v37, 16  ;;  %v6020_v8 = vrot.slane %v2997_v32, 9  ;;  %v3004_v48 = vld [vmem:[#allocation2 + $0x3c] sm:$0x1]  ;;  %v2471_v50 = vld [vmem:[#allocation2 + $0x18] sm:$0xe] }
 0x1c5   : > { %v6026_v0 = vcombine.low %v3028_v6, %v3032_v44  ;;  %v2120_v1 = vshrl.u32 %v5917_v37, 16  ;;  %v2129_v3 = vshll.u32 %v5918_v11, 16  ;;  %v3035_v7 = vrot.slane %v2998_v45, 5  ;;  %v7525_v29 = vld [vmem:[#allocation2 + $0x1c] sm:$0x1]  ;;  %v6626_v37 = vld [vmem:[%s8480_s3 + $0xc0] sm:$0xff]  }
 0x1c6   : > { %v2037_v59 = vsel %vm7014_vm9, %v1973_v41, %v2036_v2  ;;  %v2124_v16 = vrot.slane %v2122_v46, 1  ;;  %v6021_v34 = vrot.slane %v2999_v9, 9  ;;  %v3039_v12 = vrot.slane %v3000_v27, 5  ;;  %v7527_v5 = vld [vmem:[#allocation2 + $0x14] sm:$0x1]  ;;  %6417 = vmatprep.subr.bf16.mxu1 %v6626_v37 }
 0x1c7   : > { %2038 = vst [vmem:[#allocation2 + $0x40] sm:$0xf] %v2037_v59  ;;  %2326 = vrot.lane.b32.xlu0 %v2314_v60, %s6889_s14  ;;  %3073 = vst.msk [vmem:[#allocation3 + $0x20] sm:$0xff] %vm663_vm10, %v6026_v0  ;;  %v2127_v47 = vshrl.u32 %v5918_v11, 16  ;;  %v2131_v20 = vrot.slane %v2129_v3, 1  ;;  %v5919_v31 = vcombine.low %v7505_v51, %v2055_v53  ;;  %v5978_v36 = vcombine.low %v2469_v22, %v7507_v58 }
 0x1c8   : > { %v2125_v15 = vor.u32 %v2124_v16, %v2120_v1  ;;  %v3036_v23 = vsel %vm7493_vm4, %v6020_v8, %v3035_v7  ;;  %v3040_v40 = vsel %vm7493_vm4, %v6021_v34, %v3039_v12  ;;  %v7522_v19 = vcombine.low %v7511_v24, %v2056_v13  ;;  %v7532_v55 = vld [vmem:[#allocation2 + $0x10] sm:$0xf]  ;;  %v7537_v41 = vld [vmem:[#allocation2 + $0x38] sm:$0xf]  ;;  %v3007_v11 = vld [vmem:[#allocation2 + $0x48] sm:$0xe] }
 0x1c9   : > { %v2132_v42 = vor.u32 %v2131_v20, %v2127_v47  ;;  %v6027_v62 = vcombine.low %v3036_v23, %v3040_v40  ;;  %v2136_v38 = vshll.u32 %v5919_v31, 16  ;;  %v2315_v14 = vrot.slane %v6581_v4, 7  ;;  %v2821_v16 = vld [vmem:[#allocation2 + $0x14] sm:$0x1]  ;;  %v2057_v7 = vld [vmem:[#allocation2 + $0x3c] sm:$0x1] }
 0x1ca   : > { %2160 = vrot.lane.b32.xlu1 %v2125_v15, %s6889_s14  ;;  %v2316_v57 = vrot.slane %v6583_v33, 7  ;;  %v2544_v54 = vshll.u32 %v5978_v36, 16  ;;  %v2143_v32 = vshll.u32 %v7522_v19, 16  ;;  %v6022_v35 = vrot.slane %v3001_v18, 9  ;;  %v3006_v6 = vld [vmem:[#allocation2 + $0x44] sm:$0x1] }
 0x1cb   : > { %2162 = vrot.lane.b32.xlu0 %v2132_v42, %s6889_s14  ;;  %3074 = vst.msk [vmem:[#allocation3 + $0x48] sm:$0xff] %vm663_vm10, %v6027_v62  ;;  %v2138_v56 = vrot.slane %v2136_v38, 1  ;;  %v6023_v2 = vrot.slane %v3003_v21, 9  ;;  %v3043_v39 = vrot.slane %v3002_v10, 5  ;;  %v3047_v22 = vrot.slane %v3004_v48, 5 }
 0x1cc   : > { %v2546_v60 = vrot.slane %v2544_v54, 1  ;;  %v2134_v45 = vshrl.u32 %v5919_v31, 16  ;;  %v7540_v9 = vcombine.low %v2471_v50, %v7525_v29  ;;  %v5979_v27 = vcombine.low %v2470_v43, %v7527_v5  ;;  %v3008_v20 = vld [vmem:[#allocation2 + $0x4c] sm:$0x1]  ;;  %v2472_v23 = vld [vmem:[#allocation2 + $0x20] sm:$0xe] }
 0x1cd   : > { %v2542_v46 = vshrl.u32 %v5978_v36, 16  ;;  %v3044_v53 = vsel %vm7493_vm4, %v6022_v35, %v3043_v39  ;;  %v3048_v59 = vsel %vm7493_vm4, %v6023_v2, %v3047_v22  ;;  %v2145_v3 = vrot.slane %v2143_v32, 1  ;;  %v2473_v43 = vld [vmem:[#allocation2 + $0x28] sm:$0xe]  ;;  %v7560_v38 = vld [vmem:[#allocation2 + $0x24] sm:$0x1] }
 0x1ce   : > { %v3081_v44 = vld [vmem:[#allocation3 + $0x20] sm:$0xff]  ;;  %2328 = vrot.lane.b32.xlu1 %v2315_v14, %s6889_s14  ;;  %v6586_v8 = vld [vmem:[#allocation2 + $0x40] ss:$0 sps:$4 sm:$0xff]   ;;  %v3005_v0 = vld [vmem:[#allocation2 + $0x40] sm:$0xe]  ;;  %v2139_v1 = vor.u32 %v2138_v56, %v2134_v45  ;;  %v6028_v4 = vcombine.low %v3044_v53, %v3048_v59  ;;  %v2551_v12 = vshll.u32 %v5979_v27, 16  ;;  %v6006_v33 = vcombine.low %v7532_v55, %v2821_v16 }
 0x1cf   : > { %6509 = vmatprep.mubr.msk.bf16.mxu0 %vm663_vm10, %v3081_v44  ;;  %2330 = vrot.lane.b32.xlu0 %v2316_v57, %s6889_s14  ;;  %v2547_v34 = vor.u32 %v2546_v60, %v2542_v46  ;;  %v5921_v47 = vcombine.low %v7537_v41, %v2057_v7  ;;  %v2558_v31 = vshll.u32 %v7540_v9, 16  ;;  %v6024_v36 = vrot.slane %v3005_v0, 9  ;;  %v7562_v57 = vld [vmem:[#allocation2 + $0x2c] sm:$0x1]  ;;  %v7568_v35 = vld [vmem:[#allocation2 + $0x18] sm:$0xf] }
 0x1d0   : > { %3075 = vst.msk [vmem:[#allocation3 + $0x70] sm:$0xff] %vm663_vm10, %v6028_v4  ;;  %v3051_v13 = vrot.slane %v3006_v6, 5  ;;  %v6025_v15 = vrot.slane %v3007_v11, 9  ;;  %v2141_v18 = vshrl.u32 %v7522_v19, 16  ;;  %v2317_v21 = vrot.slane %v6586_v8, 7 }
 0x1d1   : > { %v3055_v62 = vrot.slane %v3008_v20, 5  ;;  %v2553_v48 = vrot.slane %v2551_v12, 1  ;;  %v2150_v14 = vshll.u32 %v5921_v47, 16  ;;  %v5981_v54 = vcombine.low %v2472_v23, %v7560_v38  ;;  %v7571_v60 = vld [vmem:[#allocation2 + $0x20] sm:$0xf] }
 0x1d2   : > { %v3086_v40 = vld [vmem:[#allocation3 + $0x48] sm:$0xff]  ;;  %2164 = vrot.lane.b32.xlu1 %v2139_v1, %s6889_s14  ;;  %v3052_v42 = vsel %vm7493_vm4, %v6024_v36, %v3051_v13  ;;  %v2146_v10 = vor.u32 %v2145_v3, %v2141_v18  ;;  %v2560_v19 = vrot.slane %v2558_v31, 1  ;;  %v2872_v50 = vshll.u32 %v6006_v33, 16  ;;  %v2823_v46 = vld [vmem:[#allocation2 + $0x24] sm:$0x1] }
 0x1d3   : > { %6510 = vmatmul.mubr.msk.bf16.vlgmr.msra.gmra.mrb[32].mxu0 %vm663_vm10, %v3086_v40  ;;  %2597 = vrot.lane.b32.xlu0 %v2547_v34, %s6889_s14  ;;  %v3056_v56 = vsel %vm7493_vm4, %v6025_v15, %v3055_v62  ;;  %v5982_v32 = vcombine.low %v2473_v43, %v7562_v57  ;;  %v2549_v2 = vshrl.u32 %v5979_v27, 16  ;;  %v2556_v39 = vshrl.u32 %v7540_v9, 16  ;;  %v2822_v22 = vld [vmem:[#allocation2 + $0x1c] sm:$0x1]  ;;  %v2474_v1 = vld [vmem:[#allocation2 + $0x30] sm:$0xe] }
 0x1d4   : > { %v6029_v37 = vcombine.low %v3052_v42, %v3056_v56  ;;  %v2152_v6 = vrot.slane %v2150_v14, 1  ;;  %v2565_v44 = vshll.u32 %v5981_v54, 16  ;;  %v6007_v8 = vcombine.low %v7568_v35, %v2822_v22  ;;  %v2475_v3 = vld [vmem:[#allocation2 + $0x38] sm:$0xe]  ;;  %v7581_v16 = vld [vmem:[#allocation2 + $0x34] sm:$0x1] }
 0x1d5   : > { %v2554_v45 = vor.u32 %v2553_v48, %v2549_v2  ;;  %v2561_v27 = vor.u32 %v2560_v19, %v2556_v39  ;;  %v2874_v53 = vrot.slane %v2872_v50, 1  ;;  %v2572_v59 = vshll.u32 %v5982_v32, 16  ;;  %v7583_v20 = vld [vmem:[#allocation2 + $0x3c] sm:$0x1]  ;;  %v7586_v36 = vld [vmem:[#allocation2 + $0x30] sm:$0xf] }
 0x1d6   : > { %2332 = vrot.lane.b32.xlu1 %v2317_v21, %s6889_s14  ;;  %3076 = vst.msk [vmem:[#allocation3 + $0x98] sm:$0xff] %vm663_vm10, %v6029_v37  ;;  %v6008_v0 = vcombine.low %v7571_v60, %v2823_v46  ;;  %v2148_v9 = vshrl.u32 %v5921_v47, 16  ;;  %v2870_v4 = vshrl.u32 %v6006_v33, 16  ;;  %v2567_v34 = vrot.slane %v2565_v44, 1  ;;  %v7589_v40 = vld [vmem:[#allocation2 + $0x28] sm:$0xf] }
 0x1d7   : > { %2166 = vrot.lane.b32.xlu0 %v2146_v10, %s6889_s14  ;;  %v3091_v11 = vld [vmem:[#allocation3 + $0x70] sm:$0xff]  ;;  %v2879_v12 = vshll.u32 %v6007_v8, 16  ;;  %v5983_v31 = vcombine.low %v2474_v1, %v7581_v16  ;;  %v2574_v15 = vrot.slane %v2572_v59, 1  ;;  %v5984_v47 = vcombine.low %v2475_v3, %v7583_v20  ;;  %v2825_v18 = vld [vmem:[#allocation2 + $0x34] sm:$0x1] }
 0x1d8   : > { %6513 = vmatprep.mubr.msk.bf16.mxu0 %vm663_vm10, %v3091_v11  ;;  %v2153_v7 = vor.u32 %v2152_v6, %v2148_v9  ;;  %v2875_v13 = vor.u32 %v2874_v53, %v2870_v4  ;;  %v2886_v23 = vshll.u32 %v6008_v0, 16  ;;  %v2563_v33 = vshrl.u32 %v5981_v54, 16  ;;  %v1550_v21 = vld [vmem:[#allocation2 + $0x48] sm:$0x1]  ;;  %v2824_v10 = vld [vmem:[#allocation2 + $0x2c] sm:$0x1] }
 0x1d9   : > { %v2570_v42 = vshrl.u32 %v5982_v32, 16  ;;  %v6010_v62 = vcombine.low %v7586_v36, %v2825_v18  ;;  %v2881_v14 = vrot.slane %v2879_v12, 1  ;;  %v2579_v19 = vshll.u32 %v5983_v31, 16  ;;  %v2476_v54 = vld [vmem:[#allocation2 + $0x40] sm:$0xe] }
 0x1da   : > { %2599 = vrot.lane.b32.xlu1 %v2554_v45, %s6889_s14  ;;  %v2568_v48 = vor.u32 %v2567_v34, %v2563_v33  ;;  %v6009_v50 = vcombine.low %v7589_v40, %v2824_v10  ;;  %v2888_v2 = vrot.slane %v2886_v23, 1  ;;  %v2586_v37 = vshll.u32 %v5984_v47, 16  ;;  %v7599_v22 = vld [vmem:[#allocation2 + $0x40] sm:$0xf]  ;;  %v7602_v45 = vld [vmem:[#allocation2 + $0x44] sm:$0x1] }
 0x1db   : > { %2601 = vrot.lane.b32.xlu0 %v2561_v27, %s6889_s14  ;;  %v2575_v56 = vor.u32 %v2574_v15, %v2570_v42  ;;  %v1551_v39 = vsel %vm7004_vm8, 0, %v1550_v21  ;;  %v2877_v32 = vshrl.u32 %v6007_v8, 16  ;;  %v2884_v11 = vshrl.u32 %v6008_v0, 16  ;;  %v2827_v27 = vld [vmem:[#allocation2 + $0x44] sm:$0x1] }
 0x1dc   : > { %1552 = vst [vmem:[#allocation2 + $0x48] sm:$0x1] %v1551_v39  ;;  %v2581_v44 = vrot.slane %v2579_v19, 1  ;;  %v2893_v46 = vshll.u32 %v6009_v50, 16  ;;  %v5985_v53 = vcombine.low %v2476_v54, %v7602_v45  ;;  %v2588_v26 = vrot.slane %v2586_v37, 1 }
 0x1dd   : > { %v3096_v43 = vld [vmem:[#allocation3 + $0x98] sm:$0xff]  ;;  %v2882_v6 = vor.u32 %v2881_v14, %v2877_v32  ;;  %v2889_v59 = vor.u32 %v2888_v2, %v2884_v11  ;;  %v2900_v1 = vshll.u32 %v6010_v62, 16  ;;  %v6012_v9 = vcombine.low %v7599_v22, %v2827_v27  ;;  %v7606_v8 = vld [vmem:[#allocation2 + $0x38] sm:$0xf]  ;;  %v2826_v4 = vld [vmem:[#allocation2 + $0x3c] sm:$0x1] }
 0x1de   : > { %2168 = vrot.lane.b32.xlu1 %v2153_v7, %s6889_s14  ;;  %6514 = vmatmul.mubr.msk.bf16.gmra.mrb[36].mxu0 %vm663_vm10, %v3096_v43  ;;  %v2577_v3 = vshrl.u32 %v5983_v31, 16  ;;  %v2584_v0 = vshrl.u32 %v5984_v47, 16  ;;  %v2828_v7 = vld [vmem:[#allocation2 + $0x4c] sm:$0x1]  ;;  %v2895_v12 = vrot.slane %v2893_v46, 1  ;;  %v6011_v15 = vcombine.low %v7606_v8, %v2826_v4 }
 0x1df   : > { %2925 = vrot.lane.b32.xlu0 %v2875_v13, %s6889_s14  ;;  %v2593_v13 = vshll.u32 %v5985_v53, 16  ;;  %v2902_v33 = vrot.slane %v2900_v1, 1  ;;  %v2914_v18 = vshll.u32 %v6012_v9, 16  ;;  %v2891_v43 = vshrl.u32 %v6009_v50, 16  ;;  %v6871_v27 = vld [vmem:[#allocation2] sm:$0xf] }
 0x1e0   : > { %v2582_v34 = vor.u32 %v2581_v44, %v2577_v3  ;;  %v2589_v23 = vor.u32 %v2588_v26, %v2584_v0  ;;  %v2898_v47 = vshrl.u32 %v6010_v62, 16  ;;  %v2912_v37 = vshrl.u32 %v6012_v9, 16 }
 0x1e1   : > { %v2896_v42 = vor.u32 %v2895_v12, %v2891_v43  ;;  %v2595_v10 = vrot.slane %v2593_v13, 1  ;;  %v2916_v19 = vrot.slane %v2914_v18, 1  ;;  %v2905_v32 = vshrl.u32 %v6011_v15, 16 }
 0x1e2   : > { %2603 = vrot.lane.b32.xlu1 %v2568_v48, %s6889_s14  ;;  %v2907_v48 = vshll.u32 %v6011_v15, 16  ;;  %v2903_v14 = vor.u32 %v2902_v33, %v2898_v47  ;;  %vm2677_vm5 = vsmask.f32 3328  ;;  %vm3815_vm9 = vcmask 1040384  }
 0x1e3   : > { %2605 = vrot.lane.b32.xlu0 %v2575_v56, %s6889_s14  ;;  %v7611_v21 = vld [vmem:[#allocation2 + $0x48] sm:$0xf]  ;;  %v2591_v56 = vshrl.u32 %v5985_v53, 16  ;;  %v2917_v50 = vor.u32 %v2916_v19, %v2912_v37  ;;  %vm7716_vm8 = vmor %vm2677_vm5, %vm2678_vm6  ;;  %vm3957_vm1 = vsmask.f32 2306 }
 0x1e4   : > { %v6013_v31 = vcombine.low %v7611_v21, %v2828_v7  ;;  %v2909_v39 = vrot.slane %v2907_v48, 1  ;;  %v6628_v48 = vld [vmem:[%s8480_s3 + $0xc8] sm:$0xff]   ;;  %vm7778_vm11 = vmand %vm3815_vm9, %vm1521_vm7  ;;  %vm3699_vm7 = vcmask 1041408   ;;  %vm4041_vm5 = vsmask.f32 5392 }
 0x1e5   : > { %v2596_v54 = vor.u32 %v2595_v10, %v2591_v56  ;;  %v6627_v10 = vld [vmem:[%s8480_s3 + $0x80] sm:$0xff]   ;;  %v6631_v56 = vld [vmem:[%s8480_s3 + $0xd0] sm:$0xff]   ;;  %vm8082_vm3 = vmand %vm2398_vm2, %vm3957_vm1  ;;  %vm4038_vm2 = vsmask.f32 1280 }
 0x1e6   : > { %2927 = vrot.lane.b32.xlu1 %v2882_v6, %s6889_s14  ;;  %v2921_v2 = vshll.u32 %v6013_v31, 16  ;;  %v2919_v11 = vshrl.u32 %v6013_v31, 16  ;;  %v2910_v6 = vor.u32 %v2909_v39, %v2905_v32  ;;  %v6633_v39 = vld [vmem:[%s8480_s3 + $0xd8] sm:$0xff]  }
 0x1e7   : > { %2929 = vrot.lane.b32.xlu0 %v2889_v59, %s6889_s14  ;;  %v6607_v59 = vld [vmem:[#allocation2] sm:$0x1e]  }
 0x1e8   : > { %v2923_v62 = vrot.slane %v2921_v2, 1  ;;  %v6617_v2 = vld [vmem:[#allocation2 + $0x10] sm:$0x1e]  }
 0x1ea   : > { %2607 = vrot.lane.b32.xlu1 %v2582_v34, %s6889_s14  ;;  %v2924_v44 = vor.u32 %v2923_v62, %v2919_v11  ;;  %v6612_v34 = vld [vmem:[#allocation2 + $0x8] sm:$0x1e]   ;;  %v6622_v11 = vld [vmem:[#allocation2 + $0x18] sm:$0x1e]  }
 0x1eb   : > { %2609 = vrot.lane.b32.xlu0 %v2589_v23, %s6889_s14  ;;  %v6634_v62 = vld [vmem:[%s8480_s3 + $0x98] sm:$0xff]  }
 0x1ee   : > { %2931 = vrot.lane.b32.xlu1 %v2896_v42, %s6889_s14 }
 0x1ef   : > { %2933 = vrot.lane.b32.xlu0 %v2903_v14, %s6889_s14  ;;  %v6630_v14 = vld [vmem:[%s8480_s3 + $0x88] sm:$0xff]  }
 0x1f2   : > { %2611 = vrot.lane.b32.xlu1 %v2596_v54, %s6889_s14  ;;  %v6632_v54 = vld [vmem:[%s8480_s3 + $0x90] sm:$0xff]  }
 0x1f3   : > { %2937 = vrot.lane.b32.xlu0 %v2917_v50, %s6889_s14 }
 0x1f6   : > { %2935 = vrot.lane.b32.xlu1 %v2910_v6, %s6889_s14 }
 0x1fa   : > { %2939 = vrot.lane.b32.xlu1 %v2924_v44, %s6889_s14  ;;  %v6636_v44 = vld [vmem:[%s8480_s3 + $0xe0] sm:$0xff]  }
 0x1fd   : > { %v2319_v1 = vpop.permute.xlu0 %2318 }
 0x1fe   : > { %v2336_v0 = vsel %vm663_vm10, %v6607_v59, %v2319_v1 }
 0x1ff   : > { %v5942_v4 = vcombine.low %v2336_v0, %v2336_v0  ;;  %v5943_v7 = vcombine.high %v2336_v0, %v2336_v0 }
 0x201   : > { %v5958_v15 = vrot.slane %v5942_v4, 9  ;;  %v2403_v23 = vrot.slane %v5943_v7, 5  ;;  %v6639_v4 = vld [vmem:[%s8480_s3 + $0xe8] sm:$0xff]  }
 0x203   : > { %v2404_v47 = vsel %vm7493_vm4, %v5958_v15, %v2403_v23  ;;  %v6640_v23 = vld [vmem:[%s8480_s3 + $0xa8] sm:$0xff]  }
 0x209   : > { %v2155_v46 = vpop.permute.xlu1 %2154 }
 0x20a   : > { %v2172_v53 = vsel %vm663_vm10, %v6871_v27, %v2155_v46 }
 0x216   : > { %v2157_v26 = vpop.permute.xlu1 %2156 }
 0x217   : > { %v2175_v9 = vsel %vm663_vm10, %v7394_v63, %v2157_v26 }
 0x218   : > { %v5922_v3 = vcombine.low %v2172_v53, %v2175_v9  ;;  %v6638_v9 = vld [vmem:[%s8480_s3 + $0xa0] sm:$0xff]  }
 0x21f   : > { %v2321_v12 = vpop.permute.xlu0 %2320 }
 0x220   : > { %v2339_v13 = vsel %vm663_vm10, %v6612_v34, %v2321_v12  ;;  %v6623_v12 = vld [vmem:[#allocation2 + $0x20] sm:$0x1e]  }
 0x221   : > { %v5944_v33 = vcombine.low %v2339_v13, %v2339_v13  ;;  %v5945_v18 = vcombine.high %v2339_v13, %v2339_v13 }
 0x223   : > { %v5959_v43 = vrot.slane %v5944_v33, 9  ;;  %v2407_v31 = vrot.slane %v5945_v18, 5  ;;  %v2323_v19 = vpop.permute.xlu0 %2322  ;;  %v6642_v18 = vld [vmem:[%s8480_s3 + $0xf0] sm:$0xff]  }
 0x224   : > { %v2342_v37 = vsel %vm663_vm10, %v6617_v2, %v2323_v19  ;;  %v6645_v19 = vld [vmem:[%s8480_s3 + $0xf8] sm:$0xff]  }
 0x225   : > { %v2408_v63 = vsel %vm7493_vm4, %v5959_v43, %v2407_v31  ;;  %v5946_v50 = vcombine.low %v2342_v37, %v2342_v37  ;;  %v5947_v32 = vcombine.high %v2342_v37, %v2342_v37 }
 0x226   : > { %v5966_v42 = vcombine.low %v2404_v47, %v2408_v63 }
 0x227   : > { %v5960_v27 = vrot.slane %v5946_v50, 9  ;;  %v2411_v53 = vrot.slane %v5947_v32, 5  ;;  %v6646_v50 = vld [vmem:[%s8480_s3 + $0xb8] sm:$0xff]  }
 0x228   : > { %3436 = vmatprep.mubr.bf16.mxu1 %v5966_v42 }
 0x229   : > { %3437 = vmatmul.mubr.bf16.vlgmr.msra.gmra.mrb[0].mxu1 %v5922_v3  ;;  %v2412_v7 = vsel %vm7493_vm4, %v5960_v27, %v2411_v53 }
 0x22a   : > { %6418 = vmatpush3.bf16.msra.mxu1 %v6627_v10  ;;  %v6644_v10 = vld [vmem:[%s8480_s3 + $0xb0] sm:$0xff]  }
 0x22b   : > { %6419 = vmatprep.subr.bf16.mxu1 %v6628_v48 }
 0x22e   : > { %6420 = vmatpush3.bf16.msra.mxu1 %v6630_v14 }
 0x22f   : > { %6421 = vmatprep.subr.bf16.mxu1 %v6631_v56  ;;  %v6624_v56 = vld [vmem:[#allocation2 + $0x28] sm:$0x1e]  }
 0x232   : > { %6422 = vmatpush3.bf16.msra.mxu1 %v6632_v54 }
 0x233   : > { %v2325_v6 = vpop.permute.xlu1 %2324  ;;  %6423 = vmatprep.subr.bf16.mxu1 %v6633_v39  ;;  %v2453_v39 = vld [vmem:[#allocation2 + $0x8] sm:$0xf] }
 0x234   : > { %v2345_v46 = vsel %vm663_vm10, %v6622_v11, %v2325_v6 }
 0x235   : > { %v2159_v59 = vpop.permute.xlu0 %2158  ;;  %v5948_v26 = vcombine.low %v2345_v46, %v2345_v46  ;;  %v5949_v1 = vcombine.high %v2345_v46, %v2345_v46 }
 0x236   : > { %6424 = vmatpush3.bf16.msra.mxu1 %v6634_v62  ;;  %v2178_v31 = vsel %vm663_vm10, %v7477_v49, %v2159_v59  ;;  %v6625_v49 = vld [vmem:[#allocation2 + $0x30] sm:$0x1e]   ;;  %v5970_v59 = vcombine.low %v2453_v39, %v7507_v58 }
 0x237   : > { %v5961_v3 = vrot.slane %v5948_v26, 9  ;;  %v2415_v0 = vrot.slane %v5949_v1, 5  ;;  %6425 = vmatprep.subr.bf16.mxu1 %v6636_v44 }
 0x239   : > { %v2416_v34 = vsel %vm7493_vm4, %v5961_v3, %v2415_v0  ;;  %v2327_v13 = vpop.permute.xlu0 %2326 }
 0x23a   : > { %v5967_v15 = vcombine.low %v2412_v7, %v2416_v34  ;;  %6426 = vmatpush3.bf16.msra.mxu1 %v6638_v9  ;;  %v2348_v33 = vsel %vm663_vm10, %v6623_v12, %v2327_v13  ;;  %v6629_v13 = vld [vmem:[#allocation2 + $0x38] sm:$0x1e]  }
 0x23b   : > { %6427 = vmatprep.subr.bf16.mxu1 %v6639_v4  ;;  %v5950_v63 = vcombine.low %v2348_v33, %v2348_v33  ;;  %v5951_v14 = vcombine.high %v2348_v33, %v2348_v33 }
 0x23c   : > { %3444 = vmatprep.mubr.bf16.mxu1 %v5967_v15  ;;  %v2161_v43 = vpop.permute.xlu1 %2160 }
 0x23d   : > { %v2181_v47 = vsel %vm663_vm10, %v7483_v17, %v2161_v43  ;;  %v2163_v42 = vpop.permute.xlu0 %2162  ;;  %v5962_v37 = vrot.slane %v5950_v63, 9  ;;  %v2419_v32 = vrot.slane %v5951_v14, 5 }
 0x23e   : > { %6428 = vmatpush3.bf16.msra.mxu1 %v6640_v23  ;;  %v5923_v48 = vcombine.low %v2178_v31, %v2181_v47  ;;  %v2184_v26 = vsel %vm663_vm10, %v7487_v28, %v2163_v42  ;;  %v2455_v23 = vld [vmem:[#allocation2 + $0x10] sm:$0xf]  ;;  %v2457_v47 = vld [vmem:[#allocation2 + $0x18] sm:$0xf] }
 0x23f   : > { %6429 = vmatprep.subr.bf16.mxu1 %v6642_v18  ;;  %v2420_v0 = vsel %vm7493_vm4, %v5962_v37, %v2419_v32  ;;  %v5971_v14 = vcombine.low %v2455_v23, %v7527_v5 }
 0x240   : > { %v2329_v2 = vpop.permute.xlu1 %2328  ;;  %3445 = vmatmul.mubr.bf16.gmra.mrb[4].mxu1 %v5923_v48 }
 0x241   : > { %v2351_v17 = vsel %vm663_vm10, %v6624_v56, %v2329_v2  ;;  %v2331_v54 = vpop.permute.xlu0 %2330  ;;  %v5972_v2 = vcombine.low %v2457_v47, %v7525_v29  ;;  %v2459_v29 = vld [vmem:[#allocation2 + $0x20] sm:$0xf] }
 0x242   : > { %6430 = vmatpush3.bf16.msra.mxu1 %v6644_v10  ;;  %v5952_v11 = vcombine.low %v2351_v17, %v2351_v17  ;;  %v5953_v62 = vcombine.high %v2351_v17, %v2351_v17  ;;  %v2354_v6 = vsel %vm663_vm10, %v6625_v49, %v2331_v54 }
 0x243   : > { %6431 = vmatprep.subr.bf16.mxu1 %v6645_v19  ;;  %v5954_v53 = vcombine.low %v2354_v6, %v2354_v6  ;;  %v5955_v9 = vcombine.high %v2354_v6, %v2354_v6 }
 0x244   : > { %v5963_v44 = vrot.slane %v5952_v11, 9  ;;  %v2423_v46 = vrot.slane %v5953_v62, 5  ;;  %v2165_v27 = vpop.permute.xlu1 %2164 }
 0x245   : > { %v2187_v1 = vsel %vm663_vm10, %v7505_v51, %v2165_v27  ;;  %v2598_v3 = vpop.permute.xlu0 %2597  ;;  %v5964_v15 = vrot.slane %v5954_v53, 9  ;;  %v2427_v33 = vrot.slane %v5955_v9, 5 }
 0x246   : > { %6432 = vmatpush3.bf16.msra.mxu1 %v6646_v50  ;;  %v2424_v4 = vsel %vm7493_vm4, %v5963_v44, %v2423_v46  ;;  %v5924_v7 = vcombine.low %v2184_v26, %v2187_v1  ;;  %v2615_v34 = vsel %vm663_vm10, %v5970_v59, %v2598_v3  ;;  %v2461_v46 = vld [vmem:[#allocation2 + $0x28] sm:$0xf] }
 0x247   : > { %v5968_v12 = vcombine.low %v2420_v0, %v2424_v4  ;;  %v5986_v58 = vcombine.low %v2615_v34, %v2615_v34  ;;  %v2428_v37 = vsel %vm7493_vm4, %v5964_v15, %v2427_v33  ;;  %v5987_v17 = vcombine.high %v2615_v34, %v2615_v34 }
 0x248   : > { %v2333_v28 = vpop.permute.xlu1 %2332  ;;  %v5973_v34 = vcombine.low %v2459_v29, %v7560_v38 }
 0x249   : > { %v2681_v51 = vshrl.u32 %v5986_v58, 16  ;;  %v2684_v18 = vshll.u32 %v5986_v58, 16  ;;  %v2167_v43 = vpop.permute.xlu0 %2166  ;;  %v2357_v31 = vsel %vm663_vm10, %v6629_v13, %v2333_v28  ;;  %3452 = vmatprep.mubr.bf16.mxu1 %v5968_v12  ;;  %v2690_v26 = vshll.u32 %v5987_v17, 16  ;;  %v3820_v28 = vld [vmem:[#allocation4 + $0x4] sm:$0x1] }
 0x24a   : > { %v5956_v63 = vcombine.low %v2357_v31, %v2357_v31  ;;  %v5957_v42 = vcombine.high %v2357_v31, %v2357_v31  ;;  %3453 = vmatmul.mubr.bf16.gmra.mrb[8].mxu1 %v5924_v7  ;;  %v5974_v7 = vcombine.low %v2461_v46, %v7562_v57  ;;  %v2190_v58 = vsel %vm663_vm10, %v7511_v24, %v2167_v43 }
 0x24b   : > { %v2683_v10 = vrot.slane %v2681_v51, 4  ;;  %v2686_v48 = vrot.slane %v2684_v18, 5  ;;  %v2692_v38 = vrot.slane %v2690_v26, 5 }
 0x24c   : > { %v5965_v19 = vrot.slane %v5956_v63, 9  ;;  %v2431_v56 = vrot.slane %v5957_v42, 5  ;;  %v2600_v49 = vpop.permute.xlu1 %2599 }
 0x24d   : > { %v2602_v54 = vpop.permute.xlu0 %2601  ;;  %v2618_v39 = vsel %vm663_vm10, %v5971_v14, %v2600_v49  ;;  %v2687_v5 = vor.u32 %v2686_v48, %v2683_v10 }
 0x24e   : > { %v2432_v50 = vsel %vm7493_vm4, %v5965_v19, %v2431_v56  ;;  %v2621_v32 = vsel %vm663_vm10, %v5972_v2, %v2602_v54  ;;  %v5988_v11 = vcombine.low %v2618_v39, %v2618_v39  ;;  %v5989_v62 = vcombine.high %v2618_v39, %v2618_v39  ;;  %v2463_v19 = vld [vmem:[#allocation2 + $0x30] sm:$0xf] }
 0x24f   : > { %v5969_v6 = vcombine.low %v2428_v37, %v2432_v50  ;;  %v5990_v44 = vcombine.low %v2621_v32, %v2621_v32  ;;  %v2688_v12 = vrot.slane %v2687_v5, 4  ;;  %v5991_v13 = vcombine.high %v2621_v32, %v2621_v32 }
 0x250   : > { %v2695_v27 = vshrl.u32 %v5988_v11, 16  ;;  %v2698_v53 = vshll.u32 %v5988_v11, 16  ;;  %v2169_v59 = vpop.permute.xlu1 %2168  ;;  %v2704_v3 = vshll.u32 %v5989_v62, 16  ;;  %v2465_v62 = vld [vmem:[#allocation2 + $0x38] sm:$0xf] }
 0x251   : > { %v2709_v1 = vshrl.u32 %v5990_v44, 16  ;;  %v2712_v9 = vshll.u32 %v5990_v44, 16  ;;  %v2926_v30 = vpop.permute.xlu0 %2925  ;;  %3460 = vmatprep.mubr.bf16.mxu1 %v5969_v6  ;;  %v2193_v15 = vsel %vm663_vm10, %v7537_v41, %v2169_v59  ;;  %v2693_v10 = vsel %vm7716_vm8, %v2688_v12, %v2692_v38 }
 0x252   : > { %v2697_v0 = vrot.slane %v2695_v27, 4  ;;  %v2700_v4 = vrot.slane %v2698_v53, 5  ;;  %v5925_v57 = vcombine.low %v2190_v58, %v2193_v15  ;;  %v2706_v31 = vrot.slane %v2704_v3, 5 }
 0x253   : > { %v2711_v23 = vrot.slane %v2709_v1, 4  ;;  %v2714_v33 = vrot.slane %v2712_v9, 5  ;;  %v2718_v48 = vshll.u32 %v5991_v13, 16  ;;  %v5975_v44 = vcombine.low %v2463_v19, %v7581_v16 }
 0x254   : > { %v2701_v51 = vor.u32 %v2700_v4, %v2697_v0  ;;  %v2604_v18 = vpop.permute.xlu1 %2603  ;;  %3461 = vmatmul.mubr.bf16.gmra.mrb[12].mxu1 %v5925_v57  ;;  %v2943_v46 = vsel %vm663_vm10, %v7532_v55, %v2926_v30  ;;  %v5976_v9 = vcombine.low %v2465_v62, %v7583_v20  ;;  %v2467_v57 = vld [vmem:[#allocation2 + $0x40] sm:$0xf]  ;;  %vm4039_vm4 = vsmask.f32 3336 }
 0x255   : > { %v2606_v47 = vpop.permute.xlu0 %2605  ;;  %v2624_v24 = vsel %vm663_vm10, %v5973_v34, %v2604_v18  ;;  %v2715_v56 = vor.u32 %v2714_v33, %v2711_v23  ;;  %v2720_v0 = vrot.slane %v2718_v48, 5  ;;  %v5977_v48 = vcombine.low %v2467_v57, %v7602_v45  ;;  %vm4040_vm6 = vmor %vm4038_vm2, %vm4039_vm4 }
 0x256   : > { %v2702_v43 = vrot.slane %v2701_v51, 4  ;;  %v2627_v63 = vsel %vm663_vm10, %v5974_v7, %v2606_v47  ;;  %v5992_v41 = vcombine.low %v2624_v24, %v2624_v24  ;;  %v5993_v42 = vcombine.high %v2624_v24, %v2624_v24 }
 0x257   : > { %v5994_v14 = vcombine.low %v2627_v63, %v2627_v63  ;;  %v2716_v59 = vrot.slane %v2715_v56, 4  ;;  %v5995_v4 = vcombine.high %v2627_v63, %v2627_v63 }
 0x258   : > { %v2707_v2 = vsel %vm7716_vm8, %v2702_v43, %v2706_v31  ;;  %v2723_v49 = vshrl.u32 %v5992_v41, 16  ;;  %v2726_v37 = vshll.u32 %v5992_v41, 16  ;;  %v2928_v17 = vpop.permute.xlu1 %2927  ;;  %v2732_v32 = vshll.u32 %v5993_v42, 16 }
 0x259   : > { %v6002_v54 = vcombine.low %v2693_v10, %v2707_v2  ;;  %v2737_v39 = vshrl.u32 %v5994_v14, 16  ;;  %v2740_v50 = vshll.u32 %v5994_v14, 16  ;;  %v2930_v11 = vpop.permute.xlu0 %2929  ;;  %v2946_v53 = vsel %vm663_vm10, %v7568_v35, %v2928_v17 }
 0x25a   : > { %v2725_v5 = vrot.slane %v2723_v49, 4  ;;  %v2728_v6 = vrot.slane %v2726_v37, 5  ;;  %v6014_v1 = vcombine.low %v2943_v46, %v2946_v53  ;;  %v2734_v7 = vrot.slane %v2732_v32, 5 }
 0x25b   : > { %v2739_v29 = vrot.slane %v2737_v39, 4  ;;  %v2742_v27 = vrot.slane %v2740_v50, 5  ;;  %v2721_v15 = vsel %vm7716_vm8, %v2716_v59, %v2720_v0  ;;  %v2746_v18 = vshll.u32 %v5995_v4, 16 }
 0x25c   : > { %v2729_v26 = vor.u32 %v2728_v6, %v2725_v5  ;;  %v2608_v3 = vpop.permute.xlu1 %2607  ;;  %3501 = vmatprep.mubr.bf16.mxu1 %v6014_v1  ;;  %v2949_v42 = vsel %vm663_vm10, %v7571_v60, %v2930_v11 }
 0x25d   : > { %v2610_v34 = vpop.permute.xlu0 %2609  ;;  %v2630_v16 = vsel %vm663_vm10, %v5975_v44, %v2608_v3  ;;  %v2743_v13 = vor.u32 %v2742_v27, %v2739_v29  ;;  %3502 = vmatmul.mubr.bf16.vlgmr.msra.gmra.mrb[16].mxu1 %v6002_v54  ;;  %v2748_v17 = vrot.slane %v2746_v18, 5  ;;  %v3841_v18 = vld [vmem:[#allocation4 + $0x4] sm:$0x4] }
 0x25e   : > { %v2730_v12 = vrot.slane %v2729_v26, 4  ;;  %v2633_v55 = vsel %vm663_vm10, %v5976_v9, %v2610_v34  ;;  %v5996_v30 = vcombine.low %v2630_v16, %v2630_v16  ;;  %v5997_v58 = vcombine.high %v2630_v16, %v2630_v16 }
 0x25f   : > { %v5998_v35 = vcombine.low %v2633_v55, %v2633_v55  ;;  %v2744_v41 = vrot.slane %v2743_v13, 4  ;;  %v5999_v54 = vcombine.high %v2633_v55, %v2633_v55 }
 0x260   : > { %v2735_v20 = vsel %vm7716_vm8, %v2730_v12, %v2734_v7  ;;  %v2751_v23 = vshrl.u32 %v5996_v30, 16  ;;  %v2754_v33 = vshll.u32 %v5996_v30, 16  ;;  %v2932_v51 = vpop.permute.xlu1 %2931  ;;  %v2760_v63 = vshll.u32 %v5997_v58, 16 }
 0x261   : > { %v6003_v38 = vcombine.low %v2721_v15, %v2735_v20  ;;  %v2765_v31 = vshrl.u32 %v5998_v35, 16  ;;  %v2768_v47 = vshll.u32 %v5998_v35, 16  ;;  %v2952_v10 = vsel %vm663_vm10, %v7589_v40, %v2932_v51  ;;  %v2934_v2 = vpop.permute.xlu0 %2933 }
 0x262   : > { %v2753_v24 = vrot.slane %v2751_v23, 4  ;;  %v2756_v43 = vrot.slane %v2754_v33, 5  ;;  %v6015_v49 = vcombine.low %v2949_v42, %v2952_v10  ;;  %v2762_v32 = vrot.slane %v2760_v63, 5  ;;  %v6648_v42 = vld [vmem:[%s8482_s5] ss:$8 sps:$4 sm:$0xff]  }
 0x263   : > { %v2767_v14 = vrot.slane %v2765_v31, 4  ;;  %v2770_v19 = vrot.slane %v2768_v47, 5  ;;  %v2749_v60 = vsel %vm7716_vm8, %v2744_v41, %v2748_v17  ;;  %v2774_v46 = vshll.u32 %v5999_v54, 16  ;;  %v6650_v10 = vld [vmem:[%s8482_s5 + $0x4] ss:$8 sps:$4 sm:$0xff]  }
 0x264   : > { %v2757_v56 = vor.u32 %v2756_v43, %v2753_v24  ;;  %v2612_v37 = vpop.permute.xlu1 %2611  ;;  %3509 = vmatprep.mubr.bf16.mxu1 %v6015_v49  ;;  %v2955_v27 = vsel %vm663_vm10, %v7586_v36, %v2934_v2  ;;  %v3823_v24 = vld [vmem:[#allocation4 + $0x8] sm:$0x1]  ;;  %v3844_v43 = vld [vmem:[#allocation4 + $0x8] sm:$0x4]  ;;  %5520 = vmatprep.subr.bf16.mxu0 %v6650_v10  ;;  %v6653_v49 = vld [vmem:[%s8482_s5 + $0x14] ss:$8 sps:$4 sm:$0xff]  }
 0x265   : > { %v2636_v39 = vsel %vm663_vm10, %v5977_v48, %v2612_v37  ;;  %3510 = vmatmul.mubr.bf16.gmra.mrb[20].mxu1 %v6003_v38  ;;  %v2771_v40 = vor.u32 %v2770_v19, %v2767_v14  ;;  %v2938_v59 = vpop.permute.xlu0 %2937  ;;  %v2776_v12 = vrot.slane %v2774_v46, 5  ;;  %v3821_v38 = vsel %vm7778_vm11, 0, %v3820_v28  ;;  %v3826_v48 = vld [vmem:[#allocation4 + $0xc] sm:$0x1]  ;;  %v3847_v14 = vld [vmem:[#allocation4 + $0xc] sm:$0x4]  ;;  %5521 = vmatpush1.bf16.msra.mxu0 %v6648_v42 }
 0x266   : > { %v2758_v50 = vrot.slane %v2757_v56, 4  ;;  %v6000_v62 = vcombine.low %v2636_v39, %v2636_v39  ;;  %v6001_v5 = vcombine.high %v2636_v39, %v2636_v39  ;;  %v2961_v34 = vsel %vm663_vm10, %v7599_v22, %v2938_v59  ;;  %3822 = vst [vmem:[#allocation4 + $0x4] sm:$0x1] %v3821_v38  ;;  %v6651_v2 = vld [vmem:[%s8482_s5 + $0x10] ss:$8 sps:$4 sm:$0xff]   ;;  %5522 = vmatprep.subr.bf16.mxu0 %v6653_v49 }
 0x267   : > { %v2772_v0 = vrot.slane %v2771_v40, 4  ;;  %v3824_v63 = vsel %vm7778_vm11, 0, %v3823_v24  ;;  %v3827_v19 = vsel %vm7778_vm11, 0, %v3826_v48  ;;  %v6654_v37 = vld [vmem:[%s8482_s5 + $0x200] ss:$8 sps:$4 sm:$0xff]  }
 0x268   : > { %v2763_v45 = vsel %vm7716_vm8, %v2758_v50, %v2762_v32  ;;  %v2779_v11 = vshrl.u32 %v6000_v62, 16  ;;  %v2782_v6 = vshll.u32 %v6000_v62, 16  ;;  %v2936_v44 = vpop.permute.xlu1 %2935  ;;  %v2788_v9 = vshll.u32 %v6001_v5, 16  ;;  %3825 = vst [vmem:[#allocation4 + $0x8] sm:$0x1] %v3824_v63 }
 0x269   : > { %v6004_v29 = vcombine.low %v2749_v60, %v2763_v45  ;;  %v2958_v53 = vsel %vm663_vm10, %v7606_v8, %v2936_v44  ;;  %v2777_v8 = vsel %vm7716_vm8, %v2772_v0, %v2776_v12  ;;  %3828 = vst [vmem:[#allocation4 + $0xc] sm:$0x1] %v3827_v19  ;;  %v6656_v17 = vld [vmem:[%s8482_s5 + $0x204] ss:$8 sps:$4 sm:$0xff]   ;;  %5523 = vmatpush1.bf16.msra.mxu0 %v6651_v2  ;;  %v6657_v39 = vld [vmem:[%s8482_s5 + $0x20] ss:$8 sps:$4 sm:$0xff]  }
 0x26a   : > { %v2781_v26 = vrot.slane %v2779_v11, 4  ;;  %v2784_v1 = vrot.slane %v2782_v6, 5  ;;  %v6016_v3 = vcombine.low %v2955_v27, %v2958_v53  ;;  %v2790_v55 = vrot.slane %v2788_v9, 5  ;;  %v6659_v54 = vld [vmem:[%s8482_s5 + $0x24] ss:$8 sps:$4 sm:$0xff]   ;;  %5606 = vmatprep.subr.bf16.mxu1 %v6656_v17 }
 0x26b   : > { %5524 = vmatprep.subr.bf16.mxu0 %v6659_v54  ;;  %5607 = vmatpush1.bf16.msra.mxu1 %v6654_v37  ;;  %v3829_v62 = vld [vmem:[#allocation4 + $0x10] sm:$0x1]  ;;  %v3850_v5 = vld [vmem:[#allocation4 + $0x10] sm:$0x4]  ;;  %v6660_v46 = vld [vmem:[%s8482_s5 + $0x210] ss:$8 sps:$4 sm:$0xff]  }
 0x26c   : > { %v2785_v4 = vor.u32 %v2784_v1, %v2781_v26  ;;  %v2940_v7 = vpop.permute.xlu1 %2939  ;;  %3517 = vmatprep.mubr.bf16.mxu1 %v6016_v3  ;;  %v3830_v45 = vsel %vm7778_vm11, 0, %v3829_v62  ;;  %v6663_v27 = vld [vmem:[%s8482_s5 + $0x30] ss:$8 sps:$4 sm:$0xff]   ;;  %v6665_v53 = vld [vmem:[%s8482_s5 + $0x34] ss:$8 sps:$4 sm:$0xff]  }
 0x26d   : > { %v2964_v16 = vsel %vm663_vm10, %v7611_v21, %v2940_v7  ;;  %3518 = vmatmul.mubr.bf16.gmra.mrb[24].mxu1 %v6004_v29  ;;  %vm3836_vm10 = vsmask.f32 7946  ;;  %5525 = vmatpush1.bf16.msra.mxu0 %v6657_v39  ;;  %3831 = vst [vmem:[#allocation4 + $0x10] sm:$0x1] %v3830_v45  ;;  %v6662_v29 = vld [vmem:[%s8482_s5 + $0x214] ss:$8 sps:$4 sm:$0xff]  }
 0x26e   : > { %v2786_v36 = vrot.slane %v2785_v4, 4  ;;  %v6017_v30 = vcombine.low %v2961_v34, %v2964_v16  ;;  %vm7785_vm15 = vmand %vm1905_vm12, %vm3836_vm10  ;;  %v6668_v59 = vld [vmem:[%s8482_s5 + $0x224] ss:$8 sps:$4 sm:$0xff]   ;;  %5608 = vmatprep.subr.bf16.mxu1 %v6662_v29  ;;  %5526 = vmatprep.subr.bf16.mxu0 %v6665_v53  ;;  %v6666_v1 = vld [vmem:[%s8482_s5 + $0x220] ss:$8 sps:$4 sm:$0xff]  }
 0x26f   : > { %v3842_v47 = vsel %vm7785_vm15, 0, %v3841_v18  ;;  %v3845_v41 = vsel %vm7785_vm15, 0, %v3844_v43  ;;  %v3848_v56 = vsel %vm7785_vm15, 0, %v3847_v14  ;;  %v3851_v11 = vsel %vm7785_vm15, 0, %v3850_v5  ;;  %v6671_v26 = vld [vmem:[%s8482_s5 + $0x44] ss:$8 sps:$4 sm:$0xff]   ;;  %5609 = vmatpush1.bf16.msra.mxu1 %v6660_v46  ;;  %vm8126_vm10 = vmor %vm4040_vm6, %vm4041_vm5 }
 0x270   : > { %v2791_v58 = vsel %vm7716_vm8, %v2786_v36, %v2790_v55  ;;  %3525 = vmatprep.mubr.bf16.mxu1 %v6017_v30  ;;  %3843 = vst [vmem:[#allocation4 + $0x4] sm:$0x4] %v3842_v47  ;;  %3846 = vst [vmem:[#allocation4 + $0x8] sm:$0x4] %v3845_v41  ;;  %5610 = vmatprep.subr.bf16.mxu1 %v6668_v59  ;;  %v6669_v9 = vld [vmem:[%s8482_s5 + $0x40] ss:$8 sps:$4 sm:$0xff]  }
 0x271   : > { %v6005_v13 = vcombine.low %v2777_v8, %v2791_v58  ;;  %3849 = vst [vmem:[#allocation4 + $0xc] sm:$0x4] %v3848_v56  ;;  %3852 = vst [vmem:[#allocation4 + $0x10] sm:$0x4] %v3851_v11  ;;  %5527 = vmatpush1.bf16.msra.mxu0 %v6663_v27  ;;  %v6674_v3 = vld [vmem:[%s8482_s5 + $0x234] ss:$8 sps:$4 sm:$0xff]  }
 0x272   : > { %5528 = vmatprep.subr.bf16.mxu0 %v6671_v26  ;;  %v6677_v0 = vld [vmem:[%s8482_s5 + $0x54] ss:$8 sps:$4 sm:$0xff]   ;;  %v6672_v4 = vld [vmem:[%s8482_s5 + $0x230] ss:$8 sps:$4 sm:$0xff]   ;;  %v6680_v34 = vld [vmem:[%s8482_s5 + $0x244] ss:$8 sps:$4 sm:$0xff]  }
 0x273   : > { %5611 = vmatpush1.bf16.msra.mxu1 %v6666_v1  ;;  %v6675_v7 = vld [vmem:[%s8482_s5 + $0x50] ss:$8 sps:$4 sm:$0xff]   ;;  %v6683_v16 = vld [vmem:[%s8482_s5 + $0x64] ss:$8 sps:$4 sm:$0xff]   ;;  %v6678_v12 = vld [vmem:[%s8482_s5 + $0x240] ss:$8 sps:$4 sm:$0xff]  }
 0x274   : > { %5612 = vmatprep.subr.bf16.mxu1 %v6674_v3  ;;  %v6681_v36 = vld [vmem:[%s8482_s5 + $0x60] ss:$8 sps:$4 sm:$0xff]   ;;  %v6686_v55 = vld [vmem:[%s8482_s5 + $0x254] ss:$8 sps:$4 sm:$0xff]   ;;  %v6684_v18 = vld [vmem:[%s8482_s5 + $0x250] ss:$8 sps:$4 sm:$0xff]  }
 0x275   : > { %3526 = vmatmul.mubr.bf16.gmra.mrb[28].mxu1 %v6005_v13  ;;  %5529 = vmatpush1.bf16.msra.mxu0 %v6669_v9  ;;  %v6689_v8 = vld [vmem:[%s8482_s5 + $0x74] ss:$8 sps:$4 sm:$0xff]   ;;  %v6687_v47 = vld [vmem:[%s8482_s5 + $0x70] ss:$8 sps:$4 sm:$0xff]   ;;  %v6692_v24 = vld [vmem:[%s8482_s5 + $0x264] ss:$8 sps:$4 sm:$0xff]  }
 0x276   : > { %5530 = vmatprep.subr.bf16.mxu0 %v6677_v0  ;;  %v6695_v63 = vld [vmem:[%s8482_s5 + $0x84] ss:$8 sps:$4 sm:$0xff]   ;;  %v6690_v41 = vld [vmem:[%s8482_s5 + $0x260] ss:$8 sps:$4 sm:$0xff]   ;;  %v3817_v42 = vld [vmem:[#allocation4] sm:$0x1] }
 0x277   : > { %5613 = vmatpush1.bf16.msra.mxu1 %v6672_v4  ;;  %v3838_v10 = vld [vmem:[#allocation4] sm:$0x4]  ;;  %v6693_v48 = vld [vmem:[%s8482_s5 + $0x80] ss:$8 sps:$4 sm:$0xff]   ;;  %v6698_v14 = vld [vmem:[%s8482_s5 + $0x274] ss:$8 sps:$4 sm:$0xff]  }
 0x278   : > { %5614 = vmatprep.subr.bf16.mxu1 %v6680_v34  ;;  %v3818_v19 = vsel %vm7778_vm11, 0, %v3817_v42  ;;  %v3839_v56 = vsel %vm7785_vm15, 0, %v3838_v10  ;;  %v6701_v2 = vld [vmem:[%s8482_s5 + $0x94] ss:$8 sps:$4 sm:$0xff]   ;;  %v6696_v37 = vld [vmem:[%s8482_s5 + $0x270] ss:$8 sps:$4 sm:$0xff]  }
 0x279   : > { %5531 = vmatpush1.bf16.msra.mxu0 %v6675_v7  ;;  %3819 = vst [vmem:[#allocation4] sm:$0x1] %v3818_v19  ;;  %3840 = vst [vmem:[#allocation4] sm:$0x4] %v3839_v56  ;;  %v6699_v54 = vld [vmem:[%s8482_s5 + $0x90] ss:$8 sps:$4 sm:$0xff]  }
 0x27a   : > { %5532 = vmatprep.subr.bf16.mxu0 %v6683_v16  ;;  %v6704_v39 = vld [vmem:[%s8482_s5 + $0x284] ss:$8 sps:$4 sm:$0xff]   ;;  %v6702_v11 = vld [vmem:[%s8482_s5 + $0x280] ss:$8 sps:$4 sm:$0xff]   ;;  %v6710_v27 = vld [vmem:[%s8482_s5 + $0x294] ss:$8 sps:$4 sm:$0xff]  }
 0x27b   : > { %5615 = vmatpush1.bf16.msra.mxu1 %v6678_v12  ;;  %v6707_v62 = vld [vmem:[%s8482_s5 + $0xa4] ss:$8 sps:$4 sm:$0xff]   ;;  %v6705_v29 = vld [vmem:[%s8482_s5 + $0xa0] ss:$8 sps:$4 sm:$0xff]   ;;  %v6713_v53 = vld [vmem:[%s8482_s5 + $0xb4] ss:$8 sps:$4 sm:$0xff]  }
 0x27c   : > { %5616 = vmatprep.subr.bf16.mxu1 %v6686_v55  ;;  %v3853_v46 = vld [vmem:[#allocation4 + $0x14] sm:$0x4]  ;;  %v6708_v59 = vld [vmem:[%s8482_s5 + $0x290] ss:$8 sps:$4 sm:$0xff]   ;;  %v6714_v3 = vld [vmem:[%s8482_s5 + $0x2a0] ss:$8 sps:$4 sm:$0xff]  }
 0x27d   : > { %5533 = vmatpush1.bf16.msra.mxu0 %v6681_v36  ;;  %v3854_v57 = vsel %vm7785_vm15, 0, %v3853_v46  ;;  %v6711_v26 = vld [vmem:[%s8482_s5 + $0xb0] ss:$8 sps:$4 sm:$0xff]   ;;  %v6716_v1 = vld [vmem:[%s8482_s5 + $0x2a4] ss:$8 sps:$4 sm:$0xff]   ;;  %vm4160_vm15 = vmor %vm3815_vm9, %vm1905_vm12 }
 0x27e   : > { %5534 = vmatprep.subr.bf16.mxu0 %v6689_v8  ;;  %3855 = vst [vmem:[#allocation4 + $0x14] sm:$0x4] %v3854_v57  ;;  %v6719_v31 = vld [vmem:[%s8482_s5 + $0xc4] ss:$8 sps:$4 sm:$0xff]   ;;  %v6717_v0 = vld [vmem:[%s8482_s5 + $0xc0] ss:$8 sps:$4 sm:$0xff]  }
 0x27f   : > { %5617 = vmatpush1.bf16.msra.mxu1 %v6684_v18  ;;  %v6722_v7 = vld [vmem:[%s8482_s5 + $0x2b4] ss:$8 sps:$4 sm:$0xff]   ;;  %v6723_v8 = vld [vmem:[%s8482_s5 + $0xd0] ss:$8 sps:$4 sm:$0xff]   ;;  %v7992_v18 = vld [vmem:[%s8481_s4] ss:$0 sm:$0xff] }
 0x280   : > { %5618 = vmatprep.subr.bf16.mxu1 %v6692_v24  ;;  %v6725_v12 = vld [vmem:[%s8482_s5 + $0xd4] ss:$8 sps:$4 sm:$0xff]   ;;  %v6729_v24 = vld [vmem:[%s8482_s5 + $0xe0] ss:$8 sps:$4 sm:$0xff]   ;;  %v6732_v56 = vld [vmem:[%s8482_s5 + $0x2d0] ss:$8 sps:$4 sm:$0xff]  }
 0x281   : > { %5535 = vmatpush1.bf16.msra.mxu0 %v6687_v47  ;;  %v6737_v42 = vld [vmem:[%s8482_s5 + $0xf4] ss:$8 sps:$4 sm:$0xff]   ;;  %vm4043_vm8 = vsmask.f32 7448 }
 0x282   : > { %5536 = vmatprep.subr.bf16.mxu0 %v6695_v63  ;;  %v6734_v63 = vld [vmem:[%s8482_s5 + $0x2d4] ss:$8 sps:$4 sm:$0xff]  }
 0x283   : > { %5619 = vmatpush1.bf16.msra.mxu1 %v6690_v41 }
 0x284   : > { %5620 = vmatprep.subr.bf16.mxu1 %v6698_v14 }
 0x285   : > { %5537 = vmatpush1.bf16.msra.mxu0 %v6693_v48 }
 0x286   : > { %5538 = vmatprep.subr.bf16.mxu0 %v6701_v2 }
 0x287   : > { %5621 = vmatpush1.bf16.msra.mxu1 %v6696_v37 }
 0x288   : > { %5622 = vmatprep.subr.bf16.mxu1 %v6704_v39 }
 0x289   : > { %5539 = vmatpush1.bf16.msra.mxu0 %v6699_v54  ;;  %v6743_v54 = vld [vmem:[%s8482_s5 + $0x104] ss:$8 sps:$4 sm:$0xff]  }
 0x28a   : > { %5540 = vmatprep.subr.bf16.mxu0 %v6707_v62 }
 0x28b   : > { %5623 = vmatpush1.bf16.msra.mxu1 %v6702_v11 }
 0x28c   : > { %5624 = vmatprep.subr.bf16.mxu1 %v6710_v27 }
 0x28d   : > { %5541 = vmatpush1.bf16.msra.mxu0 %v6705_v29 }
 0x28e   : > { %5542 = vmatprep.subr.bf16.mxu0 %v6713_v53 }
 0x28f   : > { %5625 = vmatpush1.bf16.msra.mxu1 %v6708_v59 }
 0x290   : > { %5626 = vmatprep.subr.bf16.mxu1 %v6716_v1 }
 0x291   : > { %5543 = vmatpush1.bf16.msra.mxu0 %v6711_v26 }
 0x292   : > { %5544 = vmatprep.subr.bf16.mxu0 %v6719_v31 }
 0x293   : > { %5627 = vmatpush1.bf16.msra.mxu1 %v6714_v3 }
 0x294   : > { %5628 = vmatprep.subr.bf16.mxu1 %v6722_v7 }
 0x295   : > { %5545 = vmatpush1.bf16.msra.mxu0 %v6717_v0 }
 0x296   : > { %5546 = vmatprep.subr.bf16.mxu0 %v6725_v12 }
 0x299   : > { %5547 = vmatpush1.bf16.msra.mxu0 %v6723_v8 }
 0x2a6   : > { %v7760_v35 = vpop.f32.mrb[32].mxu0 }
 0x2a7   : > { %v7762_v22 = vpop.f32.mrb[33].mxu0 }
 0x2a8   : > { %v7764_v15 = vpop.f32.mrb[34].mxu0 }
 0x2a9   : > { %v7766_v21 = vpop.f32.mrb[35].mxu0 }
 0x2b1   : > { %v7768_v20 = vpop.f32.mrb[36].mxu0 }
 0x2b2   : > { %v7770_v23 = vpop.f32.mrb[37].mxu0 }
 0x2b3   : > { %v7772_v33 = vpop.f32.mrb[38].mxu0 }
 0x2b4   : > { %v7774_v51 = vpop.f32.mrb[39].mxu0 }
 0x2fc   : > { %v6393_v50 = vpop.f32.mrb[0].mxu1 }
 0x2fd   : > { %v6394_v32 = vpop.f32.mrb[1].mxu1 }
 0x2fe   : > { %v7823_v60 = vadd.f32 %v6394_v32, %v6393_v50  ;;  %v6396_v40 = vpop.f32.mrb[2].mxu1 }
 0x2ff   : > { %v6397_v6 = vpop.f32.mrb[3].mxu1 }
 0x300   : > { %v7829_v44 = vadd.f32 %v6397_v6, %v6396_v40  ;;  %v3832_v40 = vld [vmem:[#allocation4 + $0x14] sm:$0x1]  ;;  %v3439_v10 = vadd.f32 %v7823_v60, %v7992_v18 }
 0x301   : > { %v3833_v6 = vsel %vm7778_vm11, 0, %v3832_v40  ;;  %v6740_v60 = vld [vmem:[%s8482_s5 + $0x2e4] ss:$8 sps:$4 sm:$0xff]   ;;  %v6750_v40 = vld [vmem:[%s8482_s5 + $0x2f4] ss:$8 sps:$4 sm:$0xff]   ;;  %vm8135_vm11 = vmor %vm8126_vm10, %vm4043_vm8 }
 0x302   : > { %3834 = vst [vmem:[#allocation4 + $0x14] sm:$0x1] %v3833_v6  ;;  %v3442_v2 = vadd.f32 %v7829_v44, %v7992_v18 }
 0x313   : > { %v6399_v30 = vpop.f32.mrb[4].mxu1 }
 0x314   : > { %v6400_v58 = vpop.f32.mrb[5].mxu1 }
 0x315   : > { %v7885_v13 = vadd.f32 %v6400_v58, %v6399_v30  ;;  %v6402_v28 = vpop.f32.mrb[6].mxu1  ;;  %v6720_v30 = vld [vmem:[%s8482_s5 + $0x2b0] ss:$8 sps:$4 sm:$0xff]   ;;  %v6728_v58 = vld [vmem:[%s8482_s5 + $0x2c4] ss:$8 sps:$4 sm:$0xff]  }
 0x316   : > { %v6403_v38 = vpop.f32.mrb[7].mxu1  ;;  %5629 = vmatpush1.bf16.msra.mxu1 %v6720_v30 }
 0x317   : > { %v7896_v43 = vadd.f32 %v6403_v38, %v6402_v28  ;;  %v6731_v28 = vld [vmem:[%s8482_s5 + $0xe4] ss:$8 sps:$4 sm:$0xff]   ;;  %v6726_v38 = vld [vmem:[%s8482_s5 + $0x2c0] ss:$8 sps:$4 sm:$0xff]   ;;  %5630 = vmatprep.subr.bf16.mxu1 %v6728_v58 }
 0x318   : > { %5548 = vmatprep.subr.bf16.mxu0 %v6731_v28 }
 0x319   : > { %5549 = vmatpush1.bf16.msra.mxu0 %v6729_v24  ;;  %v3450_v57 = vadd.f32 %v7896_v43, %v7992_v18 }
 0x31a   : > { %5631 = vmatpush1.bf16.msra.mxu1 %v6726_v38  ;;  %5550 = vmatprep.subr.bf16.mxu0 %v6737_v42 }
 0x31b   : > { %5632 = vmatprep.subr.bf16.mxu1 %v6734_v63 }
 0x31d   : > { %v6405_v49 = vpop.f32.mrb[8].mxu1 }
 0x31e   : > { %v6406_v17 = vpop.f32.mrb[9].mxu1  ;;  %5633 = vmatpush1.bf16.msra.mxu1 %v6732_v56 }
 0x31f   : > { %v7926_v50 = vadd.f32 %v6406_v17, %v6405_v49  ;;  %v6408_v32 = vpop.f32.mrb[10].mxu1  ;;  %v6735_v17 = vld [vmem:[%s8482_s5 + $0xf0] ss:$8 sps:$4 sm:$0xff]   ;;  %5634 = vmatprep.subr.bf16.mxu1 %v6740_v60 }
 0x320   : > { %v6409_v5 = vpop.f32.mrb[11].mxu1  ;;  %5551 = vmatpush1.bf16.msra.mxu0 %v6735_v17 }
 0x321   : > { %v7931_v45 = vadd.f32 %v6409_v5, %v6408_v32  ;;  %v6738_v32 = vld [vmem:[%s8482_s5 + $0x2e0] ss:$8 sps:$4 sm:$0xff]   ;;  %5563 = vmatprep.subr.bf16.mxu0 %v6743_v54 }
 0x322   : > { %5635 = vmatpush1.bf16.msra.mxu1 %v6738_v32 }
 0x323   : > { %5636 = vmatprep.subr.bf16.mxu1 %v6750_v40 }
 0x327   : > { %v6411_v9 = vpop.f32.mrb[12].mxu1 }
 0x328   : > { %v6412_v4 = vpop.f32.mrb[13].mxu1 }
 0x329   : > { %v7970_v34 = vadd.f32 %v6412_v4, %v6411_v9  ;;  %v6414_v16 = vpop.f32.mrb[14].mxu1  ;;  %v3455_v4 = vadd.f32 %v7926_v50, %v7992_v18 }
 0x32a   : > { %v6415_v36 = vpop.f32.mrb[15].mxu1 }
 0x32b   : > { %v7975_v55 = vadd.f32 %v6415_v36, %v6414_v16  ;;  %v3458_v36 = vadd.f32 %v7931_v45, %v7992_v18  ;;  %v8050_v30 = vadd.f32 %v7970_v34, %v7992_v18 }
 0x330   : > { %v6433_v47 = vpop.f32.mrb[16].mxu1 }
 0x331   : > { %v6434_v41 = vpop.f32.mrb[17].mxu1 }
 0x332   : > { %v6435_v48 = vadd.f32 %v6434_v41, %v6433_v47  ;;  %v6436_v14 = vpop.f32.mrb[18].mxu1 }
 0x333   : > { %v6437_v19 = vpop.f32.mrb[19].mxu1 }
 0x334   : > { %v3504_v49 = vadd.f32 %v6435_v48, %v3439_v10  ;;  %v6438_v37 = vadd.f32 %v6437_v19, %v6436_v14 }
 0x336   : > { %v3569_v39 = vadd.f32 %v7762_v22, %v3504_v49  ;;  %v3507_v44 = vadd.f32 %v6438_v37, %v3442_v2  ;;  %v3447_v22 = vadd.f32 %v7885_v13, %v7992_v18  ;;  %v6756_v13 = vld [vmem:[%s8482_s5 + $0x304] ss:$8 sps:$4 sm:$0xff]   ;;  %v8058_v37 = vadd.f32 %v7975_v55, %v7992_v18 }
 0x338   : > { %v3572_v62 = vadd.f32 %v7766_v21, %v3507_v44  ;;  %v6439_v5 = vpop.f32.mrb[20].mxu1  ;;  %v3599_v6 = vmax.f32 %v3569_v39, 0.0  ;;  %v6748_v21 = vld [vmem:[%s8482_s5 + $0x2f0] ss:$8 sps:$4 sm:$0xff]  }
 0x339   : > { %v6440_v11 = vpop.f32.mrb[21].mxu1  ;;  %5637 = vmatpush1.bf16.msra.mxu1 %v6748_v21 }
 0x33a   : > { %v3600_v46 = vmax.f32 %v3572_v62, 0.0  ;;  %v6441_v29 = vadd.f32 %v6440_v11, %v6439_v5  ;;  %v6442_v27 = vpop.f32.mrb[22].mxu1  ;;  %5649 = vmatprep.subr.bf16.mxu1 %v6756_v13 }
 0x33b   : > { %v6443_v53 = vpop.f32.mrb[23].mxu1 }
 0x33c   : > { %v3607_v59 = vmax.f32 %v3599_v6, %v3600_v46  ;;  %v3512_v26 = vadd.f32 %v6441_v29, %v3447_v22  ;;  %v6444_v1 = vadd.f32 %v6443_v53, %v6442_v27 }
 0x33e   : > { %v3615_v31 = vcombine.high %v3607_v59, %v3607_v59  ;;  %v3622_v9 = vrot.slane %v3607_v59, %v7043_v61  ;;  %v3577_v3 = vadd.f32 %v7760_v35, %v3512_v26  ;;  %v3515_v0 = vadd.f32 %v6444_v1, %v3450_v57 }
 0x340   : > { %v3629_v43 = vrot.slane %v3615_v31, %v7043_v61  ;;  %v3630_v7 = vcombine.high %v3622_v9, %v3622_v9  ;;  %v3700_v16 = vsel %vm3699_vm7, %v3622_v9, -inf  ;;  %v6445_v12 = vpop.f32.mrb[24].mxu1  ;;  %v3580_v8 = vadd.f32 %v7764_v15, %v3515_v0 }
 0x341   : > { %v3701_v35 = vrot.slane %v3700_v16, 4  ;;  %v6446_v58 = vpop.f32.mrb[25].mxu1  ;;  %v3601_v34 = vmax.f32 %v3577_v3, 0.0 }
 0x342   : > { %v3631_v28 = vcombine.high %v3629_v43, %v3629_v43  ;;  %v3707_v50 = vsel %vm3699_vm7, %v3630_v7, -inf  ;;  %v3714_v38 = vsel %vm3699_vm7, %v3629_v43, -inf  ;;  %v6447_v47 = vadd.f32 %v6446_v58, %v6445_v12  ;;  %v6448_v24 = vpop.f32.mrb[26].mxu1 }
 0x343   : > { %v3702_v63 = vmax.f32 %v3700_v16, %v3701_v35  ;;  %v3708_v41 = vrot.slane %v3707_v50, 4  ;;  %v3715_v42 = vrot.slane %v3714_v38, 4  ;;  %v3602_v10 = vmax.f32 %v3580_v8, 0.0  ;;  %v6449_v45 = vpop.f32.mrb[27].mxu1 }
 0x344   : > { %v3721_v48 = vsel %vm3699_vm7, %v3631_v28, -inf  ;;  %v3520_v14 = vadd.f32 %v6447_v47, %v3455_v4  ;;  %v6450_v19 = vadd.f32 %v6449_v45, %v6448_v24 }
 0x345   : > { %v3703_v56 = vrot.slane %v3702_v63, 2  ;;  %v3709_v15 = vmax.f32 %v3707_v50, %v3708_v41  ;;  %v3716_v2 = vmax.f32 %v3714_v38, %v3715_v42  ;;  %v3722_v49 = vrot.slane %v3721_v48, 4 }
 0x346   : > { %v3608_v17 = vmax.f32 %v3601_v34, %v3602_v10  ;;  %v3585_v60 = vadd.f32 %v7770_v23, %v3520_v14  ;;  %v3523_v54 = vadd.f32 %v6450_v19, %v3458_v36 }
 0x347   : > { %v3704_v39 = vmax.f32 %v3702_v63, %v3703_v56  ;;  %v3710_v44 = vrot.slane %v3709_v15, 2  ;;  %v3717_v32 = vrot.slane %v3716_v2, 2  ;;  %v3723_v62 = vmax.f32 %v3721_v48, %v3722_v49 }
 0x348   : > { %v3632_v5 = vcombine.high %v3608_v17, %v3608_v17  ;;  %v3639_v40 = vrot.slane %v3608_v17, %v7043_v61  ;;  %v3603_v11 = vmax.f32 %v3585_v60, 0.0  ;;  %v3588_v22 = vadd.f32 %v7774_v51, %v3523_v54  ;;  %v8063_v6 = vpop.f32.mrb[28].mxu1 }
 0x349   : > { %v3705_v46 = vrot.slane %v3704_v39, 1  ;;  %v3711_v29 = vmax.f32 %v3709_v15, %v3710_v44  ;;  %v3718_v55 = vmax.f32 %v3716_v2, %v3717_v32  ;;  %v3724_v18 = vrot.slane %v3723_v62, 2  ;;  %v8065_v27 = vpop.f32.mrb[29].mxu1 }
 0x34a   : > { %v3646_v23 = vrot.slane %v3632_v5, %v7043_v61  ;;  %v3647_v53 = vcombine.high %v3639_v40, %v3639_v40  ;;  %v3728_v21 = vsel %vm3699_vm7, %v3639_v40, -inf  ;;  %v3604_v57 = vmax.f32 %v3588_v22, 0.0  ;;  %v8069_v59 = vpop.f32.mrb[30].mxu1  ;;  %v3959_v40 = vld [vmem:[#allocation4 + $0x4] sm:$0x7] }
 0x34b   : > { %v3706_v26 = vmax.f32 %v3704_v39, %v3705_v46  ;;  %v3712_v1 = vrot.slane %v3711_v29, 1  ;;  %v3719_v51 = vrot.slane %v3718_v55, 1  ;;  %v3725_v13 = vmax.f32 %v3723_v62, %v3724_v18  ;;  %v8071_v31 = vpop.f32.mrb[31].mxu1 }
 0x34c   : > { %v3648_v9 = vcombine.high %v3646_v23, %v3646_v23  ;;  %v3729_v3 = vrot.slane %v3728_v21, 4  ;;  %v3735_v0 = vsel %vm3699_vm7, %v3647_v53, -inf  ;;  %v3742_v4 = vsel %vm3699_vm7, %v3646_v23, -inf }
 0x34d   : > { %v3713_v43 = vmax.f32 %v3711_v29, %v3712_v1  ;;  %v3720_v7 = vmax.f32 %v3718_v55, %v3719_v51  ;;  %v3726_v16 = vrot.slane %v3725_v13, 1  ;;  %v6343_v12 = vpack.c.bf16 %v3706_v26, %v3706_v26 }
 0x34e   : > { %v3730_v36 = vmax.f32 %v3728_v21, %v3729_v3  ;;  %v3736_v35 = vrot.slane %v3735_v0, 4  ;;  %v3743_v8 = vrot.slane %v3742_v4, 4  ;;  %v3749_v58 = vsel %vm3699_vm7, %v3648_v9, -inf }
 0x34f   : > { %v3727_v28 = vmax.f32 %v3725_v13, %v3726_v16  ;;  %v6344_v50 = vpack.c.bf16 %v3713_v43, %v3713_v43  ;;  %v6345_v38 = vpack.c.bf16 %v3720_v7, %v3720_v7  ;;  %v3920_v47 = vunpack.c.l.b16 %v6343_v12 }
 0x350   : > { %v3731_v24 = vrot.slane %v3730_v36, 2  ;;  %v3737_v63 = vmax.f32 %v3735_v0, %v3736_v35  ;;  %v3744_v41 = vmax.f32 %v3742_v4, %v3743_v8  ;;  %v3750_v42 = vrot.slane %v3749_v58, 4 }
 0x351   : > { %v6346_v10 = vpack.c.bf16 %v3727_v28, %v3727_v28  ;;  %v3921_v45 = vunpack.c.l.b16 %v6344_v50  ;;  %v3922_v48 = vunpack.c.l.b16 %v6345_v38  ;;  %v3609_v34 = vmax.f32 %v3603_v11, %v3604_v57 }
 0x352   : > { %v3732_v14 = vmax.f32 %v3730_v36, %v3731_v24  ;;  %v3738_v19 = vrot.slane %v3737_v63, 2  ;;  %v3745_v56 = vrot.slane %v3744_v41, 2  ;;  %v3751_v15 = vmax.f32 %v3749_v58, %v3750_v42 }
 0x353   : > { %v3923_v2 = vunpack.c.l.b16 %v6346_v10  ;;  %v3936_v49 = vsel %vm1905_vm12, %v3921_v45, %v3920_v47  ;;  %v3649_v17 = vcombine.high %v3609_v34, %v3609_v34  ;;  %v3656_v60 = vrot.slane %v3609_v34, %v7043_v61 }
 0x354   : > { %v3937_v54 = vsel %vm1907_vm13, %v3922_v48, %v3936_v49  ;;  %v3733_v39 = vrot.slane %v3732_v14, 1  ;;  %v3739_v44 = vmax.f32 %v3737_v63, %v3738_v19  ;;  %v3746_v32 = vmax.f32 %v3744_v41, %v3745_v56  ;;  %v6087_v19 = vld.sshfl [vmem:[#allocation4] sm:$0x13 pattern:$0x76325410] }
 0x355   : > { %v3938_v62 = vsel %vm1909_vm14, %v3923_v2, %v3937_v54  ;;  %v3752_v11 = vrot.slane %v3751_v15, 2  ;;  %v3663_v22 = vrot.slane %v3649_v17, %v7043_v61  ;;  %v3664_v46 = vcombine.high %v3656_v60, %v3656_v60  ;;  %v3962_v17 = vld [vmem:[#allocation4 + $0x8] sm:$0x7] }
 0x356   : > { %v3948_v29 = vpack.c.b16 %v3938_v62, %v3938_v62  ;;  %v3734_v55 = vmax.f32 %v3732_v14, %v3733_v39  ;;  %v3740_v18 = vrot.slane %v3739_v44, 1  ;;  %v3747_v23 = vrot.slane %v3746_v32, 1 }
 0x357   : > { %v3753_v53 = vmax.f32 %v3751_v15, %v3752_v11  ;;  %v3665_v21 = vcombine.high %v3663_v22, %v3663_v22  ;;  %v3756_v57 = vsel %vm3699_vm7, %v3656_v60, -inf  ;;  %v3763_v26 = vsel %vm3699_vm7, %v3664_v46, -inf }
 0x358   : > { %v3960_v1 = vsel %vm8082_vm3, %v3948_v29, %v3959_v40  ;;  %v3741_v51 = vmax.f32 %v3739_v44, %v3740_v18  ;;  %v3748_v13 = vmax.f32 %v3746_v32, %v3747_v23  ;;  %v6347_v9 = vpack.c.bf16 %v3734_v55, %v3734_v55 }
 0x359   : > { %3961 = vst [vmem:[#allocation4 + $0x4] sm:$0x7] %v3960_v1  ;;  %v3754_v3 = vrot.slane %v3753_v53, 1  ;;  %v3757_v0 = vrot.slane %v3756_v57, 4  ;;  %v3764_v4 = vrot.slane %v3763_v26, 4  ;;  %v3770_v43 = vsel %vm3699_vm7, %v3663_v22, -inf }
 0x35a   : > { %v6348_v7 = vpack.c.bf16 %v3741_v51, %v3741_v51  ;;  %v6349_v16 = vpack.c.bf16 %v3748_v13, %v3748_v13  ;;  %v3924_v12 = vunpack.c.l.b16 %v6347_v9  ;;  %v3771_v36 = vrot.slane %v3770_v43, 4 }
 0x35b   : > { %v3755_v35 = vmax.f32 %v3753_v53, %v3754_v3  ;;  %v3758_v8 = vmax.f32 %v3756_v57, %v3757_v0  ;;  %v3765_v58 = vmax.f32 %v3763_v26, %v3764_v4  ;;  %v3777_v28 = vsel %vm3699_vm7, %v3665_v21, -inf }
 0x35c   : > { %v3925_v50 = vunpack.c.l.b16 %v6348_v7  ;;  %v3926_v38 = vunpack.c.l.b16 %v6349_v16  ;;  %v3772_v47 = vmax.f32 %v3770_v43, %v3771_v36  ;;  %v3778_v24 = vrot.slane %v3777_v28, 4 }
 0x35d   : > { %v6350_v63 = vpack.c.bf16 %v3755_v35, %v3755_v35  ;;  %v3759_v41 = vrot.slane %v3758_v8, 2  ;;  %v3766_v42 = vrot.slane %v3765_v58, 2  ;;  %v6453_v10 = vadd.f32 %v8065_v27, %v8063_v6 }
 0x35e   : > { %v3939_v45 = vsel %vm1905_vm12, %v3925_v50, %v3924_v12  ;;  %v3773_v48 = vrot.slane %v3772_v47, 2  ;;  %v3779_v34 = vmax.f32 %v3777_v28, %v3778_v24  ;;  %v6456_v14 = vadd.f32 %v8071_v31, %v8069_v59  ;;  %v3965_v50 = vld [vmem:[#allocation4 + $0xc] sm:$0x7] }
 0x35f   : > { %v3927_v56 = vunpack.c.l.b16 %v6350_v63  ;;  %v3940_v15 = vsel %vm1907_vm13, %v3926_v38, %v3939_v45  ;;  %v3760_v2 = vmax.f32 %v3758_v8, %v3759_v41  ;;  %v3767_v49 = vmax.f32 %v3765_v58, %v3766_v42 }
 0x360   : > { %v3774_v60 = vmax.f32 %v3772_v47, %v3773_v48  ;;  %v3780_v54 = vrot.slane %v3779_v34, 2  ;;  %v3528_v39 = vadd.f32 %v6453_v10, %v8050_v30  ;;  %v3531_v6 = vadd.f32 %v6456_v14, %v8058_v37  ;;  %v8106_v18 = vld.sshfl [vmem:[#allocation4 + $0x4] sm:$0x13 pattern:$0x76325410] }
 0x361   : > { %v3941_v27 = vsel %vm1909_vm14, %v3927_v56, %v3940_v15  ;;  %v3761_v44 = vrot.slane %v3760_v2, 1  ;;  %v3768_v32 = vrot.slane %v3767_v49, 1  ;;  %v4046_v62 = vshrl.u32 %v6087_v19, 16 }
 0x362   : > { %v3949_v40 = vpack.c.b16 %v3941_v27, %v3941_v27  ;;  %v3775_v59 = vrot.slane %v3774_v60, 1  ;;  %v3781_v31 = vmax.f32 %v3779_v34, %v3780_v54  ;;  %v3593_v11 = vadd.f32 %v7768_v20, %v3528_v39 }
 0x363   : > { %v3762_v22 = vmax.f32 %v3760_v2, %v3761_v44  ;;  %v3769_v46 = vmax.f32 %v3767_v49, %v3768_v32  ;;  %v3596_v29 = vadd.f32 %v7772_v33, %v3531_v6  ;;  %v4049_v23 = vshll.u32 %v6087_v19, 16 }
 0x364   : > { %v3963_v30 = vsel %vm8082_vm3, %v3949_v40, %v3962_v17  ;;  %v3776_v55 = vmax.f32 %v3774_v60, %v3775_v59  ;;  %v3782_v37 = vrot.slane %v3781_v31, 1  ;;  %v3605_v57 = vmax.f32 %v3593_v11, 0.0 }
 0x365   : > { %3964 = vst [vmem:[#allocation4 + $0x8] sm:$0x7] %v3963_v30  ;;  %v6351_v53 = vpack.c.bf16 %v3762_v22, %v3762_v22  ;;  %v6352_v21 = vpack.c.bf16 %v3769_v46, %v3769_v46  ;;  %v3606_v26 = vmax.f32 %v3596_v29, 0.0  ;;  %v4013_v51 = vcombine.high %v6087_v19, %v6087_v19 }
 0x366   : > { %v3783_v1 = vmax.f32 %v3781_v31, %v3782_v37  ;;  %v6353_v20 = vpack.c.bf16 %v3776_v55, %v3776_v55  ;;  %v4048_v13 = vrot.slane %v4046_v62, 6  ;;  %v4060_v0 = vshrl.u32 %v8106_v18, 16  ;;  %v8130_v55 = vld.sshfl [vmem:[#allocation4 + $0x14] sm:$0x13 pattern:$0x76325410] }
 0x367   : > { %v3928_v9 = vunpack.c.l.b16 %v6351_v53  ;;  %v3929_v33 = vunpack.c.l.b16 %v6352_v21  ;;  %v3610_v3 = vmax.f32 %v3605_v57, %v3606_v26  ;;  %v4051_v7 = vrot.slane %v4049_v23, 7 }
 0x368   : > { %v6354_v4 = vpack.c.bf16 %v3783_v1, %v3783_v1  ;;  %v3930_v43 = vunpack.c.l.b16 %v6353_v20  ;;  %v4063_v16 = vshll.u32 %v8106_v18, 16  ;;  %v4055_v28 = vshll.u32 %v4013_v51, 16 }
 0x369   : > { %v3942_v12 = vsel %vm1905_vm12, %v3929_v33, %v3928_v9  ;;  %v3666_v36 = vcombine.high %v3610_v3, %v3610_v3  ;;  %v3673_v35 = vrot.slane %v3610_v3, %v7043_v61  ;;  %v4062_v63 = vrot.slane %v4060_v0, 6 }
 0x36a   : > { %v3931_v8 = vunpack.c.l.b16 %v6354_v4  ;;  %v3943_v58 = vsel %vm1907_vm13, %v3930_v43, %v3942_v12  ;;  %v4052_v45 = vor.u32 %v4051_v7, %v4048_v13  ;;  %v4065_v48 = vrot.slane %v4063_v16, 7 }
 0x36b   : > { %v3680_v38 = vrot.slane %v3666_v36, %v7043_v61  ;;  %v3681_v47 = vcombine.high %v3673_v35, %v3673_v35  ;;  %v3784_v24 = vsel %vm3699_vm7, %v3673_v35, -inf  ;;  %v4021_v54 = vcombine.high %v8106_v18, %v8106_v18 }
 0x36c   : > { %v3944_v41 = vsel %vm1909_vm14, %v3931_v8, %v3943_v58  ;;  %v3785_v42 = vrot.slane %v3784_v24, 4  ;;  %v6089_v10 = vld.sshfl [vmem:[#allocation4 + $0x8] sm:$0x13 pattern:$0x76325410]  ;;  %v4053_v40 = vrot.slane %v4052_v45, 2  ;;  %v4066_v31 = vor.u32 %v4065_v48, %v4062_v63 }
 0x36d   : > { %v3950_v34 = vpack.c.b16 %v3944_v41, %v3944_v41  ;;  %v3682_v14 = vcombine.high %v3680_v38, %v3680_v38  ;;  %v3791_v19 = vsel %vm3699_vm7, %v3681_v47, -inf  ;;  %v3798_v56 = vsel %vm3699_vm7, %v3680_v38, -inf  ;;  %v6104_v4 = vld.sshfl [vmem:[#allocation4 + $0x8] sm:$0x12 pattern:$0x76325410] }
 0x36e   : > { %v3786_v15 = vmax.f32 %v3784_v24, %v3785_v42  ;;  %v3792_v2 = vrot.slane %v3791_v19, 4  ;;  %v3799_v49 = vrot.slane %v3798_v56, 4  ;;  %v4074_v39 = vshrl.u32 %v6089_v10, 16 }
 0x36f   : > { %v3966_v17 = vsel %vm8082_vm3, %v3950_v34, %v3965_v50  ;;  %v3805_v60 = vsel %vm3699_vm7, %v3682_v14, -inf  ;;  %v4057_v59 = vrot.slane %v4055_v28, 7  ;;  %v4077_v11 = vshll.u32 %v6089_v10, 16  ;;  %vm4162_vm7 = vmor %vm4160_vm15, %vm1909_vm14 }
 0x370   : > { %3967 = vst [vmem:[#allocation4 + $0xc] sm:$0x7] %v3966_v17  ;;  %v3787_v6 = vrot.slane %v3786_v15, 2  ;;  %v3793_v27 = vmax.f32 %v3791_v19, %v3792_v2  ;;  %v3800_v44 = vmax.f32 %v3798_v56, %v3799_v49  ;;  %v3806_v32 = vrot.slane %v3805_v60, 4  ;;  %vm8152_vm9 = vmor %vm4162_vm7, %vm1913_vm0 }
 0x371   : > { %v4029_v37 = vcombine.high %v6089_v10, %v6089_v10  ;;  %v4069_v18 = vshll.u32 %v4021_v54, 16  ;;  %v4076_v23 = vrot.slane %v4074_v39, 6  ;;  %v4079_v53 = vrot.slane %v4077_v11, 7  ;;  %v6835_v11 = vld [vmem:[%s8482_s5 + $0x1f0] ss:$8 sps:$4 sm:$0xff]  }
 0x372   : > { %v3788_v22 = vmax.f32 %v3786_v15, %v3787_v6  ;;  %v3794_v46 = vrot.slane %v3793_v27, 2  ;;  %v3801_v29 = vrot.slane %v3800_v44, 2  ;;  %v3807_v30 = vmax.f32 %v3805_v60, %v3806_v32 }
 0x373   : > { %v4067_v51 = vrot.slane %v4066_v31, 2  ;;  %v4528_v13 = vshrl.u32 %v8130_v55, 16  ;;  %v4058_v7 = vsel %vm8135_vm11, %v4053_v40, %v4057_v59  ;;  %v4071_v16 = vrot.slane %v4069_v18, 7 }
 0x374   : > { %v3789_v21 = vrot.slane %v3788_v22, 1  ;;  %v3795_v57 = vmax.f32 %v3793_v27, %v3794_v46  ;;  %v3802_v26 = vmax.f32 %v3800_v44, %v3801_v29  ;;  %v3808_v1 = vrot.slane %v3807_v30, 2  ;;  %v3968_v29 = vld [vmem:[#allocation4 + $0x10] sm:$0x7] }
 0x375   : > { %v4080_v12 = vor.u32 %v4079_v53, %v4076_v23  ;;  %v4083_v36 = vshll.u32 %v4029_v37, 16  ;;  %v4365_v24 = vcombine.high %v6104_v4, %v6104_v4  ;;  %v8146_v10 = vsel %vm8135_vm11, %v4067_v51, %v4071_v16 }
 0x376   : > { %v3790_v9 = vmax.f32 %v3788_v22, %v3789_v21  ;;  %v3796_v33 = vrot.slane %v3795_v57, 1  ;;  %v3803_v3 = vrot.slane %v3802_v26, 1  ;;  %v3809_v0 = vmax.f32 %v3807_v30, %v3808_v1 }
 0x377   : > { %v6090_v43 = vld.sshfl [vmem:[#allocation4 + $0xc] sm:$0x13 pattern:$0x76325410]  ;;  %v4081_v17 = vrot.slane %v4080_v12, 2  ;;  %v4085_v60 = vrot.slane %v4083_v36, 7  ;;  %v4101_v30 = vcombine.low %v4058_v7, %v8146_v10  ;;  %v4484_v51 = vcombine.high %v8130_v55, %v8130_v55 }
 0x378   : > { %v3797_v35 = vmax.f32 %v3795_v57, %v3796_v33  ;;  %v3804_v8 = vmax.f32 %v3802_v26, %v3803_v3  ;;  %v3810_v58 = vrot.slane %v3809_v0, 1  ;;  %v6355_v28 = vpack.c.bf16 %v3790_v9, %v3790_v9  ;;  %v6105_v45 = vld.sshfl [vmem:[#allocation4 + $0xc] sm:$0x12 pattern:$0x76325410] }
 0x379   : > { %v4037_v50 = vcombine.high %v6090_v43, %v6090_v43  ;;  %v4088_v38 = vshrl.u32 %v6090_v43, 16  ;;  %v4091_v47 = vshll.u32 %v6090_v43, 16  ;;  %v4373_v49 = vcombine.high %v6105_v45, %v6105_v45  ;;  %v6872_v31 = vld.sshfl [vmem:[#allocation4 + $0x8] sm:$0xf pattern:$0x76325410] }
 0x37a   : > { %v3811_v63 = vmax.f32 %v3809_v0, %v3810_v58  ;;  %v6356_v41 = vpack.c.bf16 %v3797_v35, %v3797_v35  ;;  %v6357_v42 = vpack.c.bf16 %v3804_v8, %v3804_v8  ;;  %v3932_v48 = vunpack.c.l.b16 %v6355_v28  ;;  %v6873_v57 = vld.sshfl [vmem:[#allocation4] sm:$0xf pattern:$0x76325410]  ;;  %v6741_v35 = vld [vmem:[%s8482_s5 + $0x100] ss:$8 sps:$4 sm:$0xff]  }
 0x37b   : > { %v4090_v34 = vrot.slane %v4088_v38, 6  ;;  %v4093_v14 = vrot.slane %v4091_v47, 7  ;;  %v4097_v19 = vshll.u32 %v4037_v50, 16  ;;  %v4388_v39 = vrot.slane %v4365_v24, 7  ;;  %v6753_v28 = vld [vmem:[%s8482_s5 + $0x114] ss:$8 sps:$4 sm:$0xff]  }
 0x37c   : > { %v6358_v56 = vpack.c.bf16 %v3811_v63, %v3811_v63  ;;  %v3933_v15 = vunpack.c.l.b16 %v6356_v41  ;;  %v3934_v2 = vunpack.c.l.b16 %v6357_v42  ;;  %v6109_v44 = vrot.slane %v6105_v45, 9  ;;  %v6118_v9 = vld.sshfl [vmem:[#allocation4 + $0x14] sm:$0x12 pattern:$0x76325410] }
 0x37d   : > { %v4094_v54 = vor.u32 %v4093_v14, %v4090_v34  ;;  %v4392_v32 = vrot.slane %v4373_v49, 7  ;;  %v4099_v59 = vrot.slane %v4097_v19, 7  ;;  %v6108_v22 = vrot.slane %v6104_v4, 9  ;;  %v6751_v47 = vld [vmem:[%s8482_s5 + $0x110] ss:$8 sps:$4 sm:$0xff]  }
 0x37e   : > { %v3935_v6 = vunpack.c.l.b16 %v6358_v56  ;;  %v3945_v27 = vsel %vm1905_vm12, %v3933_v15, %v3932_v48  ;;  %v4531_v18 = vshll.u32 %v8130_v55, 16  ;;  %v8165_v53 = vsel %vm8135_vm11, %v4081_v17, %v4085_v60  ;;  %v6103_v0 = vld.sshfl [vmem:[#allocation4 + $0x4] sm:$0x12 pattern:$0x76325410] }
 0x37f   : > { %v3946_v62 = vsel %vm1907_vm13, %v3934_v2, %v3945_v27  ;;  %v4095_v40 = vrot.slane %v4094_v54, 2  ;;  %v8160_v37 = vsel %vm8152_vm9, %v6109_v44, %v4392_v32  ;;  %v8173_v26 = vsel %vm8152_vm9, %v6108_v22, %v4388_v39  ;;  %v6874_v55 = vld.sshfl [vmem:[#allocation4 + $0x4] sm:$0xf pattern:$0x76325410] }
 0x380   : > { %v3947_v46 = vsel %vm1909_vm14, %v3935_v6, %v3946_v62  ;;  %v4616_v33 = vcombine.low %v8173_v26, %v8160_v37  ;;  %v4109_v4 = vrot.slane %v4101_v30, %v7043_v61  ;;  %v4530_v7 = vrot.slane %v4528_v13, 6  ;;  %v6759_v63 = vld [vmem:[%s8482_s5 + $0x124] ss:$8 sps:$4 sm:$0xff]   ;;  %v6757_v2 = vld [vmem:[%s8482_s5 + $0x120] ss:$8 sps:$4 sm:$0xff]  }
 0x381   : > { %v3951_v23 = vpack.c.b16 %v3947_v46, %v3947_v46  ;;  %v8169_v21 = vsel %vm8135_vm11, %v4095_v40, %v4099_v59  ;;  %v4533_v16 = vrot.slane %v4531_v18, 7  ;;  %v4599_v12 = vcombine.high %v6118_v9, %v6118_v9  ;;  %v6765_v44 = vld [vmem:[%s8482_s5 + $0x134] ss:$8 sps:$4 sm:$0xff]   ;;  %v6763_v46 = vld [vmem:[%s8482_s5 + $0x130] ss:$8 sps:$4 sm:$0xff]  }
 0x382   : > { %v4102_v1 = vcombine.low %v8165_v53, %v8169_v21  ;;  %v4357_v5 = vcombine.high %v6103_v0, %v6103_v0  ;;  %v4537_v8 = vshll.u32 %v4484_v51, 16  ;;  %v3995_v58 = vcombine.low %v6873_v57, %v6872_v31 }
 0x383   : > { %v3969_v3 = vsel %vm8082_vm3, %v3951_v23, %v3968_v29  ;;  %v4534_v50 = vor.u32 %v4533_v16, %v4530_v7  ;;  %v6122_v13 = vrot.slane %v6118_v9, 9  ;;  %v4614_v38 = vrot.slane %v4599_v12, 7  ;;  %v6771_v23 = vld [vmem:[%s8482_s5 + $0x144] ss:$8 sps:$4 sm:$0xff]  }
 0x384   : > { %3970 = vst [vmem:[#allocation4 + $0x10] sm:$0x7] %v3969_v3  ;;  %v8185_v43 = vrot.slane %v4102_v1, %v7043_v61  ;;  %v4384_v24 = vrot.slane %v4357_v5, 7  ;;  %v4539_v41 = vrot.slane %v4537_v8, 7  ;;  %v6107_v48 = vrot.slane %v6103_v0, 9 }
 0x385   : > { %v4535_v34 = vrot.slane %v4534_v50, 2  ;;  %v4615_v56 = vsel %vm8152_vm9, %v6122_v13, %v4614_v38  ;;  %v8229_v57 = vrot.slane %v4616_v33, %v7043_v61  ;;  %v4323_v9 = vcombine.low %v8146_v10, %v8165_v53  ;;  %v6769_v33 = vld [vmem:[%s8482_s5 + $0x140] ss:$8 sps:$4 sm:$0xff]   ;;  %v6777_v10 = vld [vmem:[%s8482_s5 + $0x154] ss:$8 sps:$4 sm:$0xff]  }
 0x386   : > { %v4117_v36 = vcombine.low %v4109_v4, %v8185_v43  ;;  %v8206_v15 = vsel %vm8152_vm9, %v6107_v48, %v4384_v24  ;;  %v6762_v5 = vld [vmem:[%s8482_s5 + $0x314] ss:$8 sps:$4 sm:$0xff]   ;;  %v6775_v8 = vld [vmem:[%s8482_s5 + $0x150] ss:$8 sps:$4 sm:$0xff]   ;;  %v6781_v50 = vld [vmem:[%s8482_s5 + $0x160] ss:$8 sps:$4 sm:$0xff]  }
 0x387   : > { %v4398_v27 = vcombine.low %v8206_v15, %v8173_v26  ;;  %v4540_v18 = vsel %vm8135_vm11, %v4535_v34, %v4539_v41  ;;  %v4331_v20 = vrot.slane %v4323_v9, %v7043_v61  ;;  %v6766_v13 = vld [vmem:[%s8482_s5 + $0x320] ss:$8 sps:$4 sm:$0xff]   ;;  %v6774_v38 = vld [vmem:[%s8482_s5 + $0x334] ss:$8 sps:$4 sm:$0xff]   ;;  %v6795_v24 = vld [vmem:[%s8482_s5 + $0x184] ss:$8 sps:$4 sm:$0xff]  }
 0x388   : > { %5552 = vmatprep.mubr.bf16.mxu0 %v4117_v36  ;;  %v6754_v36 = vld [vmem:[%s8482_s5 + $0x300] ss:$8 sps:$4 sm:$0xff]   ;;  %v6780_v41 = vld [vmem:[%s8482_s5 + $0x344] ss:$8 sps:$4 sm:$0xff]   ;;  %v6786_v34 = vld [vmem:[%s8482_s5 + $0x354] ss:$8 sps:$4 sm:$0xff]  }
 0x389   : > { %5553 = vmatmul.mubr.bf16.vlgmr.msra.gmra.mrb[40].mxu0 %v3995_v58  ;;  %v4406_v30 = vrot.slane %v4398_v27, %v7043_v61  ;;  %v6783_v58 = vld [vmem:[%s8482_s5 + $0x164] ss:$8 sps:$4 sm:$0xff]   ;;  %v6778_v48 = vld [vmem:[%s8482_s5 + $0x340] ss:$8 sps:$4 sm:$0xff]   ;;  %v6837_v9 = vld [vmem:[%s8482_s5 + $0x1f4] ss:$8 sps:$4 sm:$0xff]  }
 0x38a   : > { %5564 = vmatpush1.bf16.msra.mxu0 %v6741_v35  ;;  %v6091_v27 = vld.sshfl [vmem:[#allocation4] sm:$0x12 pattern:$0x76325410] }
 0x38b   : > { %v6875_v42 = vld.sshfl [vmem:[#allocation4 + $0xc] sm:$0xf pattern:$0x76325410]  ;;  %5565 = vmatprep.subr.bf16.mxu0 %v6753_v28  ;;  %v6768_v28 = vld [vmem:[%s8482_s5 + $0x324] ss:$8 sps:$4 sm:$0xff]  }
 0x38c   : > { %v6106_v45 = vld.sshfl [vmem:[#allocation4 + $0x10] sm:$0x12 pattern:$0x76325410]  ;;  %v4224_v54 = vcombine.low %v6874_v55, %v6875_v42  ;;  %v6789_v55 = vld [vmem:[%s8482_s5 + $0x174] ss:$8 sps:$4 sm:$0xff]  }
 0x38d   : > { %v4381_v14 = vcombine.high %v6106_v45, %v6106_v45  ;;  %v6102_v19 = vld.sshfl [vmem:[#allocation4 + $0x10] sm:$0x13 pattern:$0x76325410]  ;;  %v6110_v39 = vrot.slane %v6106_v45, 9 }
 0x38e   : > { %5566 = vmatpush1.bf16.msra.mxu0 %v6751_v47  ;;  %v4266_v49 = vcombine.high %v6102_v19, %v6102_v19  ;;  %v4310_v17 = vshrl.u32 %v6102_v19, 16  ;;  %v4313_v60 = vshll.u32 %v6102_v19, 16  ;;  %5595 = vmatprep.mubr.bf16.mxu0 %v4224_v54  ;;  %v6787_v47 = vld [vmem:[%s8482_s5 + $0x170] ss:$8 sps:$4 sm:$0xff]   ;;  %v6793_v42 = vld [vmem:[%s8482_s5 + $0x180] ss:$8 sps:$4 sm:$0xff]  }
 0x38f   : > { %v4396_v6 = vrot.slane %v4381_v14, 7  ;;  %5567 = vmatprep.subr.bf16.mxu0 %v6759_v63  ;;  %v6772_v63 = vld [vmem:[%s8482_s5 + $0x330] ss:$8 sps:$4 sm:$0xff]   ;;  %v6801_v45 = vld [vmem:[%s8482_s5 + $0x194] ss:$8 sps:$4 sm:$0xff]  }
 0x390   : > { %v4312_v32 = vrot.slane %v4310_v17, 6  ;;  %v4315_v62 = vrot.slane %v4313_v60, 7  ;;  %v4319_v40 = vshll.u32 %v4266_v49, 16  ;;  %v6799_v14 = vld [vmem:[%s8482_s5 + $0x190] ss:$8 sps:$4 sm:$0xff]  }
 0x391   : > { %v4397_v59 = vsel %vm8152_vm9, %v6110_v39, %v4396_v6  ;;  %v6807_v19 = vld [vmem:[%s8482_s5 + $0x1a4] ss:$8 sps:$4 sm:$0xff]   ;;  %v6805_v49 = vld [vmem:[%s8482_s5 + $0x1a0] ss:$8 sps:$4 sm:$0xff]   ;;  %v6813_v17 = vld [vmem:[%s8482_s5 + $0x1b4] ss:$8 sps:$4 sm:$0xff]  }
 0x392   : > { %v4399_v31 = vcombine.low %v8160_v37, %v4397_v59  ;;  %v4316_v22 = vor.u32 %v4315_v62, %v4312_v32  ;;  %5568 = vmatpush1.bf16.msra.mxu0 %v6757_v2  ;;  %v4617_v29 = vcombine.low %v4397_v59, %v4615_v56  ;;  %v4321_v1 = vrot.slane %v4319_v40, 7  ;;  %v6784_v56 = vld [vmem:[%s8482_s5 + $0x350] ss:$8 sps:$4 sm:$0xff]   ;;  %v6792_v2 = vld [vmem:[%s8482_s5 + $0x364] ss:$8 sps:$4 sm:$0xff]  }
 0x393   : > { %5569 = vmatprep.subr.bf16.mxu0 %v6765_v44  ;;  %v6790_v60 = vld [vmem:[%s8482_s5 + $0x360] ss:$8 sps:$4 sm:$0xff]   ;;  %v6798_v54 = vld [vmem:[%s8482_s5 + $0x374] ss:$8 sps:$4 sm:$0xff]   ;;  %v6811_v39 = vld [vmem:[%s8482_s5 + $0x1b0] ss:$8 sps:$4 sm:$0xff]   ;;  %v4135_v40 = vcombine.high %v6091_v27, %v6091_v27 }
 0x394   : > { %v4413_v37 = vrot.slane %v4399_v31, %v7043_v61  ;;  %v4317_v26 = vrot.slane %v4316_v22, 2  ;;  %v8233_v51 = vrot.slane %v4617_v29, %v7043_v61  ;;  %v6819_v6 = vld [vmem:[%s8482_s5 + $0x1c4] ss:$8 sps:$4 sm:$0xff]   ;;  %v6796_v44 = vld [vmem:[%s8482_s5 + $0x370] ss:$8 sps:$4 sm:$0xff]   ;;  %v6095_v29 = vrot.slane %v6091_v27, 9 }
 0x395   : > { %v6804_v32 = vld [vmem:[%s8482_s5 + $0x384] ss:$8 sps:$4 sm:$0xff]   ;;  %v6817_v62 = vld [vmem:[%s8482_s5 + $0x1c0] ss:$8 sps:$4 sm:$0xff]   ;;  %v6825_v59 = vld [vmem:[%s8482_s5 + $0x1d4] ss:$8 sps:$4 sm:$0xff]  }
 0x396   : > { %v4414_v3 = vcombine.low %v4406_v30, %v4413_v37  ;;  %v4322_v0 = vsel %vm8135_vm11, %v4317_v26, %v4321_v1  ;;  %5570 = vmatpush1.bf16.msra.mxu0 %v6763_v46  ;;  %v4632_v4 = vcombine.low %v8229_v57, %v8233_v51  ;;  %v6802_v31 = vld [vmem:[%s8482_s5 + $0x380] ss:$8 sps:$4 sm:$0xff]   ;;  %v6810_v22 = vld [vmem:[%s8482_s5 + $0x394] ss:$8 sps:$4 sm:$0xff]   ;;  %v6823_v46 = vld [vmem:[%s8482_s5 + $0x1d0] ss:$8 sps:$4 sm:$0xff]  }
 0x397   : > { %v4324_v7 = vcombine.low %v8169_v21, %v4322_v0  ;;  %v4542_v16 = vcombine.low %v4322_v0, %v4540_v18  ;;  %5571 = vmatprep.subr.bf16.mxu0 %v6771_v23  ;;  %v4167_v30 = vrot.slane %v4135_v40, 7  ;;  %v6831_v18 = vld [vmem:[%s8482_s5 + $0x1e4] ss:$8 sps:$4 sm:$0xff]   ;;  %v6808_v23 = vld [vmem:[%s8482_s5 + $0x390] ss:$8 sps:$4 sm:$0xff]  }
 0x398   : > { %5638 = vmatprep.mubr.bf16.mxu1 %v4414_v3  ;;  %v6816_v37 = vld [vmem:[%s8482_s5 + $0x3a4] ss:$8 sps:$4 sm:$0xff]   ;;  %v6829_v26 = vld [vmem:[%s8482_s5 + $0x1e0] ss:$8 sps:$4 sm:$0xff]  }
 0x399   : > { %v4338_v53 = vrot.slane %v4324_v7, %v7043_v61  ;;  %v4556_v12 = vrot.slane %v4542_v16, %v7043_v61  ;;  %v4168_v1 = vsel %vm8152_vm9, %v6095_v29, %v4167_v30  ;;  %v6814_v3 = vld [vmem:[%s8482_s5 + $0x3a0] ss:$8 sps:$4 sm:$0xff]   ;;  %v6820_v7 = vld [vmem:[%s8482_s5 + $0x3b0] ss:$8 sps:$4 sm:$0xff]  }
 0x39a   : > { %5572 = vmatpush1.bf16.msra.mxu0 %v6769_v33  ;;  %v4181_v0 = vcombine.low %v4168_v1, %v8206_v15  ;;  %v6822_v33 = vld [vmem:[%s8482_s5 + $0x3b4] ss:$8 sps:$4 sm:$0xff]   ;;  %v6828_v15 = vld [vmem:[%s8482_s5 + $0x3c4] ss:$8 sps:$4 sm:$0xff]  }
 0x39b   : > { %v4339_v35 = vcombine.low %v4331_v20, %v4338_v53  ;;  %v4557_v21 = vcombine.low %v8185_v43, %v4556_v12  ;;  %5573 = vmatprep.subr.bf16.mxu0 %v6777_v10  ;;  %v6760_v43 = vld [vmem:[%s8482_s5 + $0x310] ss:$8 sps:$4 sm:$0xff]   ;;  %v6826_v20 = vld [vmem:[%s8482_s5 + $0x3c0] ss:$8 sps:$4 sm:$0xff]   ;;  %v6834_v53 = vld [vmem:[%s8482_s5 + $0x3d4] ss:$8 sps:$4 sm:$0xff]  }
 0x39c   : > { %v4189_v16 = vrot.slane %v4181_v0, %v7043_v61  ;;  %v6832_v61 = vld [vmem:[%s8482_s5 + $0x3d0] ss:$8 sps:$4 sm:$0xff]   ;;  %v6840_v12 = vld [vmem:[%s8482_s5 + $0x3e4] ss:$8 sps:$4 sm:$0xff]  }
 0x39d   : > { %5639 = vmatmul.mubr.bf16.vlgmr.msra.gmra.mrb[32].mxu1 %v4339_v35  ;;  %v6843_v35 = vld [vmem:[%s8482_s5 + $0x3f4] ss:$8 sps:$4 sm:$0xff]  }
 0x39e   : > { %5650 = vmatpush1.bf16.msra.mxu1 %v6754_v36  ;;  %5681 = vmatprep.mubr.bf16.mxu1 %v4557_v21  ;;  %v4197_v10 = vcombine.low %v4189_v16, %v8229_v57  ;;  %v6838_v36 = vld [vmem:[%s8482_s5 + $0x3e0] ss:$8 sps:$4 sm:$0xff]  }
 0x39f   : > { %5651 = vmatprep.subr.bf16.mxu1 %v6762_v5  ;;  %5574 = vmatpush1.bf16.msra.mxu0 %v6775_v8  ;;  %v6876_v21 = vld.sshfl [vmem:[#allocation4 + $0x10] sm:$0xf pattern:$0x76325410]  ;;  %v6841_v8 = vld [vmem:[%s8482_s5 + $0x3f0] ss:$8 sps:$4 sm:$0xff]  }
 0x3a0   : > { %5575 = vmatprep.subr.bf16.mxu0 %v6783_v58  ;;  %v6877_v5 = vld.sshfl [vmem:[#allocation4 + $0x8] sm:$0xf pattern:$0x76325410]  ;;  %v6848_v58 = vld [vmem:[%s8482_s5 + $0x404] ss:$8 sps:$4 sm:$0xff]  }
 0x3a2   : > { %5652 = vmatpush1.bf16.msra.mxu1 %v6760_v43  ;;  %v6846_v43 = vld [vmem:[%s8482_s5 + $0x400] ss:$8 sps:$4 sm:$0xff]  }
 0x3a3   : > { %5653 = vmatprep.subr.bf16.mxu1 %v6768_v28  ;;  %5576 = vmatpush1.bf16.msra.mxu0 %v6781_v50  ;;  %v4442_v28 = vcombine.low %v6877_v5, %v6876_v21  ;;  %v6851_v50 = vld [vmem:[%s8482_s5 + $0x414] ss:$8 sps:$4 sm:$0xff]  }
 0x3a4   : > { %5577 = vmatprep.subr.bf16.mxu0 %v6789_v55  ;;  %v6849_v55 = vld [vmem:[%s8482_s5 + $0x410] ss:$8 sps:$4 sm:$0xff]  }
 0x3a6   : > { %5654 = vmatpush1.bf16.msra.mxu1 %v6766_v13  ;;  %v6854_v13 = vld [vmem:[%s8482_s5 + $0x424] ss:$8 sps:$4 sm:$0xff]  }
 0x3a7   : > { %5655 = vmatprep.subr.bf16.mxu1 %v6774_v38  ;;  %5578 = vmatpush1.bf16.msra.mxu0 %v6787_v47  ;;  %v6852_v38 = vld [vmem:[%s8482_s5 + $0x420] ss:$8 sps:$4 sm:$0xff]   ;;  %v6857_v47 = vld [vmem:[%s8482_s5 + $0x434] ss:$8 sps:$4 sm:$0xff]  }
 0x3a8   : > { %5579 = vmatprep.subr.bf16.mxu0 %v6795_v24  ;;  %v6860_v24 = vld [vmem:[%s8482_s5 + $0x444] ss:$8 sps:$4 sm:$0xff]  }
 0x3aa   : > { %5656 = vmatpush1.bf16.msra.mxu1 %v6772_v63  ;;  %v6858_v63 = vld [vmem:[%s8482_s5 + $0x440] ss:$8 sps:$4 sm:$0xff]  }
 0x3ab   : > { %5657 = vmatprep.subr.bf16.mxu1 %v6780_v41  ;;  %5580 = vmatpush1.bf16.msra.mxu0 %v6793_v42  ;;  %v6863_v41 = vld [vmem:[%s8482_s5 + $0x454] ss:$8 sps:$4 sm:$0xff]   ;;  %v6861_v42 = vld [vmem:[%s8482_s5 + $0x450] ss:$8 sps:$4 sm:$0xff]  }
 0x3ac   : > { %5581 = vmatprep.subr.bf16.mxu0 %v6801_v45  ;;  %v6866_v45 = vld [vmem:[%s8482_s5 + $0x464] ss:$8 sps:$4 sm:$0xff]  }
 0x3ae   : > { %5658 = vmatpush1.bf16.msra.mxu1 %v6778_v48  ;;  %v6864_v48 = vld [vmem:[%s8482_s5 + $0x460] ss:$8 sps:$4 sm:$0xff]  }
 0x3af   : > { %5659 = vmatprep.subr.bf16.mxu1 %v6786_v34  ;;  %5582 = vmatpush1.bf16.msra.mxu0 %v6799_v14  ;;  %v6869_v34 = vld [vmem:[%s8482_s5 + $0x474] ss:$8 sps:$4 sm:$0xff]   ;;  %v6867_v14 = vld [vmem:[%s8482_s5 + $0x470] ss:$8 sps:$4 sm:$0xff]  }
 0x3b0   : > { %5583 = vmatprep.subr.bf16.mxu0 %v6807_v19 }
 0x3b2   : > { %5660 = vmatpush1.bf16.msra.mxu1 %v6784_v56 }
 0x3b3   : > { %5661 = vmatprep.subr.bf16.mxu1 %v6792_v2  ;;  %5584 = vmatpush1.bf16.msra.mxu0 %v6805_v49 }
 0x3b4   : > { %5585 = vmatprep.subr.bf16.mxu0 %v6813_v17  ;;  %v4792_v17 = vsub.s32 0, %v7036_v52 }
 0x3b6   : > { %5662 = vmatpush1.bf16.msra.mxu1 %v6790_v60  ;;  %v4788_v60 = vld [vmem:[%s8483_s6] sm:$0x3] }
 0x3b7   : > { %5663 = vmatprep.subr.bf16.mxu1 %v6798_v54  ;;  %5586 = vmatpush1.bf16.msra.mxu0 %v6811_v39  ;;  %v4796_v54 = vsub.s32 1, %v7036_v52  ;;  %v4793_v39 = vrot.slane %v4788_v60, %v4792_v17 }
 0x3b8   : > { %5587 = vmatprep.subr.bf16.mxu0 %v6819_v6 }
 0x3b9   : > { %v4797_v6 = vrot.slane %v4788_v60, %v4796_v54 }
 0x3ba   : > { %5664 = vmatpush1.bf16.msra.mxu1 %v6796_v44 }
 0x3bb   : > { %5665 = vmatprep.subr.bf16.mxu1 %v6804_v32  ;;  %5588 = vmatpush1.bf16.msra.mxu0 %v6817_v62 }
 0x3bc   : > { %5589 = vmatprep.subr.bf16.mxu0 %v6825_v59 }
 0x3be   : > { %5666 = vmatpush1.bf16.msra.mxu1 %v6802_v31 }
 0x3bf   : > { %5667 = vmatprep.subr.bf16.mxu1 %v6810_v22  ;;  %5590 = vmatpush1.bf16.msra.mxu0 %v6823_v46 }
 0x3c0   : > { %5591 = vmatprep.subr.bf16.mxu0 %v6831_v18 }
 0x3c2   : > { %5668 = vmatpush1.bf16.msra.mxu1 %v6808_v23 }
 0x3c3   : > { %5669 = vmatprep.subr.bf16.mxu1 %v6816_v37  ;;  %5592 = vmatpush1.bf16.msra.mxu0 %v6829_v26 }
 0x3c4   : > { %5593 = vmatprep.subr.bf16.mxu0 %v6837_v9 }
 0x3c6   : > { %5670 = vmatpush1.bf16.msra.mxu1 %v6814_v3 }
 0x3c7   : > { %5671 = vmatprep.subr.bf16.mxu1 %v6822_v33  ;;  %5594 = vmatpush1.bf16.msra.mxu0 %v6835_v11 }
 0x3ca   : > { %5672 = vmatpush1.bf16.msra.mxu1 %v6820_v7  ;;  %5596 = vmatmul.mubr.bf16.vlgmr.msra.gmra.mrb[40].mxu0 %v4197_v10 }
 0x3cb   : > { %5673 = vmatprep.subr.bf16.mxu1 %v6828_v15 }
 0x3ce   : > { %5674 = vmatpush1.bf16.msra.mxu1 %v6826_v20 }
 0x3cf   : > { %5675 = vmatprep.subr.bf16.mxu1 %v6834_v53 }
 0x3d2   : > { %5676 = vmatpush1.bf16.msra.mxu1 %v6832_v61 }
 0x3d3   : > { %5677 = vmatprep.subr.bf16.mxu1 %v6840_v12 }
 0x3d6   : > { %5678 = vmatpush1.bf16.msra.mxu1 %v6838_v36 }
 0x3d7   : > { %5679 = vmatprep.subr.bf16.mxu1 %v6843_v35 }
 0x3da   : > { %5680 = vmatpush1.bf16.msra.mxu1 %v6841_v8 }
 0x3db   : > { %5692 = vmatprep.subr.bf16.mxu1 %v6848_v58 }
 0x3dd   : > { %5682 = vmatmul.mubr.bf16.vlgmr.msra.gmra.mrb[32].mxu1 %v4442_v28 }
 0x3de   : > { %5693 = vmatpush1.bf16.msra.mxu1 %v6846_v43  ;;  %5724 = vmatprep.mubr.bf16.mxu1 %v6887_v25  ;;  %v6855_v25 = vld [vmem:[%s8482_s5 + $0x430] ss:$8 sps:$4 sm:$0xff]  }
 0x3df   : > { %5694 = vmatprep.subr.bf16.mxu1 %v6851_v50 }
 0x3e2   : > { %5695 = vmatpush1.bf16.msra.mxu1 %v6849_v55 }
 0x3e3   : > { %5696 = vmatprep.subr.bf16.mxu1 %v6854_v13 }
 0x3e6   : > { %5697 = vmatpush1.bf16.msra.mxu1 %v6852_v38 }
 0x3e7   : > { %5698 = vmatprep.subr.bf16.mxu1 %v6857_v47 }
 0x3ea   : > { %5699 = vmatpush1.bf16.msra.mxu1 %v6855_v25 }
 0x3eb   : > { %5700 = vmatprep.subr.bf16.mxu1 %v6860_v24 }
 0x3ee   : > { %5701 = vmatpush1.bf16.msra.mxu1 %v6858_v63 }
 0x3ef   : > { %5702 = vmatprep.subr.bf16.mxu1 %v6863_v41 }
 0x3f2   : > { %5703 = vmatpush1.bf16.msra.mxu1 %v6861_v42 }
 0x3f3   : > { %5704 = vmatprep.subr.bf16.mxu1 %v6866_v45 }
 0x3f6   : > { %5705 = vmatpush1.bf16.msra.mxu1 %v6864_v48 }
 0x3f7   : > { %5706 = vmatprep.subr.bf16.mxu1 %v6869_v34 }
 0x3fa   : > { %5707 = vmatpush1.bf16.msra.mxu1 %v6867_v14 }
 0x3fd   : > { %5725 = vmatmul.mubr.bf16.vlgmr.msra.gmra.mrb[32].mxu1 %v4632_v4 }
 0x49d   : > { %v5597_v19 = vpop.f32.mrb[40].mxu0 }
 0x49e   : > { %v5599_v56 = vpop.f32.mrb[41].mxu0  ;;  %v6517_v27 = vadd.f32 %v5597_v19, %v4793_v39 }
 0x49f   : > { %v5601_v2 = vpop.f32.mrb[42].mxu0  ;;  %v6519_v44 = vadd.f32 %v5599_v56, %v4797_v6 }
 0x4a0   : > { %v5603_v49 = vpop.f32.mrb[43].mxu0  ;;  %v6521_v57 = vadd.f32 %v5601_v2, %v4793_v39 }
 0x4a1   : > { %v6523_v62 = vadd.f32 %v5603_v49, %v4797_v6 }
 0x4d0   : > { %v5726_v32 = vpop.f32.mrb[32].mxu1 }
 0x4d1   : > { %v6518_v51 = vadd.f32 %v6517_v27, %v5726_v32  ;;  %v5728_v4 = vpop.f32.mrb[33].mxu1 }
 0x4d2   : > { %v6520_v40 = vadd.f32 %v6519_v44, %v5728_v4  ;;  %v5730_v59 = vpop.f32.mrb[34].mxu1 }
 0x4d3   : > { %v5735_v31 = vmax.f32 %v6518_v51, 0.0  ;;  %v6522_v22 = vadd.f32 %v6521_v57, %v5730_v59  ;;  %v5732_v46 = vpop.f32.mrb[35].mxu1 }
 0x4d4   : > { %v5736_v52 = vmax.f32 %v6520_v40, 0.0  ;;  %v6524_v29 = vadd.f32 %v6523_v62, %v5732_v46 }
 0x4d5   : > { %5739 = vst [vmem:[%s278_s28] sm:$0xff] %v5735_v31  ;;  %v5737_v30 = vmax.f32 %v6522_v22, 0.0 }
 0x4d6   : > { %5740 = vst [vmem:[%s278_s28 + $0x8] sm:$0xff] %v5736_v52  ;;  %v5738_v18 = vmax.f32 %v6524_v29, 0.0 }
 0x4d7   : > { %5741 = vst [vmem:[%s278_s28 + $0x10] sm:$0xff] %v5737_v30 }
 0x4d8   : > { %5742 = vst [vmem:[%s278_s28 + $0x18] sm:$0xff] %v5738_v18 }
 0x4d9 PF: > { %s17_s24 = sadd.s32 1, %s6884_s24  }
 0x4da   : > { %p14_p4 = scmp.ge.s32.totalorder %s17_s24, 4  }
 0x4dc   :  { %16 = sbr.rel (!%p14_p4) target bundleno = 1 (0x1), region = 84 }

</bundles_post_ra>
